<compile_context>
chip_gen: v7x
topology: tpu7x:2x2x1
jax: 0.10.0
libtpu: 0.0.40
codegen_flags: <defaults>
</compile_context>

<pallas_src>
import functools
import math

import jax
import jax.numpy as jnp
from jax import lax
from jax.experimental import pallas as pl
from jax.experimental.pallas import tpu as pltpu


def _round_up(a, b):
    return ((a + b - 1) // b) * b


def _device_kind():
    try:
        return jax.devices()[0].device_kind.lower()
    except Exception:
        return ""


def _physical_vmem_bytes():
    try:
        return int(pltpu.get_tpu_info().vmem_capacity_bytes)
    except Exception:
        return 64 * 1024 * 1024       # conservative (v7x-sized) fallback


# ----------------------------- Pallas kernel -------------------------------

def _fused_conv_kernel(x_ref, w_ref, ss_ref, o_ref, patch_ref, *,
                       ksize, stride, TOH, OW, C, relu, apply_scale):
    """One (batch n, spatial tile t, OC tile j) grid step.

    x_ref:     (P, Hs, Ws, C)  phase-split padded image of batch n (VMEM;
                               re-DMA'd only when n changes -> resident across
                               all spatial / OC tiles of that batch)
    w_ref:     (KH*KW*C, tn)   weights for one OC tile, tap-major K layout
    ss_ref:    (2, tn)         f32 [scale; shift] for this OC tile
    o_ref:     (1, TM, tn)     output tile (TM = TOH*OW rows)
    patch_ref: (TM, KH*KW*C)   VMEM scratch; built once per spatial tile
                               (at j == 0) and reused across all OC tiles.
    """
    t = pl.program_id(1)
    j = pl.program_id(2)
    TM = TOH * OW

    # Build the implicit-im2col patch tile once per spatial tile.  The tap
    # shifts (sublane relayouts) are paid once and amortized across all OC
    # tiles; taps are packed along the lane axis so K = KH*KW*C feeds the MXU.
    @pl.when(j == 0)
    def _build_patch():
        r0 = t * TOH
        for kh in range(ksize):
            for kw in range(ksize):
                ph = (kh % stride) * stride + (kw % stride)   # phase index
                qh = kh // stride
                qw = kw // stride
                win = x_ref[ph, pl.ds(r0 + qh, TOH), qw:qw + OW, :]  # (TOH,OW,C)
                col = (kh * ksize + kw) * C
                patch_ref[:, col:col + C] = win.reshape(TM, C)

    # Single big-K MXU matmul (K = KH*KW*C), f32 accumulation inside the MXU —
    # no per-tap partial sums through the VPU / store slots.
    acc = jnp.dot(patch_ref[...], w_ref[...],
                  preferred_element_type=jnp.float32)

    if apply_scale:                       # bf16 compute: BN scale in f32 epilogue
        acc = acc * ss_ref[0:1, :]
    acc = acc + ss_ref[1:2, :]            # bias / folded-BN shift (f32)
    if relu:
        acc = jnp.maximum(acc, 0.0)
    o_ref[0] = acc.astype(o_ref.dtype)


# ------------------------------- wrapper ------------------------------------

def _conv2d_pallas(x_nhwc, weight_oihw, scale, shift, *, stride, padding,
                   relu, compute_dtype=jnp.bfloat16, out_dtype=None):
    N, H, W, C = x_nhwc.shape
    OC, _, KH, KW = weight_oihw.shape
    k, s, p = KH, stride, padding
    OH = (H + 2 * p - k) // s + 1
    OW = (W + 2 * p - k) // s + 1
    if out_dtype is None:
        out_dtype = compute_dtype
    apply_scale = (scale is not None) and (
        jnp.dtype(compute_dtype) != jnp.dtype(jnp.float32))

    # --- OC tile width: generation aware (v5e MXU is 128-wide) -------------
    kind = _device_kind()
    is_v5e = ("v5 lite" in kind) or ("v5e" in kind) or ("v5litepod" in kind)
    if OC <= 128 or is_v5e:
        tn = 128
    else:
        rem = OC % 256
        tn = 256 if (rem == 0 or rem > 128) else 128
    OCp = _round_up(OC, tn)

    # --- spatial (output-row) tiling: keep f32 result tile <= ~128 KiB -----
    TM_target = max(8, (128 * 1024) // (tn * 4))
    TOH = min(OH, max(1, pl.cdiv(TM_target, OW)))
    if TOH < OH:
        unit = 8 // math.gcd(OW, 8)       # keep TM a sublane multiple
        TOH = min(OH, _round_up(TOH, unit))
    n_t = pl.cdiv(OH, TOH)
    if n_t == 1:
        TOH = OH
    OHp = n_t * TOH                       # padded output rows (sliced off later)
    TM = TOH * OW
    halo = (k - 1) // s

    # --- pad + (stride>1 only) phase-split -----------------------------------
    # xph[n, a*s+b, i, j, c] == x_padded[n, i*s + a, j*s + b, c]
    Hs = max(pl.cdiv(H + 2 * p, s), OHp + halo)
    Ws = max(pl.cdiv(W + 2 * p, s), OW + halo)
    xp = jnp.pad(x_nhwc, ((0, 0),
                          (p, p + Hs * s - (H + 2 * p)),
                          (p, p + Ws * s - (W + 2 * p)),
                          (0, 0)))
    P = s * s
    if s == 1:
        xph = xp                           # no extra HBM pass for stride 1
    else:
        xph = xp.reshape(N, Hs, s, Ws, s, C).transpose(0, 2, 4, 1, 3, 5)
    xph = xph.reshape(N * P, Hs, Ws, C).astype(compute_dtype)

    # --- weights: OIHW -> (KH*KW*C, OCp), tap-major K; scale handling --------
    Kdim = KH * KW * C
    w = weight_oihw.transpose(2, 3, 1, 0).reshape(Kdim, OC)
    if (scale is not None) and (not apply_scale):
        w = w * scale.reshape(1, OC)       # exact fold (f32 compute only)
    w = jnp.pad(w, ((0, 0), (0, OCp - OC))).astype(compute_dtype)
    scale_row = scale if scale is not None else jnp.ones((OC,), jnp.float32)
    ss = jnp.stack([jnp.pad(scale_row.astype(jnp.float32), (0, OCp - OC)),
                    jnp.pad(shift.astype(jnp.float32), (0, OCp - OC))])  # (2,OCp)

    # --- VMEM budget from actual block bytes (no hard-coded 48 MiB) ----------
    in_b = jnp.dtype(compute_dtype).itemsize
    x_block = P * Hs * Ws * C * in_b
    w_block = Kdim * tn * in_b
    ss_block = 2 * tn * 4
    o_block = TM * tn * jnp.dtype(out_dtype).itemsize
    scratch = TM * Kdim * in_b + TM * tn * 4
    vmem_needed = 2 * (x_block + w_block + ss_block + o_block) + scratch
    vmem_limit = max(int(1.25 * vmem_needed) + (8 << 20), 32 << 20)
    vmem_limit = min(vmem_limit, int(0.75 * _physical_vmem_bytes()))

    grid = (N, n_t, OCp // tn)             # OC tiles innermost -> patch reuse
    out = pl.pallas_call(
        functools.partial(_fused_conv_kernel, ksize=k, stride=s, TOH=TOH,
                          OW=OW, C=C, relu=relu, apply_scale=apply_scale),
        out_shape=jax.ShapeDtypeStruct((N, OHp * OW, OCp), out_dtype),
        grid_spec=pltpu.PrefetchScalarGridSpec(
            num_scalar_prefetch=0,
            grid=grid,
            in_specs=[
                # whole phase-split image of batch n; DMA only when n changes
                pl.BlockSpec((P, Hs, Ws, C), lambda n, t, j: (n, 0, 0, 0)),
                pl.BlockSpec((Kdim, tn), lambda n, t, j: (0, j)),
                pl.BlockSpec((2, tn), lambda n, t, j: (0, j)),
            ],
            out_specs=pl.BlockSpec((1, TM, tn), lambda n, t, j: (n, t, j)),
            scratch_shapes=[pltpu.VMEM((TM, Kdim), compute_dtype)],
        ),
        compiler_params=pltpu.CompilerParams(
            # split the two v7x TensorCores on N (distinct image bytes), not
            # on OC tiles (which would duplicate the activation DMA)
            dimension_semantics=("parallel", "arbitrary", "arbitrary"),
            vmem_limit_bytes=vmem_limit),
    )(xph, w, ss)

    return out[:, :OH * OW, :OC].reshape(N, OH, OW, OC)   # NHWC


# ------------------------------ Conv2d module ------------------------------

class Conv2dPallas:
    """Mirror of the PyTorch Conv2d wrapper (conv -> [bn] -> [relu])."""

    def __init__(self, in_channels, out_channels, kernel_size, stride=1,
                 relu=True, same_padding=False, bn=False, *, key,
                 compute_dtype=jnp.bfloat16, out_dtype=None):
        self.in_channels = in_channels
        self.out_channels = out_channels
        self.kernel_size = kernel_size
        self.stride = stride
        self.padding = int((kernel_size - 1) / 2) if same_padding else 0
        self.relu = relu
        self.use_bn = bn
        self.compute_dtype = compute_dtype
        self.out_dtype = out_dtype if out_dtype is not None else compute_dtype

        k0, k1, k2, k3, k4, k5 = jax.random.split(key, 6)
        fan_in = in_channels * kernel_size * kernel_size
        bound = 1.0 / jnp.sqrt(fan_in)
        # deterministic synthetic parameters (PyTorch-like uniform init)
        self.weight = jax.random.uniform(
            k0, (out_channels, in_channels, kernel_size, kernel_size),
            jnp.float32, -bound, bound)                      # OIHW
        self.bias = jax.random.uniform(k1, (out_channels,), jnp.float32,
                                       -bound, bound)
        if bn:
            # eval-mode BatchNorm2d(eps=0.001) with synthetic running stats
            self.gamma = 1.0 + 0.1 * jax.random.normal(k2, (out_channels,), jnp.float32)
            self.beta = 0.1 * jax.random.normal(k3, (out_channels,), jnp.float32)
            self.running_mean = 0.1 * jax.random.normal(k4, (out_channels,), jnp.float32)
            self.running_var = jnp.abs(1.0 + 0.1 * jax.random.normal(k5, (out_channels,), jnp.float32))
            self.eps = 1e-3

    def __call__(self, x):
        # x: NCHW float32
        if self.use_bn:
            bn_scale = self.gamma / jnp.sqrt(self.running_var + self.eps)
            scale = bn_scale
            shift = (self.bias - self.running_mean) * bn_scale + self.beta
        else:
            scale = None                  # no per-OC multiply at all
            shift = self.bias

        x_nhwc = x.transpose(0, 2, 3, 1)
        y = _conv2d_pallas(x_nhwc, self.weight, scale, shift,
                           stride=self.stride, padding=self.padding,
                           relu=self.relu, compute_dtype=self.compute_dtype,
                           out_dtype=self.out_dtype)
        # back to NCHW to preserve the PyTorch module's layout contract
        return y.transpose(0, 3, 1, 2)


# ------------------------------- reference ---------------------------------

def _reference(mod, x):
    y = lax.conv_general_dilated(
        x, mod.weight,
        window_strides=(mod.stride, mod.stride),
        padding=[(mod.padding, mod.padding)] * 2,
        dimension_numbers=("NCHW", "OIHW", "NCHW"))
    y = y + mod.bias.reshape(1, -1, 1, 1)
    if mod.use_bn:
        y = (y - mod.running_mean.reshape(1, -1, 1, 1)) / jnp.sqrt(
            mod.running_var.reshape(1, -1, 1, 1) + mod.eps)
        y = y * mod.gamma.reshape(1, -1, 1, 1) + mod.beta.reshape(1, -1, 1, 1)
    if mod.relu:
        y = jnp.maximum(y, 0.0)
    return y


# --------------------------------- main -------------------------------------

if __name__ == "__main__":
    key = jax.random.PRNGKey(0)
    kx, kp1, kp2 = jax.random.split(key, 3)

    x = jax.random.normal(kx, (2, 4, 16, 16), jnp.float32)   # NCHW

    # config 1: conv3x3 same-padding + BN + ReLU, bf16 MXU inputs (f32 acc,
    # BN scale applied in f32 epilogue, bf16 output writeback)
    m1 = Conv2dPallas(4, 8, 3, stride=1, relu=True, same_padding=True, bn=True,
                      key=kp1, compute_dtype=jnp.bfloat16)
    y1 = jax.block_until_ready(m1(x))
    r1 = _reference(m1, x)
    assert y1.shape == r1.shape == (2, 8, 16, 16)
    assert bool(jnp.allclose(y1, r1, atol=5e-2, rtol=5e-2))   # bf16 quantization

    # config 2: defaults (no padding, no BN, ReLU), stride 2, f32 compute
    m2 = Conv2dPallas(4, 8, 3, stride=2, relu=True, same_padding=False, bn=False,
                      key=kp2, compute_dtype=jnp.float32)
    y2 = jax.block_until_ready(m2(x))
    r2 = _reference(m2, x)
    assert y2.shape == r2.shape == (2, 8, 7, 7)
    assert bool(jnp.allclose(y2, r2, atol=1e-4, rtol=1e-4))

    print("KERNEL_OK")
</pallas_src>

<mosaic_0001>
module attributes {stable_mosaic.version = 11 : i64} {
  func.func @_fused_conv_kernel(%arg0: i32, %arg1: i32, %arg2: i32, %arg3: memref<1x18x18x4xbf16, #tpu.memory_space<vmem>>, %arg4: memref<36x128xbf16, #tpu.memory_space<vmem>>, %arg5: memref<2x128xf32, #tpu.memory_space<vmem>>, %arg6: memref<1x256x128xbf16, #tpu.memory_space<vmem>>, %arg7: memref<256x36xbf16, #tpu.memory_space<vmem>>) attributes {dimension_semantics = [#tpu.dimension_semantics<parallel>, #tpu.dimension_semantics<arbitrary>, #tpu.dimension_semantics<arbitrary>], iteration_bounds = array<i64: 2, 1, 1>, scalar_prefetch = 0 : i64, scratch_operands = 1 : i64, tpu.core_type = #tpu.core_type<tc>, window_params = [{transform_indices = @transform_0, window_bounds = array<i64: 1, 18, 18, 4>}, {transform_indices = @transform_1, window_bounds = array<i64: 36, 128>}, {transform_indices = @transform_2, window_bounds = array<i64: 2, 128>}, {transform_indices = @transform_3, window_bounds = array<i64: 1, 256, 128>}]} {
    %c0_i32 = arith.constant 0 : i32
    %0 = arith.cmpi eq, %arg2, %c0_i32 : i32
    %1 = arith.extui %0 : i1 to i32
    %c0_i32_0 = arith.constant 0 : i32
    %2 = arith.cmpi ne, %1, %c0_i32_0 : i32
    scf.if %2 {
      %c16_i32 = arith.constant 16 : i32
      %18 = arith.muli %arg1, %c16_i32 : i32
      %c0_i32_11 = arith.constant 0 : i32
      %19 = arith.addi %18, %c0_i32_11 : i32
      %c0_12 = arith.constant 0 : index
      %20 = arith.index_cast %19 : i32 to index
      %c0_13 = arith.constant 0 : index
      %c0_14 = arith.constant 0 : index
      %21 = vector.load %arg3[%c0_12, %20, %c0_13, %c0_14] : memref<1x18x18x4xbf16, #tpu.memory_space<vmem>>, vector<1x16x16x4xbf16>
      %22 = vector.shape_cast %21 : vector<1x16x16x4xbf16> to vector<16x16x4xbf16>
      %23 = vector.shape_cast %22 : vector<16x16x4xbf16> to vector<256x4xbf16>
      %c0_15 = arith.constant 0 : index
      %c0_16 = arith.constant 0 : index
      %24 = vector.load %arg7[%c0_15, %c0_16] : memref<256x36xbf16, #tpu.memory_space<vmem>>, vector<256x4xbf16>
      tpu.vector_store %arg7[%c0_15, %c0_16], %23 {strides = array<i32>} : memref<256x36xbf16, #tpu.memory_space<vmem>>, vector<256x4xbf16>,
      %c0_i32_17 = arith.constant 0 : i32
      %25 = arith.addi %18, %c0_i32_17 : i32
      %c0_18 = arith.constant 0 : index
      %26 = arith.index_cast %25 : i32 to index
      %c1_19 = arith.constant 1 : index
      %c0_20 = arith.constant 0 : index
      %27 = vector.load %arg3[%c0_18, %26, %c1_19, %c0_20] : memref<1x18x18x4xbf16, #tpu.memory_space<vmem>>, vector<1x16x16x4xbf16>
      %28 = vector.shape_cast %27 : vector<1x16x16x4xbf16> to vector<16x16x4xbf16>
      %29 = vector.shape_cast %28 : vector<16x16x4xbf16> to vector<256x4xbf16>
      %c0_21 = arith.constant 0 : index
      %c4 = arith.constant 4 : index
      %30 = vector.load %arg7[%c0_21, %c4] : memref<256x36xbf16, #tpu.memory_space<vmem>>, vector<256x4xbf16>
      tpu.vector_store %arg7[%c0_21, %c4], %29 {strides = array<i32>} : memref<256x36xbf16, #tpu.memory_space<vmem>>, vector<256x4xbf16>,
      %c0_i32_22 = arith.constant 0 : i32
      %31 = arith.addi %18, %c0_i32_22 : i32
      %c0_23 = arith.constant 0 : index
      %32 = arith.index_cast %31 : i32 to index
      %c2 = arith.constant 2 : index
      %c0_24 = arith.constant 0 : index
      %33 = vector.load %arg3[%c0_23, %32, %c2, %c0_24] : memref<1x18x18x4xbf16, #tpu.memory_space<vmem>>, vector<1x16x16x4xbf16>
      %34 = vector.shape_cast %33 : vector<1x16x16x4xbf16> to vector<16x16x4xbf16>
      %35 = vector.shape_cast %34 : vector<16x16x4xbf16> to vector<256x4xbf16>
      %c0_25 = arith.constant 0 : index
      %c8 = arith.constant 8 : index
      %36 = vector.load %arg7[%c0_25, %c8] : memref<256x36xbf16, #tpu.memory_space<vmem>>, vector<256x4xbf16>
      tpu.vector_store %arg7[%c0_25, %c8], %35 {strides = array<i32>} : memref<256x36xbf16, #tpu.memory_space<vmem>>, vector<256x4xbf16>,
      %c1_i32 = arith.constant 1 : i32
      %37 = arith.addi %18, %c1_i32 : i32
      %c0_26 = arith.constant 0 : index
      %38 = arith.index_cast %37 : i32 to index
      %c0_27 = arith.constant 0 : index
      %c0_28 = arith.constant 0 : index
      %39 = vector.load %arg3[%c0_26, %38, %c0_27, %c0_28] : memref<1x18x18x4xbf16, #tpu.memory_space<vmem>>, vector<1x16x16x4xbf16>
      %40 = vector.shape_cast %39 : vector<1x16x16x4xbf16> to vector<16x16x4xbf16>
      %41 = vector.shape_cast %40 : vector<16x16x4xbf16> to vector<256x4xbf16>
      %c0_29 = arith.constant 0 : index
      %c12 = arith.constant 12 : index
      %42 = vector.load %arg7[%c0_29, %c12] : memref<256x36xbf16, #tpu.memory_space<vmem>>, vector<256x4xbf16>
      tpu.vector_store %arg7[%c0_29, %c12], %41 {strides = array<i32>} : memref<256x36xbf16, #tpu.memory_space<vmem>>, vector<256x4xbf16>,
      %c1_i32_30 = arith.constant 1 : i32
      %43 = arith.addi %18, %c1_i32_30 : i32
      %c0_31 = arith.constant 0 : index
      %44 = arith.index_cast %43 : i32 to index
      %c1_32 = arith.constant 1 : index
      %c0_33 = arith.constant 0 : index
      %45 = vector.load %arg3[%c0_31, %44, %c1_32, %c0_33] : memref<1x18x18x4xbf16, #tpu.memory_space<vmem>>, vector<1x16x16x4xbf16>
      %46 = vector.shape_cast %45 : vector<1x16x16x4xbf16> to vector<16x16x4xbf16>
      %47 = vector.shape_cast %46 : vector<16x16x4xbf16> to vector<256x4xbf16>
      %c0_34 = arith.constant 0 : index
      %c16 = arith.constant 16 : index
      %48 = vector.load %arg7[%c0_34, %c16] : memref<256x36xbf16, #tpu.memory_space<vmem>>, vector<256x4xbf16>
      tpu.vector_store %arg7[%c0_34, %c16], %47 {strides = array<i32>} : memref<256x36xbf16, #tpu.memory_space<vmem>>, vector<256x4xbf16>,
      %c1_i32_35 = arith.constant 1 : i32
      %49 = arith.addi %18, %c1_i32_35 : i32
      %c0_36 = arith.constant 0 : index
      %50 = arith.index_cast %49 : i32 to index
      %c2_37 = arith.constant 2 : index
      %c0_38 = arith.constant 0 : index
      %51 = vector.load %arg3[%c0_36, %50, %c2_37, %c0_38] : memref<1x18x18x4xbf16, #tpu.memory_space<vmem>>, vector<1x16x16x4xbf16>
      %52 = vector.shape_cast %51 : vector<1x16x16x4xbf16> to vector<16x16x4xbf16>
      %53 = vector.shape_cast %52 : vector<16x16x4xbf16> to vector<256x4xbf16>
      %c0_39 = arith.constant 0 : index
      %c20 = arith.constant 20 : index
      %54 = vector.load %arg7[%c0_39, %c20] : memref<256x36xbf16, #tpu.memory_space<vmem>>, vector<256x4xbf16>
      tpu.vector_store %arg7[%c0_39, %c20], %53 {strides = array<i32>} : memref<256x36xbf16, #tpu.memory_space<vmem>>, vector<256x4xbf16>,
      %c2_i32 = arith.constant 2 : i32
      %55 = arith.addi %18, %c2_i32 : i32
      %c0_40 = arith.constant 0 : index
      %56 = arith.index_cast %55 : i32 to index
      %c0_41 = arith.constant 0 : index
      %c0_42 = arith.constant 0 : index
      %57 = vector.load %arg3[%c0_40, %56, %c0_41, %c0_42] : memref<1x18x18x4xbf16, #tpu.memory_space<vmem>>, vector<1x16x16x4xbf16>
      %58 = vector.shape_cast %57 : vector<1x16x16x4xbf16> to vector<16x16x4xbf16>
      %59 = vector.shape_cast %58 : vector<16x16x4xbf16> to vector<256x4xbf16>
      %c0_43 = arith.constant 0 : index
      %c24 = arith.constant 24 : index
      %60 = vector.load %arg7[%c0_43, %c24] : memref<256x36xbf16, #tpu.memory_space<vmem>>, vector<256x4xbf16>
      tpu.vector_store %arg7[%c0_43, %c24], %59 {strides = array<i32>} : memref<256x36xbf16, #tpu.memory_space<vmem>>, vector<256x4xbf16>,
      %c2_i32_44 = arith.constant 2 : i32
      %61 = arith.addi %18, %c2_i32_44 : i32
      %c0_45 = arith.constant 0 : index
      %62 = arith.index_cast %61 : i32 to index
      %c1_46 = arith.constant 1 : index
      %c0_47 = arith.constant 0 : index
      %63 = vector.load %arg3[%c0_45, %62, %c1_46, %c0_47] : memref<1x18x18x4xbf16, #tpu.memory_space<vmem>>, vector<1x16x16x4xbf16>
      %64 = vector.shape_cast %63 : vector<1x16x16x4xbf16> to vector<16x16x4xbf16>
      %65 = vector.shape_cast %64 : vector<16x16x4xbf16> to vector<256x4xbf16>
      %c0_48 = arith.constant 0 : index
      %c28 = arith.constant 28 : index
      %66 = vector.load %arg7[%c0_48, %c28] : memref<256x36xbf16, #tpu.memory_space<vmem>>, vector<256x4xbf16>
      tpu.vector_store %arg7[%c0_48, %c28], %65 {strides = array<i32>} : memref<256x36xbf16, #tpu.memory_space<vmem>>, vector<256x4xbf16>,
      %c2_i32_49 = arith.constant 2 : i32
      %67 = arith.addi %18, %c2_i32_49 : i32
      %c0_50 = arith.constant 0 : index
      %68 = arith.index_cast %67 : i32 to index
      %c2_51 = arith.constant 2 : index
      %c0_52 = arith.constant 0 : index
      %69 = vector.load %arg3[%c0_50, %68, %c2_51, %c0_52] : memref<1x18x18x4xbf16, #tpu.memory_space<vmem>>, vector<1x16x16x4xbf16>
      %70 = vector.shape_cast %69 : vector<1x16x16x4xbf16> to vector<16x16x4xbf16>
      %71 = vector.shape_cast %70 : vector<16x16x4xbf16> to vector<256x4xbf16>
      %c0_53 = arith.constant 0 : index
      %c32 = arith.constant 32 : index
      %72 = vector.load %arg7[%c0_53, %c32] : memref<256x36xbf16, #tpu.memory_space<vmem>>, vector<256x4xbf16>
      tpu.vector_store %arg7[%c0_53, %c32], %71 {strides = array<i32>} : memref<256x36xbf16, #tpu.memory_space<vmem>>, vector<256x4xbf16>,
    } else {
    }
    %c0 = arith.constant 0 : index
    %c0_1 = arith.constant 0 : index
    %3 = vector.load %arg7[%c0, %c0_1] : memref<256x36xbf16, #tpu.memory_space<vmem>>, vector<256x36xbf16>
    %c0_2 = arith.constant 0 : index
    %c0_3 = arith.constant 0 : index
    %4 = vector.load %arg4[%c0_2, %c0_3] : memref<36x128xbf16, #tpu.memory_space<vmem>>, vector<36x128xbf16>
    %cst = arith.constant dense<0.000000e+00> : vector<256x128xf32>
    %5 = tpu.matmul %3, %4, %cst {dimension_numbers = #tpu.dot_dimension_numbers<[1], [0], [0], [1], [0, 0, 1, 1], [], []>} : vector<256x36xbf16>, vector<36x128xbf16>, vector<256x128xf32> -> vector<256x128xf32>
    %c0_4 = arith.constant 0 : index
    %c0_5 = arith.constant 0 : index
    %6 = vector.load %arg5[%c0_4, %c0_5] : memref<2x128xf32, #tpu.memory_space<vmem>>, vector<1x128xf32>
    %7 = vector.broadcast %6 : vector<1x128xf32> to vector<256x128xf32>
    %8 = arith.mulf %5, %7 : vector<256x128xf32>
    %c1 = arith.constant 1 : index
    %c0_6 = arith.constant 0 : index
    %9 = vector.load %arg5[%c1, %c0_6] : memref<2x128xf32, #tpu.memory_space<vmem>>, vector<1x128xf32>
    %10 = vector.broadcast %9 : vector<1x128xf32> to vector<256x128xf32>
    %11 = arith.addf %8, %10 : vector<256x128xf32>
    %cst_7 = arith.constant 0.000000e+00 : f32
    %12 = vector.broadcast %cst_7 : f32 to vector<256x128xf32>
    %13 = arith.maximumf %11, %12 : vector<256x128xf32>
    %14 = arith.truncf %13 : vector<256x128xf32> to vector<256x128xbf16>
    %c0_8 = arith.constant 0 : index
    %c0_9 = arith.constant 0 : index
    %c0_10 = arith.constant 0 : index
    %15 = vector.load %arg6[%c0_8, %c0_9, %c0_10] : memref<1x256x128xbf16, #tpu.memory_space<vmem>>, vector<1x256x128xbf16>
    %16 = vector.shape_cast %15 : vector<1x256x128xbf16> to vector<256x128xbf16>
    %17 = vector.shape_cast %14 : vector<256x128xbf16> to vector<1x256x128xbf16>
    tpu.vector_store %arg6[%c0_8, %c0_9, %c0_10], %17 {strides = array<i32>} : memref<1x256x128xbf16, #tpu.memory_space<vmem>>, vector<1x256x128xbf16>,
    return
  }
  func.func @transform_0(%arg0: i32, %arg1: i32, %arg2: i32) -> (i32, i32, i32, i32) {
    %c0_i32 = arith.constant 0 : i32
    %c0_i32_0 = arith.constant 0 : i32
    %c0_i32_1 = arith.constant 0 : i32
    %c0_i32_2 = arith.constant 0 : i32
    return %arg0, %c0_i32, %c0_i32_0, %c0_i32_1 : i32, i32, i32, i32
  }
  func.func @transform_1(%arg0: i32, %arg1: i32, %arg2: i32) -> (i32, i32) {
    %c0_i32 = arith.constant 0 : i32
    %c0_i32_0 = arith.constant 0 : i32
    return %c0_i32, %arg2 : i32, i32
  }
  func.func @transform_2(%arg0: i32, %arg1: i32, %arg2: i32) -> (i32, i32) {
    %c0_i32 = arith.constant 0 : i32
    %c0_i32_0 = arith.constant 0 : i32
    return %c0_i32, %arg2 : i32, i32
  }
  func.func @transform_3(%arg0: i32, %arg1: i32, %arg2: i32) -> (i32, i32, i32) {
    %c0_i32 = arith.constant 0 : i32
    return %arg0, %arg1, %arg2 : i32, i32, i32
  }
}

</mosaic_0001>

<bundles_post_ra>
// kernel: tpu_custom_call.1
= control target key start
LH: loop header
LB: loop body
LE: loop exit
PB: predicated region body
PF: predicated region fallthrough
CT: control target
= control target key end

     0   :  { %8 = vsyncpa [#allocation4], 0  ;;  %s6243_s0 = inlined_call_operand.vmem [shape: bf16[2,18,18,4], index: 0, kind: input, shape index: {}]   ;;  %s6244_s1 = inlined_call_operand.vmem [shape: bf16[36,128], index: 1, kind: input, shape index: {}]   ;;  %s6245_s2 = inlined_call_operand.vmem [shape: f32[2,128], index: 2, kind: input, shape index: {}]   ;;  %s6246_s3 = inlined_call_operand.hbm [shape: bf16[2,256,128], index: 3, kind: output, shape index: {}]  }
   0x1   :  { %10 = vsyncpa [#allocation4 + $0x1], 0  ;;  %s4931_s12 = smov 0   ;;  %s4933_s13 = smov 0  }
   0x2   :  { %s4935_s14 = smov 0   ;;  %s4937_s15 = smov 0  }
   0x3   :  { %s4939_s16 = smov 0   ;;  %s4941_s17 = smov 0  }
   0x4 LB: > { %s3997_s18 = sadd.s32 4294967295, %s4899_s17   ;;  %s3998_s19 = sadd.s32 4294967294, %s4899_s17   ;;  %s4899_s17 = sphi %s4941_s17, %s16_s17   ;;  %s4895_s16 = sphi %s4939_s16, %s6257_s16   ;;  %s4891_s15 = sphi %s4937_s15, %s6256_s15   ;;  %s4887_s14 = sphi %s4935_s14, %s6255_s14   ;;  %s4883_s13 = sphi %s4933_s13, %s6254_s13   ;;  %s4879_s12 = sphi %s4931_s12, %s6253_s12  }
   0x5   : > { %s35_s20 = sadd.s32 1, %s4895_s16  ;;  %s124_s21 = sadd.s32 1, %s4887_s14 }
   0x6   : > { %p37_p0 = scmp.ge.s32.totalorder %s35_s20, 2  ;;  %p134_p1 = scmp.ne.s32.totalorder %s4887_s14, %s4883_s13 }
   0x7   : > { %p135_p2 = scmp.eq.s32.totalorder %s3997_s18, 1  ;;  %p140_p3 = scmp.ne.s32.totalorder %s4883_s13, %s4879_s12 }
   0x8   : > { %s6259_s20 = smov (%p37_p0, %s35_s20), 0  ;;  %p141_p5 = scmp.eq.s32.totalorder %s3998_s19, 1 }
   0x9   : > { %p4971_p4 = por %p135_p2, %p134_p1  ;;  %s117_s23 = ssub.s32 %s4895_s16, %s6259_s20 }
   0xa   : > { %p4003_p6 = scmp.ge.s32.totalorder %s4899_s17, 1  ;;  %p122_p7 = scmp.eq.s32.totalorder %s117_s23, 0 }
   0xb   : > { %p4978_p8 = por %p141_p5, %p140_p3  ;;  %p181_p9 = scmp.lt.s32.totalorder %s4899_s17, 3 }
   0xc   : > { %s4984_s25 = scalar_select %p122_p7, %s4887_s14, %s124_s21  }
   0xd   : > { %p182_p10 = pnand %p4003_p6, %p181_p9 }
   0xe   : > { %p213_p11 = scmp.lt.s32.totalorder (!%p182_p10), %s4891_s15, 1  ;;  %vm1025_vm0 = vcmask (!%p182_p10), 1042432   ;;  %vm1026_vm1 = vcmask (!%p182_p10), 1046532   ;;  %s4901_s4 = smov (!%p182_p10), 12   ;;  %vm429_vm3 = vsmask.f32 (!%p182_p10), 3328 }
   0xf   : > { %185 = sbr.rel (%p182_p10) target bundleno = 688 (0x2b0), region = 32  ;;  %vm4993_vm2 = vmor (!%p182_p10), %vm1025_vm0, %vm1026_vm1  ;;  %vm430_vm4 = vsmask.f32 (!%p182_p10), 7440  ;;  %s4902_s5 = smov (!%p182_p10), 8   ;;  %vm364_vm6 = vcmask (!%p182_p10), 31744   ;;  %vm912_vm7 = vcmask (!%p182_p10), 64544  }
  0x10   : > { %vm5043_vm5 = vmor (!%p182_p10), %vm429_vm3, %vm430_vm4  ;;  %s4903_s6 = smov (!%p182_p10), 4   ;;  %s4904_s7 = smov (!%p182_p10), 16   ;;  %vm1236_vm8 = vcmask (!%p182_p10), 97344   ;;  %vm1417_vm9 = vcmask (!%p182_p10), 130144   ;;  %vm1962_vm10 = vcmask (!%p182_p10), 162944   ;;  %vm2283_vm11 = vcmask (!%p182_p10), 195744  }
  0x11   : > { %s4905_s8 = smov (!%p182_p10), 20   ;;  %s4906_s9 = smov (!%p182_p10), 24   ;;  %vm2464_vm12 = vcmask (!%p182_p10), 228544   ;;  %vm3009_vm13 = vcmask (!%p182_p10), 261344   ;;  %vm3330_vm14 = vcmask (!%p182_p10), 294144   ;;  %vm3383_vm15 = vcmask (!%p182_p10), 293888  }
  0x12   : > { %s4907_s10 = smov (!%p182_p10), 28   ;;  %s4908_s11 = smov (!%p182_p10), 32   ;;  %vm3432_vm0 = vcmask (!%p182_p10), 1041408  }
  0x13   : > { %s4909_s23 = smov (!%p182_p10), [#allocation3]  }
  0x16   : > { %s214_s26 = scalar_select %p213_p11, %s4891_s15, 1 }
  0x18   : > { %s4705_s27 = smul.u32 216, %s214_s26  ;;  %s4825_s26 = sshll.u32 %s4909_s23, 4  ;;  %s4826_s26 = int_to_ptr.vmem [resolvable:$false] %s4825_s26 }
  0x1a   : > { %s4991_s30 = scalar_lea.vmem %s6243_s0, %s4705_s27  ;;  %s4827_s27 = scalar_lea.vmem %s4826_s26, 4096 }
  0x1b   : > { %v4770_v1 = vld [vmem:[%s4991_s30 + $0x6c] sm:$0xff]   ;;  %v953_v3 = vld [vmem:[%s4991_s30 + $0x60] sm:$0xe]  ;;  %v954_v4 = vld [vmem:[%s4991_s30 + $0x64] sm:$0xf] }
  0x1c   : > { %v4771_v2 = vld [vmem:[%s4991_s30 + $0xc] sm:$0xff]   ;;  %1385 = vrot.lane.b32.xlu1 %v4770_v1, %s4901_s4  ;;  %v955_v5 = vld [vmem:[%s4991_s30 + $0x68] sm:$0x1]  ;;  %v4046_v6 = vrot.slane %v953_v3, 9  ;;  %v1086_v7 = vrot.slane %v954_v4, 5 }
  0x1d   : > { %1369 = vrot.lane.b32.xlu0 %v4771_v2, %s4901_s4  ;;  %v1089_v8 = vrot.slane %v955_v5, 5  ;;  %v929_v9 = vld [vmem:[%s4991_s30] sm:$0xe]  ;;  %v930_v10 = vld [vmem:[%s4991_s30 + $0x4] sm:$0xf] }
  0x1e   : > { %v931_v11 = vld [vmem:[%s4991_s30 + $0x8] sm:$0x1]  ;;  %v4038_v12 = vrot.slane %v929_v9, 9  ;;  %v1087_v13 = vsel %vm4993_vm2, %v4046_v6, %v1086_v7  ;;  %v1088_v14 = vrot.slane %v1086_v7, 4  ;;  %v1030_v15 = vrot.slane %v930_v10, 5 }
  0x1f   : > { %v1033_v16 = vrot.slane %v931_v11, 5  ;;  %v956_v17 = vld [vmem:[%s4991_s30 + $0x6c] sm:$0xe]  ;;  %v957_v18 = vld [vmem:[%s4991_s30 + $0x70] sm:$0xf] }
  0x20   : > { %v958_v19 = vld [vmem:[%s4991_s30 + $0x74] sm:$0x1]  ;;  %v4047_v20 = vrot.slane %v956_v17, 9  ;;  %v1090_v21 = vsel %vm4993_vm2, %v1088_v14, %v1089_v8  ;;  %v1031_v22 = vsel %vm4993_vm2, %v4038_v12, %v1030_v15  ;;  %v1032_v23 = vrot.slane %v1030_v15, 4  ;;  %v932_v25 = vld [vmem:[%s4991_s30 + $0xc] sm:$0xe] }
  0x21   : > { %v1093_v24 = vrot.slane %v957_v18, 5  ;;  %v933_v26 = vld [vmem:[%s4991_s30 + $0x10] sm:$0xf]  ;;  %v4062_v27 = vcombine.low %v1087_v13, %v1090_v21  ;;  %v1096_v28 = vrot.slane %v958_v19, 5  ;;  %v934_v29 = vld [vmem:[%s4991_s30 + $0x14] sm:$0x1] }
  0x22   : > { %v4039_v30 = vrot.slane %v932_v25, 9  ;;  %v1037_v31 = vrot.slane %v933_v26, 5  ;;  %v1034_v32 = vsel %vm4993_vm2, %v1032_v23, %v1033_v16  ;;  %v1040_v35 = vrot.slane %v934_v29, 5  ;;  %v384_v36 = vld [vmem:[%s4991_s30 + $0xc] sm:$0xf] }
  0x23   : > { %v1094_v33 = vsel %vm4993_vm2, %v4047_v20, %v1093_v24  ;;  %v1095_v34 = vrot.slane %v1093_v24, 4  ;;  %v385_v37 = vld [vmem:[%s4991_s30 + $0x10] sm:$0xf]  ;;  %1204 = vrot.lane.b32.xlu1 %v4062_v27, %s4902_s5  ;;  %v4054_v38 = vcombine.low %v1031_v22, %v1034_v32  ;;  %v386_v41 = vld [vmem:[%s4991_s30 + $0x14] sm:$0x1]  ;;  %v457_v42 = vshrl.u32 %v384_v36, 16 }
  0x24   : > { %v1038_v39 = vsel %vm4993_vm2, %v4039_v30, %v1037_v31  ;;  %v1039_v40 = vrot.slane %v1037_v31, 4  ;;  %v381_v43 = vld [vmem:[%s4991_s30] sm:$0xf]  ;;  %v460_v45 = vshll.u32 %v384_v36, 16  ;;  %v466_v46 = vshll.u32 %v385_v37, 16 }
  0x25   : > { %v1097_v44 = vsel %vm4993_vm2, %v1095_v34, %v1096_v28  ;;  %v470_v47 = vshrl.u32 %v385_v37, 16  ;;  %v382_v48 = vld [vmem:[%s4991_s30 + $0x4] sm:$0xf]  ;;  %1188 = vrot.lane.b32.xlu0 %v4054_v38, %s4902_s5  ;;  %v459_v51 = vrot.slane %v457_v42, 4  ;;  %v476_v52 = vshll.u32 %v386_v41, 16 }
  0x26   : > { %v4063_v49 = vcombine.low %v1094_v33, %v1097_v44  ;;  %v1041_v50 = vsel %vm4993_vm2, %v1039_v40, %v1040_v35  ;;  %v383_v53 = vld [vmem:[%s4991_s30 + $0x8] sm:$0x1]  ;;  %v462_v55 = vrot.slane %v460_v45, 5  ;;  %v468_v56 = vrot.slane %v466_v46, 5  ;;  %v408_v58 = vld [vmem:[%s4991_s30 + $0x6c] sm:$0xf] }
  0x27   : > { %v4055_v54 = vcombine.low %v1038_v39, %v1041_v50  ;;  %v472_v57 = vrot.slane %v470_v47, 4  ;;  %v478_v59 = vrot.slane %v476_v52, 5  ;;  %v433_v60 = vshrl.u32 %v381_v43, 16  ;;  %v409_v4 = vld [vmem:[%s4991_s30 + $0x70] sm:$0xf] }
  0x28   : > { %1206 = vrot.lane.b32.xlu1 %v4063_v49, %s4902_s5  ;;  %v436_v61 = vshll.u32 %v381_v43, 16  ;;  %v442_v62 = vshll.u32 %v382_v48, 16  ;;  %v463_v63 = vor.u32 %v462_v55, %v459_v51  ;;  %v446_v2 = vshrl.u32 %v382_v48, 16  ;;  %v410_v9 = vld [vmem:[%s4991_s30 + $0x74] sm:$0x1] }
  0x29   : > { %v473_v1 = vor.u32 %v472_v57, %v468_v56  ;;  %v452_v3 = vshll.u32 %v383_v53, 16  ;;  %1190 = vrot.lane.b32.xlu0 %v4055_v54, %s4902_s5  ;;  %v435_v6 = vrot.slane %v433_v60, 4  ;;  %v649_v10 = vshrl.u32 %v408_v58, 16  ;;  %v405_v11 = vld [vmem:[%s4991_s30 + $0x60] sm:$0xf] }
  0x2a   : > { %v438_v7 = vrot.slane %v436_v61, 5  ;;  %v444_v8 = vrot.slane %v442_v62, 5  ;;  %v464_v12 = vrot.slane %v463_v63, 4  ;;  %v448_v14 = vrot.slane %v446_v2, 4  ;;  %v406_v16 = vld [vmem:[%s4991_s30 + $0x64] sm:$0xf] }
  0x2b   : > { %v474_v13 = vrot.slane %v473_v1, 4  ;;  %v454_v15 = vrot.slane %v452_v3, 5  ;;  %v651_v18 = vrot.slane %v649_v10, 4  ;;  %v652_v19 = vshll.u32 %v408_v58, 16  ;;  %v407_v35 = vld [vmem:[%s4991_s30 + $0x68] sm:$0x1] }
  0x2c   : > { %v439_v17 = vor.u32 %v438_v7, %v435_v6  ;;  %v658_v20 = vshll.u32 %v409_v4, 16  ;;  %v469_v21 = vsel %vm5043_vm5, %v464_v12, %v468_v56  ;;  %v449_v23 = vor.u32 %v448_v14, %v444_v8  ;;  %v4142_v38 = vld [vmem:[%s4991_s30 + $0x6c] sm:$0xf]  ;;  %v4143_v43 = vld [vmem:[%s4991_s30 + $0x70] sm:$0xf]  ;;  %v4772_v6 = vld [vmem:[%s4991_s30 + $0x78] sm:$0xff]  }
  0x2d   : > { %v479_v22 = vsel %vm5043_vm5, %v474_v13, %v478_v59  ;;  %v662_v24 = vshrl.u32 %v409_v4, 16  ;;  %v654_v27 = vrot.slane %v652_v19, 5  ;;  %v668_v31 = vshll.u32 %v410_v9, 16  ;;  %v4144_v54 = vld [vmem:[%s4991_s30 + $0x74] sm:$0x1] }
  0x2e   : > { %v4023_v25 = vcombine.low %v469_v21, %v479_v22  ;;  %v440_v26 = vrot.slane %v439_v17, 4  ;;  %v660_v28 = vrot.slane %v658_v20, 5  ;;  %v450_v29 = vrot.slane %v449_v23, 4  ;;  %v4118_v57 = vld [vmem:[%s4991_s30 + $0xc] sm:$0xf] }
  0x2f   : > { %v664_v30 = vrot.slane %v662_v24, 4  ;;  %v625_v32 = vshrl.u32 %v405_v11, 16  ;;  %v655_v34 = vor.u32 %v654_v27, %v651_v18  ;;  %v628_v36 = vshll.u32 %v405_v11, 16  ;;  %v4119_v62 = vld [vmem:[%s4991_s30 + $0x10] sm:$0xf] }
  0x30   : > { %866 = vrot.lane.b32.xlu1 %v4023_v25, %s4903_s6  ;;  %v445_v33 = vsel %vm5043_vm5, %v440_v26, %v444_v8  ;;  %v634_v37 = vshll.u32 %v406_v16, 16  ;;  %v455_v39 = vsel %vm5043_vm5, %v450_v29, %v454_v15  ;;  %v670_v41 = vrot.slane %v668_v31, 5  ;;  %v4120_v12 = vld [vmem:[%s4991_s30 + $0x14] sm:$0x1]  ;;  %v4145_v15 = vld [vmem:[%s4991_s30 + $0x78] sm:$0xf] }
  0x31   : > { %v665_v40 = vor.u32 %v664_v30, %v660_v28  ;;  %v627_v42 = vrot.slane %v625_v32, 4  ;;  %v4022_v44 = vcombine.low %v445_v33, %v455_v39  ;;  %v656_v45 = vrot.slane %v655_v34, 4  ;;  %v4146_v27 = vld [vmem:[%s4991_s30 + $0x7c] sm:$0xf]  ;;  %v4147_v33 = vld [vmem:[%s4991_s30 + $0x80] sm:$0x1] }
  0x32   : > { %v630_v46 = vrot.slane %v628_v36, 5  ;;  %v636_v47 = vrot.slane %v634_v37, 5  ;;  %v638_v49 = vshrl.u32 %v406_v16, 16  ;;  %v644_v50 = vshll.u32 %v407_v35, 16  ;;  %v4121_v34 = vld [vmem:[%s4991_s30 + $0x18] sm:$0xf] }
  0x33   : > { %v666_v48 = vrot.slane %v665_v40, 4  ;;  %v1675_v51 = vshrl.u32 %v4142_v38, 16  ;;  %864 = vrot.lane.b32.xlu0 %v4022_v44, %s4903_s6  ;;  %v661_v52 = vsel %vm5043_vm5, %v656_v45, %v660_v28  ;;  %v1678_v55 = vshll.u32 %v4142_v38, 16  ;;  %v4122_v39 = vld [vmem:[%s4991_s30 + $0x1c] sm:$0xf] }
  0x34   : > { %v631_v53 = vor.u32 %v630_v46, %v627_v42  ;;  %v1684_v56 = vshll.u32 %v4143_v43, 16  ;;  %v640_v59 = vrot.slane %v638_v49, 4  ;;  %v646_v60 = vrot.slane %v644_v50, 5  ;;  %v4773_v40 = vld [vmem:[%s4991_s30 + $0x18] sm:$0xff]   ;;  %v4123_v45 = vld [vmem:[%s4991_s30 + $0x20] sm:$0x1] }
  0x35   : > { %v671_v58 = vsel %vm5043_vm5, %v666_v48, %v670_v41  ;;  %v1677_v61 = vrot.slane %v1675_v51, 4  ;;  %v1680_v2 = vrot.slane %v1678_v55, 5  ;;  %v1688_v7 = vshrl.u32 %v4143_v43, 16  ;;  %v4206_v50 = vld [vmem:[%s4991_s30 + $0x6c] sm:$0xe] }
  0x36   : > { %v4031_v63 = vcombine.low %v661_v52, %v671_v58  ;;  %v632_v1 = vrot.slane %v631_v53, 4  ;;  %v1686_v3 = vrot.slane %v1684_v56, 5  ;;  %v641_v4 = vor.u32 %v640_v59, %v636_v47  ;;  %v4207_v55 = vld [vmem:[%s4991_s30 + $0x70] sm:$0xf] }
  0x37   : > { %v1694_v8 = vshll.u32 %v4144_v54, 16  ;;  %v1483_v9 = vshrl.u32 %v4118_v57, 16  ;;  %v1681_v11 = vor.u32 %v1680_v2, %v1677_v61  ;;  %v1486_v13 = vshll.u32 %v4118_v57, 16  ;;  %v4182_v61 = vld [vmem:[%s4991_s30 + $0xc] sm:$0xe] }
  0x38   : > { %882 = vrot.lane.b32.xlu1 %v4031_v63, %s4903_s6  ;;  %v637_v10 = vsel %vm5043_vm5, %v632_v1, %v636_v47  ;;  %v1492_v14 = vshll.u32 %v4119_v62, 16  ;;  %v642_v16 = vrot.slane %v641_v4, 4  ;;  %v1690_v17 = vrot.slane %v1688_v7, 4 }
  0x39   : > { %v1696_v18 = vrot.slane %v1694_v8, 5  ;;  %v1485_v19 = vrot.slane %v1483_v9, 4  ;;  %v1682_v20 = vrot.slane %v1681_v11, 4  ;;  %v1488_v21 = vrot.slane %v1486_v13, 5  ;;  %v4184_v9 = vld [vmem:[%s4991_s30 + $0x14] sm:$0x1] }
  0x3a   : > { %v1494_v22 = vrot.slane %v1492_v14, 5  ;;  %v1496_v23 = vshrl.u32 %v4119_v62, 16  ;;  %v647_v24 = vsel %vm5043_vm5, %v642_v16, %v646_v60  ;;  %v1691_v25 = vor.u32 %v1690_v17, %v1686_v3  ;;  %v4208_v60 = vld [vmem:[%s4991_s30 + $0x74] sm:$0x1] }
  0x3b   : > { %v1502_v26 = vshll.u32 %v4120_v12, 16  ;;  %v1699_v28 = vshrl.u32 %v4145_v15, 16  ;;  %v4030_v29 = vcombine.low %v637_v10, %v647_v24  ;;  %v1687_v30 = vsel %vm5043_vm5, %v1682_v20, %v1686_v3  ;;  %v4183_v3 = vld [vmem:[%s4991_s30 + $0x10] sm:$0xf] }
  0x3c   : > { %1387 = vrot.lane.b32.xlu1 %v4772_v6, %s4901_s4  ;;  %v1489_v31 = vor.u32 %v1488_v21, %v1485_v19  ;;  %v1498_v32 = vrot.slane %v1496_v23, 4  ;;  %v1692_v35 = vrot.slane %v1691_v25, 4  ;;  %v1702_v38 = vshll.u32 %v4145_v15, 16 }
  0x3d   : > { %v1504_v36 = vrot.slane %v1502_v26, 5  ;;  %v1701_v37 = vrot.slane %v1699_v28, 4  ;;  %880 = vrot.lane.b32.xlu0 %v4030_v29, %s4903_s6  ;;  %v1708_v43 = vshll.u32 %v4146_v27, 16  ;;  %v1712_v44 = vshrl.u32 %v4146_v27, 16  ;;  %v4210_v27 = vld [vmem:[%s4991_s30 + $0x7c] sm:$0xf] }
  0x3e   : > { %v1490_v41 = vrot.slane %v1489_v31, 4  ;;  %v1499_v42 = vor.u32 %v1498_v32, %v1494_v22  ;;  %v1697_v46 = vsel %vm5043_vm5, %v1692_v35, %v1696_v18  ;;  %v1704_v47 = vrot.slane %v1702_v38, 5  ;;  %v4211_v28 = vld [vmem:[%s4991_s30 + $0x80] sm:$0x1]  ;;  %v4186_v38 = vld [vmem:[%s4991_s30 + $0x1c] sm:$0xf] }
  0x3f   : > { %v1718_v48 = vshll.u32 %v4147_v33, 16  ;;  %v1507_v49 = vshrl.u32 %v4121_v34, 16  ;;  %v4174_v51 = vcombine.low %v1687_v30, %v1697_v46  ;;  %v1710_v54 = vrot.slane %v1708_v43, 5  ;;  %v4185_v33 = vld [vmem:[%s4991_s30 + $0x18] sm:$0xe] }
  0x40   : > { %v1495_v52 = vsel %vm5043_vm5, %v1490_v41, %v1494_v22  ;;  %v1500_v53 = vrot.slane %v1499_v42, 4  ;;  %v1705_v56 = vor.u32 %v1704_v47, %v1701_v37  ;;  %v1714_v57 = vrot.slane %v1712_v44, 4  ;;  %v4209_v22 = vld [vmem:[%s4991_s30 + $0x78] sm:$0xe] }
  0x41   : > { %v1720_v58 = vrot.slane %v1718_v48, 5  ;;  %v1509_v59 = vrot.slane %v1507_v49, 4  ;;  %1371 = vrot.lane.b32.xlu0 %v4773_v40, %s4901_s4  ;;  %1930 = vrot.lane.b32.xlu1 %v4174_v51, %s4904_s7  ;;  %v1510_v63 = vshll.u32 %v4121_v34, 16  ;;  %v1516_v1 = vshll.u32 %v4122_v39, 16  ;;  %v4334_v44 = vld [vmem:[%s4991_s30 + $0x78] sm:$0xf] }
  0x42   : > { %v1505_v62 = vsel %vm5043_vm5, %v1500_v53, %v1504_v36  ;;  %v1520_v2 = vshrl.u32 %v4122_v39, 16  ;;  %v1706_v6 = vrot.slane %v1705_v56, 4  ;;  %v1715_v7 = vor.u32 %v1714_v57, %v1710_v54  ;;  %v4187_v39 = vld [vmem:[%s4991_s30 + $0x20] sm:$0x1] }
  0x43   : > { %v4166_v4 = vcombine.low %v1495_v52, %v1505_v62  ;;  %v1526_v8 = vshll.u32 %v4123_v45, 16  ;;  %v1512_v10 = vrot.slane %v1510_v63, 5  ;;  %v1518_v11 = vrot.slane %v1516_v1, 5  ;;  %v4335_v45 = vld [vmem:[%s4991_s30 + $0x7c] sm:$0xf] }
  0x44   : > { %v1522_v12 = vrot.slane %v1520_v2, 4  ;;  %v4238_v13 = vrot.slane %v4206_v50, 9  ;;  %v1711_v14 = vsel %vm5043_vm5, %v1706_v6, %v1710_v54  ;;  %v1716_v15 = vrot.slane %v1715_v7, 4  ;;  %v4336_v54 = vld [vmem:[%s4991_s30 + $0x80] sm:$0x1] }
  0x45   : > { %v1528_v16 = vrot.slane %v1526_v8, 5  ;;  %v2133_v17 = vrot.slane %v4207_v55, 5  ;;  %1914 = vrot.lane.b32.xlu0 %v4166_v4, %s4904_s7  ;;  %v1513_v18 = vor.u32 %v1512_v10, %v1509_v59  ;;  %v2136_v20 = vrot.slane %v4208_v60, 5  ;;  %v4310_v59 = vld [vmem:[%s4991_s30 + $0x18] sm:$0xf] }
  0x46   : > { %v1523_v19 = vor.u32 %v1522_v12, %v1518_v11  ;;  %v4230_v21 = vrot.slane %v4182_v61, 9  ;;  %v1721_v23 = vsel %vm5043_vm5, %v1716_v15, %v1720_v58  ;;  %v2077_v26 = vrot.slane %v4183_v3, 5  ;;  %v4311_v1 = vld [vmem:[%s4991_s30 + $0x1c] sm:$0xf]  ;;  %v4312_v10 = vld [vmem:[%s4991_s30 + $0x20] sm:$0x1] }
  0x47   : > { %v2134_v24 = vsel %vm4993_vm2, %v4238_v13, %v2133_v17  ;;  %v2135_v25 = vrot.slane %v2133_v17, 4  ;;  %v4175_v29 = vcombine.low %v1711_v14, %v1721_v23  ;;  %v1514_v30 = vrot.slane %v1513_v18, 4  ;;  %v4774_v17 = vld [vmem:[%s4991_s30 + $0x78] sm:$0xff]  }
  0x48   : > { %v1524_v31 = vrot.slane %v1523_v19, 4  ;;  %v2080_v32 = vrot.slane %v4184_v9, 5  ;;  %v2078_v35 = vsel %vm4993_vm2, %v4230_v21, %v2077_v26  ;;  %v2079_v36 = vrot.slane %v2077_v26, 4 }
  0x49   : > { %v2137_v34 = vsel %vm4993_vm2, %v2135_v25, %v2136_v20  ;;  %v4239_v37 = vrot.slane %v4209_v22, 9  ;;  %1932 = vrot.lane.b32.xlu1 %v4175_v29, %s4904_s7  ;;  %v1519_v40 = vsel %vm5043_vm5, %v1514_v30, %v1518_v11  ;;  %v2140_v43 = vrot.slane %v4210_v27, 5  ;;  %v4338_v22 = vld [vmem:[%s4991_s30 + $0x88] sm:$0xf]  ;;  %v4775_v27 = vld [vmem:[%s4991_s30 + $0x18] sm:$0xff]  }
  0x4a   : > { %v1529_v41 = vsel %vm5043_vm5, %v1524_v31, %v1528_v16  ;;  %v4254_v42 = vcombine.low %v2134_v24, %v2137_v34  ;;  %v2081_v47 = vsel %vm4993_vm2, %v2079_v36, %v2080_v32  ;;  %v2143_v48 = vrot.slane %v4211_v28, 5  ;;  %v4337_v16 = vld [vmem:[%s4991_s30 + $0x84] sm:$0xf] }
  0x4b   : > { %v4167_v46 = vcombine.low %v1519_v40, %v1529_v41  ;;  %v4231_v49 = vrot.slane %v4185_v33, 9  ;;  %v4246_v50 = vcombine.low %v2078_v35, %v2081_v47  ;;  %v2141_v51 = vsel %vm4993_vm2, %v4239_v37, %v2140_v43  ;;  %v4339_v35 = vld [vmem:[%s4991_s30 + $0x8c] sm:$0x1]  ;;  %v4313_v37 = vld [vmem:[%s4991_s30 + $0x24] sm:$0xf] }
  0x4c   : > { %v2142_v52 = vrot.slane %v2140_v43, 4  ;;  %v2084_v53 = vrot.slane %v4186_v38, 5  ;;  %v2087_v55 = vrot.slane %v4187_v39, 5  ;;  %v2722_v56 = vshrl.u32 %v4334_v44, 16  ;;  %v4776_v38 = vld [vmem:[%s4991_s30 + $0x84] sm:$0xff]  }
  0x4d   : > { %1916 = vrot.lane.b32.xlu0 %v4167_v46, %s4904_s7  ;;  %v2725_v57 = vshll.u32 %v4334_v44, 16  ;;  %v2731_v58 = vshll.u32 %v4335_v45, 16  ;;  %2251 = vrot.lane.b32.xlu1 %v4254_v42, %s4905_s8  ;;  %v2735_v63 = vshrl.u32 %v4335_v45, 16  ;;  %v2741_v9 = vshll.u32 %v4336_v54, 16  ;;  %v4314_v43 = vld [vmem:[%s4991_s30 + $0x28] sm:$0xf] }
  0x4e   : > { %v2144_v60 = vsel %vm4993_vm2, %v2142_v52, %v2143_v48  ;;  %v2085_v61 = vsel %vm4993_vm2, %v4231_v49, %v2084_v53  ;;  %v2086_v62 = vrot.slane %v2084_v53, 4  ;;  %v2724_v3 = vrot.slane %v2722_v56, 4  ;;  %v4315_v48 = vld [vmem:[%s4991_s30 + $0x2c] sm:$0x1]  ;;  %v4398_v53 = vld [vmem:[%s4991_s30 + $0x78] sm:$0xe] }
  0x4f   : > { %v4255_v2 = vcombine.low %v2141_v51, %v2144_v60  ;;  %v2727_v4 = vrot.slane %v2725_v57, 5  ;;  %v2733_v6 = vrot.slane %v2731_v58, 5  ;;  %v2737_v8 = vrot.slane %v2735_v63, 4  ;;  %v4777_v54 = vld [vmem:[%s4991_s30 + $0x24] sm:$0xff]  }
  0x50   : > { %v2088_v7 = vsel %vm4993_vm2, %v2086_v62, %v2087_v55  ;;  %v2530_v11 = vshrl.u32 %v4310_v59, 16  ;;  %v2533_v14 = vshll.u32 %v4310_v59, 16  ;;  %v2539_v15 = vshll.u32 %v4311_v1, 16  ;;  %v4399_v59 = vld [vmem:[%s4991_s30 + $0x7c] sm:$0xf] }
  0x51   : > { %2235 = vrot.lane.b32.xlu0 %v4246_v50, %s4905_s8  ;;  %v4247_v12 = vcombine.low %v2085_v61, %v2088_v7  ;;  %v2728_v13 = vor.u32 %v2727_v4, %v2724_v3  ;;  %2253 = vrot.lane.b32.xlu1 %v4255_v2, %s4905_s8  ;;  %v2738_v18 = vor.u32 %v2737_v8, %v2733_v6  ;;  %v2743_v19 = vrot.slane %v2741_v9, 5  ;;  %v4374_v7 = vld [vmem:[%s4991_s30 + $0x18] sm:$0xe]  ;;  %v4375_v8 = vld [vmem:[%s4991_s30 + $0x1c] sm:$0xf] }
  0x52   : > { %v2532_v20 = vrot.slane %v2530_v11, 4  ;;  %v2543_v21 = vshrl.u32 %v4311_v1, 16  ;;  %v2535_v24 = vrot.slane %v2533_v14, 5  ;;  %v2541_v25 = vrot.slane %v2539_v15, 5  ;;  %v4400_v1 = vld [vmem:[%s4991_s30 + $0x80] sm:$0x1] }
  0x53   : > { %v2729_v23 = vrot.slane %v2728_v13, 4  ;;  %v2549_v26 = vshll.u32 %v4312_v10, 16  ;;  %v2739_v28 = vrot.slane %v2738_v18, 4  ;;  %v2746_v30 = vshrl.u32 %v4337_v16, 16 }
  0x54   : > { %v2545_v29 = vrot.slane %v2543_v21, 4  ;;  %v2749_v31 = vshll.u32 %v4337_v16, 16  ;;  %v2536_v33 = vor.u32 %v2535_v24, %v2532_v20  ;;  %v2755_v36 = vshll.u32 %v4338_v22, 16 }
  0x55   : > { %2237 = vrot.lane.b32.xlu0 %v4247_v12, %s4905_s8  ;;  %v2734_v32 = vsel %vm5043_vm5, %v2729_v23, %v2733_v6  ;;  %v2551_v34 = vrot.slane %v2549_v26, 5  ;;  %2432 = vrot.lane.b32.xlu1 %v4774_v17, %s4906_s9  ;;  %v2744_v39 = vsel %vm5043_vm5, %v2739_v28, %v2743_v19  ;;  %v2748_v41 = vrot.slane %v2746_v30, 4  ;;  %v4376_v17 = vld [vmem:[%s4991_s30 + $0x20] sm:$0x1] }
  0x56   : > { %v2546_v40 = vor.u32 %v2545_v29, %v2541_v25  ;;  %v2751_v42 = vrot.slane %v2749_v31, 5  ;;  %v4366_v44 = vcombine.low %v2734_v32, %v2744_v39  ;;  %v2537_v45 = vrot.slane %v2536_v33, 4  ;;  %v413_v32 = vld [vmem:[%s4991_s30 + $0x80] sm:$0x1] }
  0x57   : > { %v2757_v46 = vrot.slane %v2755_v36, 5  ;;  %v2759_v47 = vshrl.u32 %v4338_v22, 16  ;;  %v2765_v51 = vshll.u32 %v4339_v35, 16  ;;  %v2554_v52 = vshrl.u32 %v4313_v37, 16  ;;  %v411_v22 = vld [vmem:[%s4991_s30 + $0x78] sm:$0xf] }
  0x58   : > { %v2547_v49 = vrot.slane %v2546_v40, 4  ;;  %v2752_v50 = vor.u32 %v2751_v42, %v2748_v41  ;;  %v2542_v55 = vsel %vm5043_vm5, %v2537_v45, %v2541_v25  ;;  %v2557_v57 = vshll.u32 %v4313_v37, 16  ;;  %v387_v37 = vld [vmem:[%s4991_s30 + $0x18] sm:$0xf] }
  0x59   : > { %2416 = vrot.lane.b32.xlu0 %v4775_v27, %s4906_s9  ;;  %v2761_v56 = vrot.slane %v2759_v47, 4  ;;  %v2563_v58 = vshll.u32 %v4314_v43, 16  ;;  %2434 = vrot.lane.b32.xlu1 %v4776_v38, %s4906_s9  ;;  %v2767_v62 = vrot.slane %v2765_v51, 5  ;;  %v2556_v63 = vrot.slane %v2554_v52, 4  ;;  %v412_v27 = vld [vmem:[%s4991_s30 + $0x7c] sm:$0xf] }
  0x5a   : > { %v2552_v60 = vsel %vm5043_vm5, %v2547_v49, %v2551_v34  ;;  %v2753_v61 = vrot.slane %v2752_v50, 4  ;;  %v2559_v4 = vrot.slane %v2557_v57, 5  ;;  %v2567_v10 = vshrl.u32 %v4314_v43, 16  ;;  %v388_v38 = vld [vmem:[%s4991_s30 + $0x1c] sm:$0xf] }
  0x5b   : > { %v4358_v2 = vcombine.low %v2542_v55, %v2552_v60  ;;  %v2762_v3 = vor.u32 %v2761_v56, %v2757_v46  ;;  %v2565_v6 = vrot.slane %v2563_v58, 5  ;;  %v2573_v11 = vshll.u32 %v4315_v48, 16  ;;  %v389_v43 = vld [vmem:[%s4991_s30 + $0x20] sm:$0x1]  ;;  %v4401_v48 = vld [vmem:[%s4991_s30 + $0x84] sm:$0xe] }
  0x5c   : > { %v2758_v9 = vsel %vm5043_vm5, %v2753_v61, %v2757_v46  ;;  %v4430_v12 = vrot.slane %v4398_v53, 9  ;;  %v2560_v14 = vor.u32 %v2559_v4, %v2556_v63  ;;  %v3180_v15 = vrot.slane %v4399_v59, 5  ;;  %v4402_v53 = vld [vmem:[%s4991_s30 + $0x88] sm:$0xf]  ;;  %v4377_v59 = vld [vmem:[%s4991_s30 + $0x24] sm:$0xe] }
  0x5d   : > { %2418 = vrot.lane.b32.xlu0 %v4777_v54, %s4906_s9  ;;  %v2763_v13 = vrot.slane %v2762_v3, 4  ;;  %v3183_v16 = vrot.slane %v4400_v1, 5  ;;  %2977 = vrot.lane.b32.xlu1 %v4366_v44, %s4907_s10  ;;  %v2569_v18 = vrot.slane %v2567_v10, 4  ;;  %v2575_v19 = vrot.slane %v2573_v11, 5  ;;  %v4403_v54 = vld [vmem:[%s4991_s30 + $0x8c] sm:$0x1] }
  0x5e   : > { %v4422_v20 = vrot.slane %v4374_v7, 9  ;;  %v3124_v21 = vrot.slane %v4375_v8, 5  ;;  %v2561_v24 = vrot.slane %v2560_v14, 4  ;;  %v3181_v25 = vsel %vm4993_vm2, %v4430_v12, %v3180_v15  ;;  %v4378_v1 = vld [vmem:[%s4991_s30 + $0x28] sm:$0xf] }
  0x5f   : > { %v2768_v23 = vsel %vm5043_vm5, %v2763_v13, %v2767_v62  ;;  %v3182_v26 = vrot.slane %v3180_v15, 4  ;;  %v2570_v29 = vor.u32 %v2569_v18, %v2565_v6  ;;  %v3127_v35 = vrot.slane %v4376_v17, 5  ;;  %v4379_v7 = vld [vmem:[%s4991_s30 + $0x2c] sm:$0x1]  ;;  %v414_v12 = vld [vmem:[%s4991_s30 + $0x84] sm:$0xf] }
  0x60   : > { %v4367_v28 = vcombine.low %v2758_v9, %v2768_v23  ;;  %v3125_v30 = vsel %vm4993_vm2, %v4422_v20, %v3124_v21  ;;  %v3126_v31 = vrot.slane %v3124_v21, 4  ;;  %v2566_v33 = vsel %vm5043_vm5, %v2561_v24, %v2565_v6  ;;  %v415_v21 = vld [vmem:[%s4991_s30 + $0x88] sm:$0xf] }
  0x61   : > { %2961 = vrot.lane.b32.xlu0 %v4358_v2, %s4907_s10  ;;  %v3184_v34 = vsel %vm4993_vm2, %v3182_v26, %v3183_v16  ;;  %v673_v36 = vshrl.u32 %v411_v22, 16  ;;  %v2571_v39 = vrot.slane %v2570_v29, 4  ;;  %v676_v41 = vshll.u32 %v411_v22, 16 }
  0x62   : > { %2979 = vrot.lane.b32.xlu1 %v4367_v28, %s4907_s10  ;;  %v4446_v40 = vcombine.low %v3181_v25, %v3184_v34  ;;  %v682_v42 = vshll.u32 %v412_v27, 16  ;;  %v3128_v44 = vsel %vm4993_vm2, %v3126_v31, %v3127_v35  ;;  %v686_v46 = vshrl.u32 %v412_v27, 16 }
  0x63   : > { %v675_v45 = vrot.slane %v673_v36, 4  ;;  %v692_v47 = vshll.u32 %v413_v32, 16  ;;  %v2576_v49 = vsel %vm5043_vm5, %v2571_v39, %v2575_v19  ;;  %v4438_v50 = vcombine.low %v3125_v30, %v3128_v44  ;;  %v390_v39 = vld [vmem:[%s4991_s30 + $0x24] sm:$0xf] }
  0x64   : > { %v678_v51 = vrot.slane %v676_v41, 5  ;;  %v684_v52 = vrot.slane %v682_v42, 5  ;;  %v4359_v55 = vcombine.low %v2566_v33, %v2576_v49  ;;  %v688_v56 = vrot.slane %v686_v46, 4  ;;  %v416_v33 = vld [vmem:[%s4991_s30 + $0x8c] sm:$0x1] }
  0x65   : > { %v694_v57 = vrot.slane %v692_v47, 5  ;;  %v481_v58 = vshrl.u32 %v387_v37, 16  ;;  %v484_v61 = vshll.u32 %v387_v37, 16  ;;  %v490_v62 = vshll.u32 %v388_v38, 16  ;;  %v959_v46 = vld [vmem:[%s4991_s30 + $0x78] sm:$0xe] }
  0x66   : > { %3298 = vrot.lane.b32.xlu1 %v4446_v40, %s4908_s11  ;;  %v679_v60 = vor.u32 %v678_v51, %v675_v45  ;;  %v494_v63 = vshrl.u32 %v388_v38, 16  ;;  %2963 = vrot.lane.b32.xlu0 %v4359_v55, %s4907_s10  ;;  %v689_v2 = vor.u32 %v688_v56, %v684_v52  ;;  %v500_v4 = vshll.u32 %v389_v43, 16  ;;  %v391_v40 = vld [vmem:[%s4991_s30 + $0x28] sm:$0xf]  ;;  %v392_v45 = vld [vmem:[%s4991_s30 + $0x2c] sm:$0x1] }
  0x67   : > { %v483_v3 = vrot.slane %v481_v58, 4  ;;  %v4431_v6 = vrot.slane %v4401_v48, 9  ;;  %v486_v9 = vrot.slane %v484_v61, 5  ;;  %v492_v10 = vrot.slane %v490_v62, 5  ;;  %v960_v51 = vld [vmem:[%s4991_s30 + $0x7c] sm:$0xf] }
  0x68   : > { %v680_v8 = vrot.slane %v679_v60, 4  ;;  %v496_v11 = vrot.slane %v494_v63, 4  ;;  %v690_v13 = vrot.slane %v689_v2, 4  ;;  %v502_v14 = vrot.slane %v500_v4, 5  ;;  %v961_v56 = vld [vmem:[%s4991_s30 + $0x80] sm:$0x1] }
  0x69   : > { %v3187_v15 = vrot.slane %v4402_v53, 5  ;;  %v3190_v16 = vrot.slane %v4403_v54, 5  ;;  %v487_v18 = vor.u32 %v486_v9, %v483_v3  ;;  %v4423_v20 = vrot.slane %v4377_v59, 9  ;;  %v935_v61 = vld [vmem:[%s4991_s30 + $0x18] sm:$0xe] }
  0x6a   : > { %v685_v17 = vsel %vm5043_vm5, %v680_v8, %v684_v52  ;;  %v497_v19 = vor.u32 %v496_v11, %v492_v10  ;;  %3282 = vrot.lane.b32.xlu0 %v4438_v50, %s4908_s11  ;;  %v695_v22 = vsel %vm5043_vm5, %v690_v13, %v694_v57  ;;  %v3131_v25 = vrot.slane %v4378_v1, 5  ;;  %v936_v3 = vld [vmem:[%s4991_s30 + $0x1c] sm:$0xf]  ;;  %v937_v9 = vld [vmem:[%s4991_s30 + $0x20] sm:$0x1] }
  0x6b   : > { %v3188_v23 = vsel %vm4993_vm2, %v4431_v6, %v3187_v15  ;;  %v3189_v24 = vrot.slane %v3187_v15, 4  ;;  %v4032_v26 = vcombine.low %v685_v17, %v695_v22  ;;  %v488_v27 = vrot.slane %v487_v18, 4  ;;  %v4800_v15 = vld [vmem:[%s6244_s1] sm:$0xff]  }
  0x6c   : > { %v498_v28 = vrot.slane %v497_v19, 4  ;;  %v3134_v29 = vrot.slane %v4379_v7, 5  ;;  %v3132_v31 = vsel %vm4993_vm2, %v4423_v20, %v3131_v25  ;;  %v3133_v32 = vrot.slane %v3131_v25, 4  ;;  %v963_v20 = vld [vmem:[%s4991_s30 + $0x88] sm:$0xf]  ;;  %4659 = vmatprep.subr.bf16.mxu0 %v4800_v15  ;;  %4697 = vmatprep.subr.bf16.mxu1 %v4800_v15 }
  0x6d   : > { %v3191_v30 = vsel %vm4993_vm2, %v3189_v24, %v3190_v16  ;;  %v697_v34 = vshrl.u32 %v414_v12, 16  ;;  %884 = vrot.lane.b32.xlu1 %v4032_v26, %s4903_s6  ;;  %v493_v35 = vsel %vm5043_vm5, %v488_v27, %v492_v10  ;;  %v700_v38 = vshll.u32 %v414_v12, 16  ;;  %v938_v26 = vld [vmem:[%s4991_s30 + $0x24] sm:$0xe]  ;;  %v4801_v27 = vld [vmem:[%s6244_s1 + $0x8] sm:$0xff]   ;;  %4660 = vmatpush3.bf16.msra.mxu0 %v4800_v15 }
  0x6e   : > { %v503_v36 = vsel %vm5043_vm5, %v498_v28, %v502_v14  ;;  %v4447_v37 = vcombine.low %v3188_v23, %v3191_v30  ;;  %v3135_v42 = vsel %vm4993_vm2, %v3133_v32, %v3134_v29  ;;  %v706_v44 = vshll.u32 %v415_v21, 16  ;;  %v962_v14 = vld [vmem:[%s4991_s30 + $0x84] sm:$0xe]  ;;  %v939_v32 = vld [vmem:[%s4991_s30 + $0x28] sm:$0xf]  ;;  %4700 = vmatpush3.bf16.msra.mxu1 %v4800_v15  ;;  %4661 = vmatprep.subr.bf16.mxu0 %v4801_v27 }
  0x6f   : > { %v4024_v41 = vcombine.low %v493_v35, %v503_v36  ;;  %v699_v43 = vrot.slane %v697_v34, 4  ;;  %v4439_v47 = vcombine.low %v3132_v31, %v3135_v42  ;;  %v702_v48 = vrot.slane %v700_v38, 5  ;;  %v4148_v42 = vld [vmem:[%s4991_s30 + $0x84] sm:$0xf]  ;;  %4698 = vmatprep.subr.bf16.mxu1 %v4801_v27 }
  0x70   : > { %v710_v49 = vshrl.u32 %v415_v21, 16  ;;  %v716_v50 = vshll.u32 %v416_v33, 16  ;;  %v708_v52 = vrot.slane %v706_v44, 5  ;;  %v505_v53 = vshrl.u32 %v390_v39, 16  ;;  %v964_v21 = vld [vmem:[%s4991_s30 + $0x8c] sm:$0x1] }
  0x71   : > { %868 = vrot.lane.b32.xlu0 %v4024_v41, %s4903_s6  ;;  %v508_v54 = vshll.u32 %v390_v39, 16  ;;  %v514_v55 = vshll.u32 %v391_v40, 16  ;;  %3300 = vrot.lane.b32.xlu1 %v4447_v37, %s4908_s11  ;;  %v703_v57 = vor.u32 %v702_v48, %v699_v43  ;;  %v518_v60 = vshrl.u32 %v391_v40, 16  ;;  %v940_v37 = vld [vmem:[%s4991_s30 + $0x2c] sm:$0x1] }
  0x72   : > { %v712_v58 = vrot.slane %v710_v49, 4  ;;  %v718_v59 = vrot.slane %v716_v50, 5  ;;  %v507_v62 = vrot.slane %v505_v53, 4  ;;  %v524_v2 = vshll.u32 %v392_v45, 16  ;;  %v4149_v43 = vld [vmem:[%s4991_s30 + $0x88] sm:$0xf]  ;;  %4662 = vmatpush3.bf16.msra.mxu0 %v4801_v27  ;;  %4701 = vmatpush3.bf16.msra.mxu1 %v4801_v27 }
  0x73   : > { %v510_v63 = vrot.slane %v508_v54, 5  ;;  %v516_v1 = vrot.slane %v514_v55, 5  ;;  %v704_v4 = vrot.slane %v703_v57, 4  ;;  %v520_v7 = vrot.slane %v518_v60, 4  ;;  %v4150_v48 = vld [vmem:[%s4991_s30 + $0x8c] sm:$0x1] }
  0x74   : > { %v713_v6 = vor.u32 %v712_v58, %v708_v52  ;;  %v4048_v8 = vrot.slane %v959_v46, 9  ;;  %v526_v11 = vrot.slane %v524_v2, 5  ;;  %v1100_v12 = vrot.slane %v960_v51, 5  ;;  %v4124_v53 = vld [vmem:[%s4991_s30 + $0x24] sm:$0xf] }
  0x75   : > { %3284 = vrot.lane.b32.xlu0 %v4439_v47, %s4908_s11  ;;  %v511_v10 = vor.u32 %v510_v63, %v507_v62  ;;  %v1103_v13 = vrot.slane %v961_v56, 5  ;;  %v709_v16 = vsel %vm5043_vm5, %v704_v4, %v708_v52  ;;  %v521_v18 = vor.u32 %v520_v7, %v516_v1  ;;  %v4125_v54 = vld [vmem:[%s4991_s30 + $0x28] sm:$0xf] }
  0x76   : > { %v714_v17 = vrot.slane %v713_v6, 4  ;;  %v4040_v19 = vrot.slane %v935_v61, 9  ;;  %v1101_v23 = vsel %vm4993_vm2, %v4048_v8, %v1100_v12  ;;  %v1102_v24 = vrot.slane %v1100_v12, 4 }
  0x77   : > { %v512_v22 = vrot.slane %v511_v10, 4  ;;  %v1044_v25 = vrot.slane %v936_v3, 5  ;;  %v522_v29 = vrot.slane %v521_v18, 4  ;;  %v1047_v30 = vrot.slane %v937_v9, 5 }
  0x78   : > { %v719_v28 = vsel %vm5043_vm5, %v714_v17, %v718_v59  ;;  %v4049_v31 = vrot.slane %v962_v14, 9  ;;  %v1104_v35 = vsel %vm4993_vm2, %v1102_v24, %v1103_v13  ;;  %v1107_v41 = vrot.slane %v963_v20, 5  ;;  %v4126_v59 = vld [vmem:[%s4991_s30 + $0x2c] sm:$0x1]  ;;  %v4778_v20 = vld [vmem:[%s4991_s30 + $0x84] sm:$0xff]  }
  0x79   : > { %v4033_v33 = vcombine.low %v709_v16, %v719_v28  ;;  %v517_v34 = vsel %vm5043_vm5, %v512_v22, %v516_v1  ;;  %v1045_v36 = vsel %vm4993_vm2, %v4040_v19, %v1044_v25  ;;  %v527_v38 = vsel %vm5043_vm5, %v522_v29, %v526_v11  ;;  %v4151_v1 = vld [vmem:[%s4991_s30 + $0x90] sm:$0xf]  ;;  %v4152_v19 = vld [vmem:[%s4991_s30 + $0x94] sm:$0xf]  ;;  %v4153_v29 = vld [vmem:[%s4991_s30 + $0x98] sm:$0x1] }
  0x7a   : > { %v4064_v39 = vcombine.low %v1101_v23, %v1104_v35  ;;  %v1046_v40 = vrot.slane %v1044_v25, 4  ;;  %v4025_v44 = vcombine.low %v517_v34, %v527_v38  ;;  %v1110_v45 = vrot.slane %v964_v21, 5  ;;  %v4127_v35 = vld [vmem:[%s4991_s30 + $0x30] sm:$0xf] }
  0x7b   : > { %886 = vrot.lane.b32.xlu1 %v4033_v33, %s4903_s6  ;;  %v4041_v46 = vrot.slane %v938_v26, 9  ;;  %v1051_v47 = vrot.slane %v939_v32, 5  ;;  %v1108_v50 = vsel %vm4993_vm2, %v4049_v31, %v1107_v41  ;;  %v1109_v51 = vrot.slane %v1107_v41, 4  ;;  %v4780_v41 = vld [vmem:[%s4991_s30 + $0x90] sm:$0xff]  }
  0x7c   : > { %v1048_v49 = vsel %vm4993_vm2, %v1046_v40, %v1047_v30  ;;  %v1054_v52 = vrot.slane %v940_v37, 5  ;;  %870 = vrot.lane.b32.xlu0 %v4025_v44, %s4903_s6  ;;  %v1723_v58 = vshrl.u32 %v4148_v42, 16  ;;  %v1726_v61 = vshll.u32 %v4148_v42, 16  ;;  %v4779_v30 = vld [vmem:[%s4991_s30 + $0x24] sm:$0xff]   ;;  %v4128_v40 = vld [vmem:[%s4991_s30 + $0x34] sm:$0xf] }
  0x7d   : > { %v4056_v55 = vcombine.low %v1045_v36, %v1048_v49  ;;  %v1052_v56 = vsel %vm4993_vm2, %v4041_v46, %v1051_v47  ;;  %v1053_v57 = vrot.slane %v1051_v47, 4  ;;  %v1111_v60 = vsel %vm4993_vm2, %v1109_v51, %v1110_v45  ;;  %v4781_v42 = vld [vmem:[%s4991_s30 + $0x30] sm:$0xff]  }
  0x7e   : > { %v1732_v62 = vshll.u32 %v4149_v43, 16  ;;  %v1736_v63 = vshrl.u32 %v4149_v43, 16  ;;  %v4065_v2 = vcombine.low %v1108_v50, %v1111_v60  ;;  %v1725_v4 = vrot.slane %v1723_v58, 4  ;;  %v4129_v50 = vld [vmem:[%s4991_s30 + $0x38] sm:$0x1] }
  0x7f   : > { %1208 = vrot.lane.b32.xlu1 %v4064_v39, %s4902_s5  ;;  %v1055_v3 = vsel %vm4993_vm2, %v1053_v57, %v1054_v52  ;;  %v1742_v6 = vshll.u32 %v4150_v48, 16  ;;  %v1728_v8 = vrot.slane %v1726_v61, 5  ;;  %v1531_v12 = vshrl.u32 %v4124_v53, 16  ;;  %v4213_v57 = vld [vmem:[%s4991_s30 + $0x88] sm:$0xf] }
  0x80   : > { %v4057_v7 = vcombine.low %v1052_v56, %v1055_v3  ;;  %v1734_v9 = vrot.slane %v1732_v62, 5  ;;  %v1738_v10 = vrot.slane %v1736_v63, 4  ;;  %1192 = vrot.lane.b32.xlu0 %v4056_v55, %s4902_s5  ;;  %v1534_v13 = vshll.u32 %v4124_v53, 16  ;;  %v4212_v56 = vld [vmem:[%s4991_s30 + $0x84] sm:$0xe] }
  0x81   : > { %v1744_v11 = vrot.slane %v1742_v6, 5  ;;  %v1540_v14 = vshll.u32 %v4125_v54, 16  ;;  %v1729_v15 = vor.u32 %v1728_v8, %v1725_v4  ;;  %v1544_v17 = vshrl.u32 %v4125_v54, 16  ;;  %v4214_v62 = vld [vmem:[%s4991_s30 + $0x8c] sm:$0x1] }
  0x82   : > { %v1739_v16 = vor.u32 %v1738_v10, %v1734_v9  ;;  %v1550_v18 = vshll.u32 %v4126_v59, 16  ;;  %v1533_v21 = vrot.slane %v1531_v12, 4  ;;  %v1536_v22 = vrot.slane %v1534_v13, 5  ;;  %v4188_v63 = vld [vmem:[%s4991_s30 + $0x24] sm:$0xe] }
  0x83   : > { %1210 = vrot.lane.b32.xlu1 %v4065_v2, %s4902_s5  ;;  %v1542_v23 = vrot.slane %v1540_v14, 5  ;;  %v1747_v24 = vshrl.u32 %v4151_v1, 16  ;;  %v1730_v25 = vrot.slane %v1729_v15, 4  ;;  %v1546_v27 = vrot.slane %v1544_v17, 4  ;;  %v4189_v6 = vld [vmem:[%s4991_s30 + $0x28] sm:$0xf] }
  0x84   : > { %v1740_v26 = vrot.slane %v1739_v16, 4  ;;  %v1552_v28 = vrot.slane %v1550_v18, 5  ;;  %1194 = vrot.lane.b32.xlu0 %v4057_v7, %s4902_s5  ;;  %v1537_v31 = vor.u32 %v1536_v22, %v1533_v21  ;;  %v1750_v33 = vshll.u32 %v4151_v1, 16  ;;  %v4215_v16 = vld [vmem:[%s4991_s30 + $0x90] sm:$0xe] }
  0x85   : > { %v1749_v32 = vrot.slane %v1747_v24, 4  ;;  %v1756_v34 = vshll.u32 %v4152_v19, 16  ;;  %v1735_v36 = vsel %vm5043_vm5, %v1730_v25, %v1734_v9  ;;  %v1547_v38 = vor.u32 %v1546_v27, %v1542_v23  ;;  %v4216_v17 = vld [vmem:[%s4991_s30 + $0x94] sm:$0xf]  ;;  %v4217_v22 = vld [vmem:[%s4991_s30 + $0x98] sm:$0x1] }
  0x86   : > { %v1745_v37 = vsel %vm5043_vm5, %v1740_v26, %v1744_v11  ;;  %v1760_v39 = vshrl.u32 %v4152_v19, 16  ;;  %v1538_v44 = vrot.slane %v1537_v31, 4  ;;  %v1752_v45 = vrot.slane %v1750_v33, 5  ;;  %v4190_v11 = vld [vmem:[%s4991_s30 + $0x2c] sm:$0x1] }
  0x87   : > { %1389 = vrot.lane.b32.xlu1 %v4778_v20, %s4901_s4  ;;  %v4176_v43 = vcombine.low %v1735_v36, %v1745_v37  ;;  %v1758_v46 = vrot.slane %v1756_v34, 5  ;;  %v1548_v47 = vrot.slane %v1547_v38, 4  ;;  %v1766_v49 = vshll.u32 %v4153_v29, 16  ;;  %v4191_v27 = vld [vmem:[%s4991_s30 + $0x30] sm:$0xe] }
  0x88   : > { %v1762_v48 = vrot.slane %v1760_v39, 4  ;;  %v1555_v51 = vshrl.u32 %v4127_v35, 16  ;;  %1373 = vrot.lane.b32.xlu0 %v4779_v30, %s4901_s4  ;;  %v1543_v52 = vsel %vm5043_vm5, %v1538_v44, %v1542_v23  ;;  %v1753_v53 = vor.u32 %v1752_v45, %v1749_v32  ;;  %v4192_v32 = vld [vmem:[%s4991_s30 + $0x34] sm:$0xf]  ;;  %v4193_v37 = vld [vmem:[%s4991_s30 + $0x38] sm:$0x1] }
  0x89   : > { %v1558_v54 = vshll.u32 %v4127_v35, 16  ;;  %v1564_v55 = vshll.u32 %v4128_v40, 16  ;;  %v1553_v58 = vsel %vm5043_vm5, %v1548_v47, %v1552_v28  ;;  %v1768_v60 = vrot.slane %v1766_v49, 5  ;;  %v4340_v38 = vld [vmem:[%s4991_s30 + $0x90] sm:$0xf] }
  0x8a   : > { %v1763_v59 = vor.u32 %v1762_v48, %v1758_v46  ;;  %v1557_v61 = vrot.slane %v1555_v51, 4  ;;  %v4168_v1 = vcombine.low %v1543_v52, %v1553_v58  ;;  %v1754_v2 = vrot.slane %v1753_v53, 4  ;;  %v4342_v44 = vld [vmem:[%s4991_s30 + $0x98] sm:$0x1]  ;;  %v4316_v45 = vld [vmem:[%s4991_s30 + $0x30] sm:$0xf] }
  0x8b   : > { %1391 = vrot.lane.b32.xlu1 %v4780_v41, %s4901_s4  ;;  %v1560_v3 = vrot.slane %v1558_v54, 5  ;;  %v1566_v4 = vrot.slane %v1564_v55, 5  ;;  %v1568_v8 = vshrl.u32 %v4128_v40, 16  ;;  %v1574_v9 = vshll.u32 %v4129_v50, 16 }
  0x8c   : > { %v1764_v7 = vrot.slane %v1763_v59, 4  ;;  %v4240_v10 = vrot.slane %v4212_v56, 9  ;;  %1375 = vrot.lane.b32.xlu0 %v4781_v42, %s4901_s4  ;;  %v1759_v12 = vsel %vm5043_vm5, %v1754_v2, %v1758_v46  ;;  %v2147_v14 = vrot.slane %v4213_v57, 5  ;;  %v4317_v59 = vld [vmem:[%s4991_s30 + $0x34] sm:$0xf] }
  0x8d   : > { %v1561_v13 = vor.u32 %v1560_v3, %v1557_v61  ;;  %v2150_v15 = vrot.slane %v4214_v62, 5  ;;  %v1570_v19 = vrot.slane %v1568_v8, 4  ;;  %v1576_v20 = vrot.slane %v1574_v9, 5 }
  0x8e   : > { %v1769_v18 = vsel %vm5043_vm5, %v1764_v7, %v1768_v60  ;;  %v4232_v21 = vrot.slane %v4188_v63, 9  ;;  %v2148_v25 = vsel %vm4993_vm2, %v4240_v10, %v2147_v14  ;;  %v2149_v26 = vrot.slane %v2147_v14, 4  ;;  %v5339_v46 = vpop.permute.xlu1 %1385 }
  0x8f   : > { %1934 = vrot.lane.b32.xlu1 %v4176_v43, %s4904_s7  ;;  %v4177_v23 = vcombine.low %v1759_v12, %v1769_v18  ;;  %v1562_v24 = vrot.slane %v1561_v13, 4  ;;  %v1571_v28 = vor.u32 %v1570_v19, %v1566_v4  ;;  %v2091_v29 = vrot.slane %v4189_v6, 5  ;;  %v4341_v43 = vld [vmem:[%s4991_s30 + $0x94] sm:$0xf]  ;;  %v4343_v12 = vld [vmem:[%s4991_s30 + $0x9c] sm:$0xf] }
  0x90   : > { %v2094_v30 = vrot.slane %v4190_v11, 5  ;;  %v4241_v31 = vrot.slane %v4215_v16, 9  ;;  %1918 = vrot.lane.b32.xlu0 %v4168_v1, %s4904_s7  ;;  %v2151_v34 = vsel %vm4993_vm2, %v2149_v26, %v2150_v15  ;;  %v2154_v35 = vrot.slane %v4216_v17, 5  ;;  %v5358_v11 = vpop.permute.xlu0 %1369  ;;  %v4344_v18 = vld [vmem:[%s4991_s30 + $0xa0] sm:$0xf] }
  0x91   : > { %v1567_v33 = vsel %vm5043_vm5, %v1562_v24, %v1566_v4  ;;  %v2157_v36 = vrot.slane %v4217_v22, 5  ;;  %v1572_v39 = vrot.slane %v1571_v28, 4  ;;  %v4256_v40 = vcombine.low %v2148_v25, %v2151_v34  ;;  %v4318_v4 = vld [vmem:[%s4991_s30 + $0x38] sm:$0x1]  ;;  %v4782_v24 = vld [vmem:[%s4991_s30 + $0x90] sm:$0xff]  }
  0x92   : > { %v2092_v41 = vsel %vm4993_vm2, %v4232_v21, %v2091_v29  ;;  %v2093_v42 = vrot.slane %v2091_v29, 4  ;;  %v2155_v47 = vsel %vm4993_vm2, %v4241_v31, %v2154_v35  ;;  %v2156_v48 = vrot.slane %v2154_v35, 4  ;;  %v4319_v29 = vld [vmem:[%s4991_s30 + $0x3c] sm:$0xf] }
  0x93   : > { %1936 = vrot.lane.b32.xlu1 %v4177_v23, %s4904_s7  ;;  %v4233_v49 = vrot.slane %v4191_v27, 9  ;;  %v2098_v50 = vrot.slane %v4192_v32, 5  ;;  %v1577_v51 = vsel %vm5043_vm5, %v1572_v39, %v1576_v20  ;;  %v2101_v53 = vrot.slane %v4193_v37, 5  ;;  %v4345_v23 = vld [vmem:[%s4991_s30 + $0xa4] sm:$0x1] }
  0x94   : > { %v2095_v52 = vsel %vm4993_vm2, %v2093_v42, %v2094_v30  ;;  %v2770_v54 = vshrl.u32 %v4340_v38, 16  ;;  %v4169_v55 = vcombine.low %v1567_v33, %v1577_v51  ;;  %v2158_v57 = vsel %vm4993_vm2, %v2156_v48, %v2157_v36  ;;  %v4320_v51 = vld [vmem:[%s4991_s30 + $0x40] sm:$0xf] }
  0x95   : > { %v4248_v56 = vcombine.low %v2092_v41, %v2095_v52  ;;  %v2099_v58 = vsel %vm4993_vm2, %v4233_v49, %v2098_v50  ;;  %v4257_v60 = vcombine.low %v2155_v47, %v2158_v57  ;;  %v2100_v61 = vrot.slane %v2098_v50, 4  ;;  %v5361_v13 = vpop.permute.xlu1 %1204  ;;  %v4785_v57 = vld [vmem:[%s4991_s30 + $0x3c] sm:$0xff]  }
  0x96   : > { %v2772_v62 = vrot.slane %v2770_v54, 4  ;;  %v2773_v63 = vshll.u32 %v4340_v38, 16  ;;  %1920 = vrot.lane.b32.xlu0 %v4169_v55, %s4904_s7  ;;  %v2779_v1 = vshll.u32 %v4341_v43, 16  ;;  %v2783_v2 = vshrl.u32 %v4341_v43, 16  ;;  %v4783_v38 = vld [vmem:[%s4991_s30 + $0x30] sm:$0xff]  }
  0x97   : > { %2255 = vrot.lane.b32.xlu1 %v4256_v40, %s4905_s8  ;;  %v2789_v3 = vshll.u32 %v4342_v44, 16  ;;  %v2578_v6 = vshrl.u32 %v4316_v45, 16  ;;  %v2102_v7 = vsel %vm4993_vm2, %v2100_v61, %v2101_v53  ;;  %v2581_v9 = vshll.u32 %v4316_v45, 16  ;;  %v5372_v43 = vpop.permute.xlu0 %1188  ;;  %v4784_v45 = vld [vmem:[%s4991_s30 + $0x9c] sm:$0xff]   ;;  %v4321_v55 = vld [vmem:[%s4991_s30 + $0x44] sm:$0x1] }
  0x98   : > { %v2775_v8 = vrot.slane %v2773_v63, 5  ;;  %v2587_v10 = vshll.u32 %v4317_v59, 16  ;;  %v4249_v14 = vcombine.low %v2099_v58, %v2102_v7  ;;  %v2781_v15 = vrot.slane %v2779_v1, 5 }
  0x99   : > { %v2785_v16 = vrot.slane %v2783_v2, 4  ;;  %v2791_v17 = vrot.slane %v2789_v3, 5  ;;  %v2580_v20 = vrot.slane %v2578_v6, 4  ;;  %v2583_v21 = vrot.slane %v2581_v9, 5 }
  0x9a   : > { %v2776_v19 = vor.u32 %v2775_v8, %v2772_v62  ;;  %v2589_v22 = vrot.slane %v2587_v10, 5  ;;  %2239 = vrot.lane.b32.xlu0 %v4248_v56, %s4905_s8  ;;  %v2591_v26 = vshrl.u32 %v4317_v59, 16  ;;  %v2597_v27 = vshll.u32 %v4318_v4, 16  ;;  %v5374_v44 = vpop.permute.xlu1 %1206  ;;  %v4404_v62 = vld [vmem:[%s4991_s30 + $0x90] sm:$0xe] }
  0x9b   : > { %2257 = vrot.lane.b32.xlu1 %v4257_v60, %s4905_s8  ;;  %v2786_v25 = vor.u32 %v2785_v16, %v2781_v15  ;;  %v2794_v28 = vshrl.u32 %v4343_v12, 16  ;;  %v2584_v31 = vor.u32 %v2583_v21, %v2580_v20  ;;  %v2797_v32 = vshll.u32 %v4343_v12, 16  ;;  %v4405_v4 = vld [vmem:[%s4991_s30 + $0x94] sm:$0xf]  ;;  %v4406_v10 = vld [vmem:[%s4991_s30 + $0x98] sm:$0x1]  ;;  %v5398_v20 = vpop.permute.xlu0 %1190 }
  0x9c   : > { %v2777_v30 = vrot.slane %v2776_v19, 4  ;;  %v2803_v33 = vshll.u32 %v4344_v18, 16  ;;  %v2593_v35 = vrot.slane %v2591_v26, 4  ;;  %v2599_v36 = vrot.slane %v2597_v27, 5  ;;  %v4380_v12 = vld [vmem:[%s4991_s30 + $0x30] sm:$0xe] }
  0x9d   : > { %v2787_v34 = vrot.slane %v2786_v25, 4  ;;  %v2796_v37 = vrot.slane %v2794_v28, 4  ;;  %v2585_v40 = vrot.slane %v2584_v31, 4  ;;  %v2799_v41 = vrot.slane %v2797_v32, 5  ;;  %v4382_v19 = vld [vmem:[%s4991_s30 + $0x38] sm:$0x1] }
  0x9e   : > { %v2782_v39 = vsel %vm5043_vm5, %v2777_v30, %v2781_v15  ;;  %v2805_v42 = vrot.slane %v2803_v33, 5  ;;  %2241 = vrot.lane.b32.xlu0 %v4249_v14, %s4905_s8  ;;  %v2594_v48 = vor.u32 %v2593_v35, %v2589_v22  ;;  %v2807_v49 = vshrl.u32 %v4344_v18, 16  ;;  %v4381_v18 = vld [vmem:[%s4991_s30 + $0x34] sm:$0xf]  ;;  %v417_v30 = vld [vmem:[%s4991_s30 + $0x90] sm:$0xf] }
  0x9f   : > { %2436 = vrot.lane.b32.xlu1 %v4782_v24, %s4906_s9  ;;  %v2792_v47 = vsel %vm5043_vm5, %v2787_v34, %v2791_v17  ;;  %v2813_v50 = vshll.u32 %v4345_v23, 16  ;;  %v2590_v53 = vsel %vm5043_vm5, %v2585_v40, %v2589_v22  ;;  %v2800_v54 = vor.u32 %v2799_v41, %v2796_v37  ;;  %v418_v35 = vld [vmem:[%s4991_s30 + $0x94] sm:$0xf]  ;;  %v419_v40 = vld [vmem:[%s4991_s30 + $0x98] sm:$0x1] }
  0xa0   : > { %v4368_v52 = vcombine.low %v2782_v39, %v2792_v47  ;;  %v2602_v56 = vshrl.u32 %v4319_v29, 16  ;;  %v2595_v58 = vrot.slane %v2594_v48, 4  ;;  %v2809_v59 = vrot.slane %v2807_v49, 4  ;;  %v393_v41 = vld [vmem:[%s4991_s30 + $0x30] sm:$0xf] }
  0xa1   : > { %v2815_v60 = vrot.slane %v2813_v50, 5  ;;  %v2605_v61 = vshll.u32 %v4319_v29, 16  ;;  %v2801_v63 = vrot.slane %v2800_v54, 4  ;;  %v2611_v2 = vshll.u32 %v4320_v51, 16  ;;  %v394_v49 = vld [vmem:[%s4991_s30 + $0x34] sm:$0xf] }
  0xa2   : > { %v2604_v1 = vrot.slane %v2602_v56, 4  ;;  %v2615_v3 = vshrl.u32 %v4320_v51, 16  ;;  %2420 = vrot.lane.b32.xlu0 %v4783_v38, %s4906_s9  ;;  %v2600_v6 = vsel %vm5043_vm5, %v2595_v58, %v2599_v36  ;;  %v2810_v7 = vor.u32 %v2809_v59, %v2805_v42  ;;  %v5400_v21 = vpop.permute.xlu1 %866  ;;  %v395_v50 = vld [vmem:[%s4991_s30 + $0x38] sm:$0x1] }
  0xa3   : > { %2438 = vrot.lane.b32.xlu1 %v4784_v45, %s4906_s9  ;;  %v2607_v8 = vrot.slane %v2605_v61, 5  ;;  %v2621_v9 = vshll.u32 %v4321_v55, 16  ;;  %v4360_v14 = vcombine.low %v2590_v53, %v2600_v6  ;;  %v2806_v15 = vsel %vm5043_vm5, %v2801_v63, %v2805_v42  ;;  %v4789_v6 = vld [vmem:[%s4991_s30 + $0x60] sm:$0xff]  }
  0xa4   : > { %v2613_v16 = vrot.slane %v2611_v2, 5  ;;  %v2617_v17 = vrot.slane %v2615_v3, 4  ;;  %v2811_v22 = vrot.slane %v2810_v7, 4  ;;  %v4432_v25 = vrot.slane %v4404_v62, 9  ;;  %v4786_v2 = vld [vmem:[%s4991_s30 + $0xc] sm:$0xff]   ;;  %v4787_v3 = vld [vmem:[%s4991_s30] sm:$0xff]  }
  0xa5   : > { %v2608_v23 = vor.u32 %v2607_v8, %v2604_v1  ;;  %v2623_v24 = vrot.slane %v2621_v9, 5  ;;  %v3194_v27 = vrot.slane %v4405_v4, 5  ;;  %v3197_v28 = vrot.slane %v4406_v10, 5  ;;  %v5424_v55 = vpop.permute.xlu0 %864  ;;  %v4788_v4 = vld [vmem:[%s4991_s30 + $0x6c] sm:$0xff]   ;;  %v4798_v7 = vld [vmem:[%s4991_s30 + $0x78] sm:$0xff]   ;;  %v4802_v9 = vld [vmem:[%s4991_s30 + $0x84] sm:$0xff]  }
  0xa6   : > { %v2618_v26 = vor.u32 %v2617_v17, %v2613_v16  ;;  %v4424_v29 = vrot.slane %v4380_v12, 9  ;;  %2422 = vrot.lane.b32.xlu0 %v4785_v57, %s4906_s9  ;;  %v2816_v31 = vsel %vm5043_vm5, %v2811_v22, %v2815_v60  ;;  %v3138_v33 = vrot.slane %v4381_v18, 5  ;;  %v4799_v8 = vld [vmem:[%s4991_s30 + $0x18] sm:$0xff]   ;;  %366 = vst.msk [vmem:[#allocation2 + $0x8] sm:$0xff] %vm364_vm6, %v4786_v2  ;;  %365 = vst.msk [vmem:[#allocation2] sm:$0xff] %vm364_vm6, %v4787_v3 }
  0xa7   : > { %2981 = vrot.lane.b32.xlu1 %v4368_v52, %s4907_s10  ;;  %v2609_v32 = vrot.slane %v2608_v23, 4  ;;  %v3141_v34 = vrot.slane %v4382_v19, 5  ;;  %v4369_v36 = vcombine.low %v2806_v15, %v2816_v31  ;;  %v3195_v38 = vsel %vm4993_vm2, %v4432_v25, %v3194_v27  ;;  %v4408_v23 = vld [vmem:[%s4991_s30 + $0xa0] sm:$0xf]  ;;  %v4383_v25 = vld [vmem:[%s4991_s30 + $0x3c] sm:$0xe] }
  0xa8   : > { %v2619_v37 = vrot.slane %v2618_v26, 4  ;;  %v3196_v39 = vrot.slane %v3194_v27, 4  ;;  %v5416_v45 = vsel %vm4993_vm2, %v4424_v29, %v3138_v33  ;;  %v3140_v47 = vrot.slane %v3138_v33, 4  ;;  %v4803_v26 = vld [vmem:[%s4991_s30 + $0x24] sm:$0xff]   ;;  %374 = vst.msk [vmem:[#allocation2 + $0x48] sm:$0xff] %vm364_vm6, %v4788_v4  ;;  %373 = vst.msk [vmem:[#allocation2 + $0x40] sm:$0xff] %vm364_vm6, %v4789_v6 }
  0xa9   : > { %v2614_v42 = vsel %vm5043_vm5, %v2609_v32, %v2613_v16  ;;  %v721_v48 = vshrl.u32 %v417_v30, 16  ;;  %v724_v53 = vshll.u32 %v417_v30, 16  ;;  %v730_v54 = vshll.u32 %v418_v35, 16  ;;  %v5443_v16 = vld [vmem:[%s4991_s30 + $0x9c] sm:$0xe]  ;;  %375 = vst.msk [vmem:[#allocation2 + $0x50] sm:$0xff] %vm364_vm6, %v4798_v7 }
  0xaa   : > { %v2624_v51 = vsel %vm5043_vm5, %v2619_v37, %v2623_v24  ;;  %v3198_v52 = vsel %vm4993_vm2, %v3196_v39, %v3197_v28  ;;  %v5426_v56 = vpop.permute.xlu1 %882  ;;  %2965 = vrot.lane.b32.xlu0 %v4360_v14, %s4907_s10  ;;  %v3142_v59 = vsel %vm4993_vm2, %v3140_v47, %v3141_v34  ;;  %v734_v1 = vshrl.u32 %v418_v35, 16  ;;  %v5447_v24 = vld [vmem:[%s4991_s30 + $0xa4] sm:$0x1]  ;;  %v4384_v35 = vld [vmem:[%s4991_s30 + $0x40] sm:$0xf]  ;;  %367 = vst.msk [vmem:[#allocation2 + $0x10] sm:$0xff] %vm364_vm6, %v4799_v8 }
  0xab   : > { %2983 = vrot.lane.b32.xlu1 %v4369_v36, %s4907_s10  ;;  %v4361_v57 = vcombine.low %v2614_v42, %v2624_v51  ;;  %v4448_v58 = vcombine.low %v3195_v38, %v3198_v52  ;;  %v723_v60 = vrot.slane %v721_v48, 4  ;;  %v4440_v61 = vcombine.low %v5416_v45, %v3142_v59  ;;  %v4385_v39 = vld [vmem:[%s4991_s30 + $0x44] sm:$0x1]  ;;  %376 = vst.msk [vmem:[#allocation2 + $0x58] sm:$0xff] %vm364_vm6, %v4802_v9  ;;  %v420_v51 = vld [vmem:[%s4991_s30 + $0x9c] sm:$0xf] }
  0xac   : > { %v726_v62 = vrot.slane %v724_v53, 5  ;;  %v5433_v63 = vrot.slane %v730_v54, 5  ;;  %v740_v10 = vshll.u32 %v419_v40, 16  ;;  %v529_v12 = vshrl.u32 %v393_v41, 16  ;;  %368 = vst.msk [vmem:[#allocation2 + $0x18] sm:$0xff] %vm364_vm6, %v4803_v26 }
  0xad   : > { %v532_v14 = vshll.u32 %v393_v41, 16  ;;  %v538_v15 = vshll.u32 %v394_v49, 16  ;;  %v736_v18 = vrot.slane %v734_v1, 4  ;;  %v542_v19 = vshrl.u32 %v394_v49, 16  ;;  %914 = vst.msk [vmem:[#allocation2 + $0x8] sm:$0xff] %vm912_vm7, %v5400_v21  ;;  %913 = vst.msk [vmem:[#allocation2] sm:$0xff] %vm912_vm7, %v5424_v55 }
  0xae   : > { %v727_v17 = vor.u32 %v726_v62, %v723_v60  ;;  %v548_v22 = vshll.u32 %v395_v50, 16  ;;  %2967 = vrot.lane.b32.xlu0 %v4361_v57, %s4907_s10  ;;  %v742_v27 = vrot.slane %v740_v10, 5  ;;  %v531_v28 = vrot.slane %v529_v12, 4  ;;  %v5455_v37 = vpop.permute.xlu1 %1387  ;;  %922 = vst.msk [vmem:[#allocation2 + $0x48] sm:$0xff] %vm912_vm7, %v5426_v56  ;;  %v421_v55 = vld [vmem:[%s4991_s30 + $0xa0] sm:$0xf] }
  0xaf   : > { %3302 = vrot.lane.b32.xlu1 %v4448_v58, %s4908_s11  ;;  %v534_v29 = vrot.slane %v532_v14, 5  ;;  %v540_v30 = vrot.slane %v538_v15, 5  ;;  %v737_v32 = vor.u32 %v736_v18, %v5433_v63  ;;  %v544_v33 = vrot.slane %v542_v19, 4  ;;  %v881_v36 = vpop.permute.xlu0 %880  ;;  %1237 = vst.msk [vmem:[#allocation2] sm:$0xff] %vm1236_vm8, %v5372_v43  ;;  %1238 = vst.msk [vmem:[#allocation2 + $0x8] sm:$0xff] %vm1236_vm8, %v5398_v20 }
  0xb0   : > { %v728_v31 = vrot.slane %v727_v17, 4  ;;  %v550_v34 = vrot.slane %v548_v22, 5  ;;  %v4433_v45 = vrot.slane %v5443_v16, 9  ;;  %v3201_v48 = vrot.slane %v4408_v23, 5  ;;  %921 = vst.msk [vmem:[#allocation2 + $0x40] sm:$0xff] %vm912_vm7, %v881_v36 }
  0xb1   : > { %v535_v38 = vor.u32 %v534_v29, %v531_v28  ;;  %v738_v41 = vrot.slane %v737_v32, 4  ;;  %v545_v42 = vor.u32 %v544_v33, %v540_v30  ;;  %v3204_v49 = vrot.slane %v5447_v24, 5  ;;  %1246 = vst.msk [vmem:[#allocation2 + $0x48] sm:$0xff] %vm1236_vm8, %v5374_v44  ;;  %1245 = vst.msk [vmem:[#allocation2 + $0x40] sm:$0xff] %vm1236_vm8, %v5361_v13  ;;  %v422_v60 = vld [vmem:[%s4991_s30 + $0xa4] sm:$0x1] }
  0xb2   : > { %v733_v40 = vsel %vm5043_vm5, %v728_v31, %v5433_v63  ;;  %3286 = vrot.lane.b32.xlu0 %v4440_v61, %s4908_s11  ;;  %v4425_v50 = vrot.slane %v4383_v25, 9  ;;  %v3145_v21 = vrot.slane %v4384_v35, 5  ;;  %v3148_v54 = vrot.slane %v4385_v39, 5  ;;  %v396_v4 = vld [vmem:[%s4991_s30 + $0x3c] sm:$0xf]  ;;  %1427 = vst.msk [vmem:[#allocation2 + $0x48] sm:$0xff] %vm1417_vm9, %v5455_v37 }
  0xb3   : > { %v536_v47 = vrot.slane %v535_v38, 4  ;;  %v743_v52 = vsel %vm5043_vm5, %v738_v41, %v742_v27  ;;  %v546_v53 = vrot.slane %v545_v42, 4  ;;  %v1372_v56 = vpop.permute.xlu0 %1371  ;;  %v3202_v43 = vsel %vm4993_vm2, %v4433_v45, %v3201_v48  ;;  %v5500_v62 = vpop.permute.xlu1 %1930  ;;  %v397_v6 = vld [vmem:[%s4991_s30 + $0x40] sm:$0xf]  ;;  %v398_v12 = vld [vmem:[%s4991_s30 + $0x44] sm:$0x1] }
  0xb4   : > { %v4034_v57 = vcombine.low %v733_v40, %v743_v52  ;;  %v3203_v20 = vrot.slane %v3201_v48, 4  ;;  %v3146_v44 = vsel %vm4993_vm2, %v4425_v50, %v3145_v21  ;;  %v3147_v13 = vrot.slane %v3145_v21, 4  ;;  %v965_v18 = vld [vmem:[%s4991_s30 + $0x90] sm:$0xe]  ;;  %v966_v19 = vld [vmem:[%s4991_s30 + $0x94] sm:$0xf] }
  0xb5   : > { %v541_v58 = vsel %vm5043_vm5, %v536_v47, %v540_v30  ;;  %v551_v59 = vsel %vm5043_vm5, %v546_v53, %v550_v34  ;;  %v745_v61 = vshrl.u32 %v420_v51, 16  ;;  %v748_v2 = vshll.u32 %v420_v51, 16  ;;  %v967_v27 = vld [vmem:[%s4991_s30 + $0x98] sm:$0x1]  ;;  %v941_v32 = vld [vmem:[%s4991_s30 + $0x30] sm:$0xe] }
  0xb6   : > { %888 = vrot.lane.b32.xlu1 %v4034_v57, %s4903_s6  ;;  %v4026_v63 = vcombine.low %v541_v58, %v551_v59  ;;  %v3205_v1 = vsel %vm4993_vm2, %v3203_v20, %v3204_v49  ;;  %v754_v3 = vshll.u32 %v421_v55, 16  ;;  %v3149_v8 = vsel %vm4993_vm2, %v3147_v13, %v3148_v54  ;;  %v942_v38 = vld [vmem:[%s4991_s30 + $0x34] sm:$0xf]  ;;  %v943_v47 = vld [vmem:[%s4991_s30 + $0x38] sm:$0x1]  ;;  %1418 = vst.msk [vmem:[#allocation2] sm:$0xff] %vm1417_vm9, %v5358_v11 }
  0xb7   : > { %v4449_v7 = vcombine.low %v3202_v43, %v3205_v1  ;;  %v747_v9 = vrot.slane %v745_v61, 4  ;;  %v758_v10 = vshrl.u32 %v421_v55, 16  ;;  %v4441_v14 = vcombine.low %v3146_v44, %v3149_v8  ;;  %v5513_v22 = vpop.permute.xlu0 %1914  ;;  %v4813_v40 = vld [vmem:[%s4991_s30 + $0x90] sm:$0xff]   ;;  %1426 = vst.msk [vmem:[#allocation2 + $0x40] sm:$0xff] %vm1417_vm9, %v5339_v46  ;;  %1419 = vst.msk [vmem:[#allocation2 + $0x8] sm:$0xff] %vm1417_vm9, %v1372_v56 }
  0xb8   : > { %872 = vrot.lane.b32.xlu0 %v4026_v63, %s4903_s6  ;;  %v750_v15 = vrot.slane %v748_v2, 5  ;;  %v756_v16 = vrot.slane %v754_v3, 5  ;;  %v764_v17 = vshll.u32 %v422_v60, 16  ;;  %v553_v24 = vshrl.u32 %v396_v4, 16  ;;  %v968_v52 = vld [vmem:[%s4991_s30 + $0x9c] sm:$0xe] }
  0xb9   : > { %v760_v23 = vrot.slane %v758_v10, 4  ;;  %v556_v25 = vshll.u32 %v396_v4, 16  ;;  %v562_v26 = vshll.u32 %v397_v6, 16  ;;  %v566_v30 = vshrl.u32 %v397_v6, 16  ;;  %377 = vst.msk [vmem:[#allocation2 + $0x60] sm:$0xff] %vm364_vm6, %v4813_v40  ;;  %v4814_v53 = vld [vmem:[%s4991_s30 + $0x30] sm:$0xff]  }
  0xba   : > { %3304 = vrot.lane.b32.xlu1 %v4449_v7, %s4908_s11  ;;  %v751_v28 = vor.u32 %v750_v15, %v747_v9  ;;  %v766_v29 = vrot.slane %v764_v17, 5  ;;  %v572_v31 = vshll.u32 %v398_v12, 16  ;;  %v555_v34 = vrot.slane %v553_v24, 4  ;;  %v969_v11 = vld [vmem:[%s4991_s30 + $0xa0] sm:$0xf]  ;;  %369 = vst.msk [vmem:[#allocation2 + $0x20] sm:$0xff] %vm364_vm6, %v4814_v53 }
  0xbb   : > { %v761_v33 = vor.u32 %v760_v23, %v756_v16  ;;  %v558_v35 = vrot.slane %v556_v25, 5  ;;  %v564_v36 = vrot.slane %v562_v26, 5  ;;  %v1933_v39 = vpop.permute.xlu1 %1932  ;;  %v568_v42 = vrot.slane %v566_v30, 4  ;;  %v5536_v57 = vld [vmem:[%s4991_s30 + $0xa4] sm:$0x1]  ;;  %1971 = vst.msk [vmem:[#allocation2 + $0x40] sm:$0xff] %vm1962_vm10, %v5500_v62 }
  0xbc   : > { %3288 = vrot.lane.b32.xlu0 %v4441_v14, %s4908_s11  ;;  %v752_v41 = vrot.slane %v751_v28, 4  ;;  %v574_v45 = vrot.slane %v572_v31, 5  ;;  %v4050_v50 = vrot.slane %v965_v18, 9  ;;  %v1114_v51 = vrot.slane %v966_v19, 5  ;;  %v944_v46 = vld [vmem:[%s4991_s30 + $0x3c] sm:$0xe] }
  0xbd   : > { %v762_v48 = vrot.slane %v761_v33, 4  ;;  %v559_v49 = vor.u32 %v558_v35, %v555_v34  ;;  %v569_v37 = vor.u32 %v568_v42, %v564_v36  ;;  %v1117_v54 = vrot.slane %v967_v27, 5  ;;  %v945_v44 = vld [vmem:[%s4991_s30 + $0x40] sm:$0xf]  ;;  %v946_v13 = vld [vmem:[%s4991_s30 + $0x44] sm:$0x1] }
  0xbe   : > { %v757_v21 = vsel %vm5043_vm5, %v752_v41, %v756_v16  ;;  %v4042_v55 = vrot.slane %v941_v32, 9  ;;  %v1115_v20 = vsel %vm4993_vm2, %v4050_v50, %v1114_v51  ;;  %v1116_v59 = vrot.slane %v1114_v51, 4  ;;  %v4154_v3 = vld [vmem:[%s4991_s30 + $0x9c] sm:$0xf]  ;;  %v4155_v8 = vld [vmem:[%s4991_s30 + $0xa0] sm:$0xf] }
  0xbf   : > { %v1917_v56 = vpop.permute.xlu0 %1916  ;;  %v767_v58 = vsel %vm5043_vm5, %v762_v48, %v766_v29  ;;  %v560_v43 = vrot.slane %v559_v49, 4  ;;  %v2252_v60 = vpop.permute.xlu1 %2251  ;;  %v570_v63 = vrot.slane %v569_v37, 4  ;;  %v1058_v1 = vrot.slane %v942_v38, 5  ;;  %1963 = vst.msk [vmem:[#allocation2] sm:$0xff] %vm1962_vm10, %v5513_v22  ;;  %1972 = vst.msk [vmem:[#allocation2 + $0x48] sm:$0xff] %vm1962_vm10, %v1933_v39  ;;  %v4815_v17 = vld [vmem:[%s4991_s30 + $0x9c] sm:$0xff]  }
  0xc0   : > { %v4035_v61 = vcombine.low %v757_v21, %v767_v58  ;;  %v1061_v2 = vrot.slane %v943_v47, 5  ;;  %v1118_v6 = vsel %vm4993_vm2, %v1116_v59, %v1117_v54  ;;  %v4051_v7 = vrot.slane %v968_v52, 9  ;;  %1964 = vst.msk [vmem:[#allocation2 + $0x8] sm:$0xff] %vm1962_vm10, %v1917_v56  ;;  %v4156_v16 = vld [vmem:[%s4991_s30 + $0xa4] sm:$0x1]  ;;  %v4816_v26 = vld [vmem:[%s4991_s30 + $0x3c] sm:$0xff]  }
  0xc1   : > { %v565_v4 = vsel %vm5043_vm5, %v560_v43, %v564_v36  ;;  %v575_v9 = vsel %vm5043_vm5, %v570_v63, %v574_v45  ;;  %v4066_v10 = vcombine.low %v1115_v20, %v1118_v6  ;;  %v1059_v12 = vsel %vm4993_vm2, %v4042_v55, %v1058_v1  ;;  %v4130_v28 = vld [vmem:[%s4991_s30 + $0x3c] sm:$0xf]  ;;  %378 = vst.msk [vmem:[#allocation2 + $0x68] sm:$0xff] %vm364_vm6, %v4815_v17  ;;  %v4131_v33 = vld [vmem:[%s4991_s30 + $0x40] sm:$0xf] }
  0xc2   : > { %890 = vrot.lane.b32.xlu1 %v4035_v61, %s4903_s6  ;;  %v1060_v14 = vrot.slane %v1058_v1, 4  ;;  %v4027_v18 = vcombine.low %v565_v4, %v575_v9  ;;  %v1121_v19 = vrot.slane %v969_v11, 5  ;;  %v1124_v23 = vrot.slane %v5536_v57, 5  ;;  %2292 = vst.msk [vmem:[#allocation2 + $0x40] sm:$0xff] %vm2283_vm11, %v2252_v60  ;;  %v4132_v52 = vld [vmem:[%s4991_s30 + $0x44] sm:$0x1] }
  0xc3   : > { %v2236_v15 = vpop.permute.xlu0 %2235  ;;  %v4043_v24 = vrot.slane %v944_v46, 9  ;;  %v2254_v25 = vpop.permute.xlu1 %2253  ;;  %v1065_v22 = vrot.slane %v945_v44, 5  ;;  %v1068_v27 = vrot.slane %v946_v13, 5  ;;  %v1771_v32 = vshrl.u32 %v4154_v3, 16  ;;  %370 = vst.msk [vmem:[#allocation2 + $0x28] sm:$0xff] %vm364_vm6, %v4816_v26  ;;  %v4790_v55 = vld [vmem:[%s4991_s30 + $0x9c] sm:$0xff]  }
  0xc4   : > { %v1062_v62 = vsel %vm4993_vm2, %v1060_v14, %v1061_v2  ;;  %874 = vrot.lane.b32.xlu0 %v4027_v18, %s4903_s6  ;;  %v1122_v30 = vsel %vm4993_vm2, %v4051_v7, %v1121_v19  ;;  %v1123_v31 = vrot.slane %v1121_v19, 4  ;;  %2284 = vst.msk [vmem:[#allocation2] sm:$0xff] %vm2283_vm11, %v2236_v15  ;;  %2293 = vst.msk [vmem:[#allocation2 + $0x48] sm:$0xff] %vm2283_vm11, %v2254_v25  ;;  %v1774_v38 = vshll.u32 %v4154_v3, 16  ;;  %v4157_v43 = vld [vmem:[%s4991_s30 + $0xa8] sm:$0xf] }
  0xc5   : > { %v4058_v29 = vcombine.low %v1059_v12, %v1062_v62  ;;  %v1066_v34 = vsel %vm4993_vm2, %v4043_v24, %v1065_v22  ;;  %v1067_v35 = vrot.slane %v1065_v22, 4  ;;  %v1780_v39 = vshll.u32 %v4155_v8, 16  ;;  %v4158_v13 = vld [vmem:[%s4991_s30 + $0xac] sm:$0xf]  ;;  %v4791_v3 = vld [vmem:[%s4991_s30 + $0x3c] sm:$0xff]  }
  0xc6   : > { %1212 = vrot.lane.b32.xlu1 %v4066_v10, %s4902_s5  ;;  %v1125_v40 = vsel %vm4993_vm2, %v1123_v31, %v1124_v23  ;;  %v1773_v41 = vrot.slane %v1771_v32, 4  ;;  %v1784_v42 = vshrl.u32 %v4155_v8, 16  ;;  %v1790_v45 = vshll.u32 %v4156_v16, 16  ;;  %v4792_v9 = vld [vmem:[%s4991_s30 + $0xa8] sm:$0xff]   ;;  %v4159_v15 = vld [vmem:[%s4991_s30 + $0xb0] sm:$0x1] }
  0xc7   : > { %v2238_v36 = vpop.permute.xlu0 %2237  ;;  %v2433_v47 = vpop.permute.xlu1 %2432  ;;  %v4067_v48 = vcombine.low %v1122_v30, %v1125_v40  ;;  %v1069_v49 = vsel %vm4993_vm2, %v1067_v35, %v1068_v27  ;;  %v1776_v50 = vrot.slane %v1774_v38, 5  ;;  %v1782_v51 = vrot.slane %v1780_v39, 5  ;;  %v4133_v17 = vld [vmem:[%s4991_s30 + $0x48] sm:$0xf]  ;;  %v4134_v26 = vld [vmem:[%s4991_s30 + $0x4c] sm:$0xf] }
  0xc8   : > { %2285 = vst.msk [vmem:[#allocation2 + $0x8] sm:$0xff] %vm2283_vm11, %v2238_v36  ;;  %1196 = vrot.lane.b32.xlu0 %v4058_v29, %s4902_s5  ;;  %v4059_v53 = vcombine.low %v1066_v34, %v1069_v49  ;;  %v1786_v21 = vrot.slane %v1784_v42, 4  ;;  %v1792_v37 = vrot.slane %v1790_v45, 5  ;;  %v1579_v54 = vshrl.u32 %v4130_v28, 16  ;;  %v4135_v30 = vld [vmem:[%s4991_s30 + $0x50] sm:$0x1] }
  0xc9   : > { %v1777_v11 = vor.u32 %v1776_v50, %v1773_v41  ;;  %v1582_v57 = vshll.u32 %v4130_v28, 16  ;;  %v1588_v46 = vshll.u32 %v4131_v33, 16  ;;  %v1592_v56 = vshrl.u32 %v4131_v33, 16  ;;  %2473 = vst.msk [vmem:[#allocation2 + $0x40] sm:$0xff] %vm2464_vm12, %v2433_v47  ;;  %v4218_v31 = vld [vmem:[%s4991_s30 + $0x9c] sm:$0xe] }
  0xca   : > { %1214 = vrot.lane.b32.xlu1 %v4067_v48, %s4902_s5  ;;  %v1787_v20 = vor.u32 %v1786_v21, %v1782_v51  ;;  %v1581_v59 = vrot.slane %v1579_v54, 4  ;;  %v1598_v44 = vshll.u32 %v4132_v52, 16  ;;  %v1795_v7 = vshrl.u32 %v4157_v43, 16  ;;  %v4793_v32 = vld [vmem:[%s4991_s30 + $0x48] sm:$0xff]   ;;  %v4219_v38 = vld [vmem:[%s4991_s30 + $0xa0] sm:$0xf] }
  0xcb   : > { %v2417_v58 = vpop.permute.xlu0 %2416  ;;  %v2435_v60 = vpop.permute.xlu1 %2434  ;;  %v1778_v61 = vrot.slane %v1777_v11, 4  ;;  %v1584_v63 = vrot.slane %v1582_v57, 5  ;;  %v1590_v1 = vrot.slane %v1588_v46, 5  ;;  %v1594_v2 = vrot.slane %v1592_v56, 4  ;;  %v4220_v39 = vld [vmem:[%s4991_s30 + $0xa4] sm:$0x1] }
  0xcc   : > { %2465 = vst.msk [vmem:[#allocation2] sm:$0xff] %vm2464_vm12, %v2417_v58  ;;  %2474 = vst.msk [vmem:[#allocation2 + $0x48] sm:$0xff] %vm2464_vm12, %v2435_v60  ;;  %1198 = vrot.lane.b32.xlu0 %v4059_v53, %s4902_s5  ;;  %v1788_v4 = vrot.slane %v1787_v20, 4  ;;  %v1600_v6 = vrot.slane %v1598_v44, 5  ;;  %v1798_v8 = vshll.u32 %v4157_v43, 16  ;;  %v1804_v16 = vshll.u32 %v4158_v13, 16 }
  0xcd   : > { %v1783_v10 = vsel %vm5043_vm5, %v1778_v61, %v1782_v51  ;;  %v1585_v12 = vor.u32 %v1584_v63, %v1581_v59  ;;  %v1595_v14 = vor.u32 %v1594_v2, %v1590_v1  ;;  %v1797_v23 = vrot.slane %v1795_v7, 4  ;;  %v4194_v47 = vld [vmem:[%s4991_s30 + $0x3c] sm:$0xe]  ;;  %v4195_v48 = vld [vmem:[%s4991_s30 + $0x40] sm:$0xf] }
  0xce   : > { %1393 = vrot.lane.b32.xlu1 %v4790_v55, %s4901_s4  ;;  %v1793_v19 = vsel %vm5043_vm5, %v1788_v4, %v1792_v37  ;;  %v1800_v24 = vrot.slane %v1798_v8, 5  ;;  %v1808_v25 = vshrl.u32 %v4158_v13, 16  ;;  %v1806_v29 = vrot.slane %v1804_v16, 5  ;;  %v4196_v13 = vld [vmem:[%s4991_s30 + $0x44] sm:$0x1] }
  0xcf   : > { %v2419_v18 = vpop.permute.xlu0 %2418  ;;  %v5608_v62 = vpop.permute.xlu1 %2977  ;;  %v4178_v22 = vcombine.low %v1783_v10, %v1793_v19  ;;  %v1586_v27 = vrot.slane %v1585_v12, 4  ;;  %v1596_v28 = vrot.slane %v1595_v14, 4  ;;  %v1814_v35 = vshll.u32 %v4159_v15, 16  ;;  %v4221_v2 = vld [vmem:[%s4991_s30 + $0xa8] sm:$0xe] }
  0xd0   : > { %2466 = vst.msk [vmem:[#allocation2 + $0x8] sm:$0xff] %vm2464_vm12, %v2419_v18  ;;  %1377 = vrot.lane.b32.xlu0 %v4791_v3, %s4901_s4  ;;  %v1801_v33 = vor.u32 %v1800_v24, %v1797_v23  ;;  %v1810_v34 = vrot.slane %v1808_v25, 4  ;;  %v1603_v36 = vshrl.u32 %v4133_v17, 16  ;;  %v1606_v42 = vshll.u32 %v4133_v17, 16  ;;  %v4222_v8 = vld [vmem:[%s4991_s30 + $0xac] sm:$0xf] }
  0xd1   : > { %v1591_v40 = vsel %vm5043_vm5, %v1586_v27, %v1590_v1  ;;  %v1601_v41 = vsel %vm5043_vm5, %v1596_v28, %v1600_v6  ;;  %v1612_v45 = vshll.u32 %v4134_v26, 16  ;;  %v1816_v53 = vrot.slane %v1814_v35, 5  ;;  %v4197_v17 = vld [vmem:[%s4991_s30 + $0x48] sm:$0xe]  ;;  %v4198_v25 = vld [vmem:[%s4991_s30 + $0x4c] sm:$0xf] }
  0xd2   : > { %1395 = vrot.lane.b32.xlu1 %v4792_v9, %s4901_s4  ;;  %v4170_v50 = vcombine.low %v1591_v40, %v1601_v41  ;;  %v1802_v51 = vrot.slane %v1801_v33, 4  ;;  %v1811_v52 = vor.u32 %v1810_v34, %v1806_v29  ;;  %v1605_v37 = vrot.slane %v1603_v36, 4  ;;  %v4223_v9 = vld [vmem:[%s4991_s30 + $0xb0] sm:$0x1]  ;;  %3018 = vst.msk [vmem:[#allocation2 + $0x40] sm:$0xff] %vm3009_vm13, %v5608_v62 }
  0xd3   : > { %v2962_v49 = vpop.permute.xlu0 %2961  ;;  %v1608_v54 = vrot.slane %v1606_v42, 5  ;;  %v1614_v55 = vrot.slane %v1612_v45, 5  ;;  %v1616_v11 = vshrl.u32 %v4134_v26, 16  ;;  %v1622_v56 = vshll.u32 %v4135_v30, 16  ;;  %v4346_v30 = vld [vmem:[%s4991_s30 + $0xa8] sm:$0xf] }
  0xd4   : > { %v2980_v21 = vpop.permute.xlu1 %2979  ;;  %1379 = vrot.lane.b32.xlu0 %v4793_v32, %s4901_s4  ;;  %v1807_v57 = vsel %vm5043_vm5, %v1802_v51, %v1806_v29  ;;  %v1812_v46 = vrot.slane %v1811_v52, 4  ;;  %v4242_v58 = vrot.slane %v4218_v31, 9  ;;  %v2161_v59 = vrot.slane %v4219_v38, 5  ;;  %3010 = vst.msk [vmem:[#allocation2] sm:$0xff] %vm3009_vm13, %v2962_v49  ;;  %v4199_v29 = vld [vmem:[%s4991_s30 + $0x50] sm:$0x1] }
  0xd5   : > { %v1609_v43 = vor.u32 %v1608_v54, %v1605_v37  ;;  %v1618_v20 = vrot.slane %v1616_v11, 4  ;;  %v2164_v44 = vrot.slane %v4220_v39, 5  ;;  %v1624_v61 = vrot.slane %v1622_v56, 5  ;;  %3019 = vst.msk [vmem:[#allocation2 + $0x48] sm:$0xff] %vm3009_vm13, %v2980_v21  ;;  %v4347_v35 = vld [vmem:[%s4991_s30 + $0xac] sm:$0xf] }
  0xd6   : > { %1938 = vrot.lane.b32.xlu1 %v4178_v22, %s4904_s7  ;;  %v1817_v60 = vsel %vm5043_vm5, %v1812_v46, %v1816_v53  ;;  %v4234_v63 = vrot.slane %v4194_v47, 9  ;;  %v2105_v1 = vrot.slane %v4195_v48, 5  ;;  %v2162_v7 = vsel %vm4993_vm2, %v4242_v58, %v2161_v59  ;;  %v4348_v41 = vld [vmem:[%s4991_s30 + $0xb0] sm:$0x1]  ;;  %v4322_v48 = vld [vmem:[%s4991_s30 + $0x48] sm:$0xf] }
  0xd7   : > { %v4179_v3 = vcombine.low %v1807_v57, %v1817_v60  ;;  %v1610_v4 = vrot.slane %v1609_v43, 4  ;;  %v1619_v6 = vor.u32 %v1618_v20, %v1614_v55  ;;  %v2163_v12 = vrot.slane %v2161_v59, 4  ;;  %v4323_v11 = vld [vmem:[%s4991_s30 + $0x4c] sm:$0xf]  ;;  %v4324_v58 = vld [vmem:[%s4991_s30 + $0x50] sm:$0x1] }
  0xd8   : > { %v2964_v10 = vpop.permute.xlu0 %2963  ;;  %1922 = vrot.lane.b32.xlu0 %v4170_v50, %s4904_s7  ;;  %v5638_v14 = vsel %vm4993_vm2, %v4234_v63, %v2105_v1  ;;  %v2107_v15 = vrot.slane %v2105_v1, 4  ;;  %v2108_v16 = vrot.slane %v4196_v13, 5  ;;  %v3299_v18 = vpop.permute.xlu1 %3298  ;;  %v4243_v24 = vrot.slane %v4221_v2, 9  ;;  %v4794_v59 = vld [vmem:[%s4991_s30 + $0xa8] sm:$0xff]   ;;  %v4349_v63 = vld [vmem:[%s4991_s30 + $0xb4] sm:$0xf] }
  0xd9   : > { %v1615_v19 = vsel %vm5043_vm5, %v1610_v4, %v1614_v55  ;;  %v1620_v23 = vrot.slane %v1619_v6, 4  ;;  %v2165_v26 = vsel %vm4993_vm2, %v2163_v12, %v2164_v44  ;;  %v2168_v27 = vrot.slane %v4222_v8, 5  ;;  %3011 = vst.msk [vmem:[#allocation2 + $0x8] sm:$0xff] %vm3009_vm13, %v2964_v10  ;;  %v4350_v12 = vld [vmem:[%s4991_s30 + $0xb8] sm:$0xf] }
  0xda   : > { %1940 = vrot.lane.b32.xlu1 %v4179_v3, %s4904_s7  ;;  %v2109_v22 = vsel %vm4993_vm2, %v2107_v15, %v2108_v16  ;;  %v2171_v28 = vrot.slane %v4223_v9, 5  ;;  %v4258_v32 = vcombine.low %v2162_v7, %v2165_v26  ;;  %v4235_v34 = vrot.slane %v4197_v17, 9  ;;  %3339 = vst.msk [vmem:[#allocation2 + $0x40] sm:$0xff] %vm3330_vm14, %v3299_v18  ;;  %v4351_v16 = vld [vmem:[%s4991_s30 + $0xbc] sm:$0x1]  ;;  %v4796_v18 = vld [vmem:[%s4991_s30 + $0xb4] sm:$0xff]  }
  0xdb   : > { %v1625_v31 = vsel %vm5043_vm5, %v1620_v23, %v1624_v61  ;;  %v4250_v33 = vcombine.low %v5638_v14, %v2109_v22  ;;  %v2169_v38 = vsel %vm4993_vm2, %v4243_v24, %v2168_v27  ;;  %v2170_v39 = vrot.slane %v2168_v27, 4 }
  0xdc   : > { %v3283_v62 = vpop.permute.xlu0 %3282  ;;  %v4171_v36 = vcombine.low %v1615_v19, %v1625_v31  ;;  %v2112_v40 = vrot.slane %v4198_v25, 5  ;;  %v2115_v42 = vrot.slane %v4199_v29, 5  ;;  %v2818_v45 = vshrl.u32 %v4346_v30, 16 }
  0xdd   : > { %v2821_v47 = vshll.u32 %v4346_v30, 16  ;;  %v2172_v49 = vsel %vm4993_vm2, %v2170_v39, %v2171_v28  ;;  %3331 = vst.msk [vmem:[#allocation2] sm:$0xff] %vm3330_vm14, %v3283_v62  ;;  %v2827_v53 = vshll.u32 %v4347_v35, 16  ;;  %v2831_v55 = vshrl.u32 %v4347_v35, 16  ;;  %v4795_v28 = vld [vmem:[%s4991_s30 + $0x48] sm:$0xff]  }
  0xde   : > { %2259 = vrot.lane.b32.xlu1 %v4258_v32, %s4905_s8  ;;  %1924 = vrot.lane.b32.xlu0 %v4171_v36, %s4904_s7  ;;  %v2113_v50 = vsel %vm4993_vm2, %v4235_v34, %v2112_v40  ;;  %v2114_v51 = vrot.slane %v2112_v40, 4  ;;  %v4259_v21 = vcombine.low %v2169_v38, %v2172_v49  ;;  %v2820_v37 = vrot.slane %v2818_v45, 4  ;;  %v4326_v38 = vld [vmem:[%s4991_s30 + $0x58] sm:$0xf]  ;;  %v4327_v45 = vld [vmem:[%s4991_s30 + $0x5c] sm:$0x1] }
  0xdf   : > { %v885_v52 = vpop.permute.xlu1 %884  ;;  %v2823_v54 = vrot.slane %v2821_v47, 5  ;;  %v2829_v46 = vrot.slane %v2827_v53, 5  ;;  %v2837_v56 = vshll.u32 %v4348_v41, 16  ;;  %v2626_v43 = vshrl.u32 %v4322_v48, 16 }
  0xe0   : > { %923 = vst.msk [vmem:[#allocation2 + $0x50] sm:$0xff] %vm912_vm7, %v885_v52  ;;  %v2116_v57 = vsel %vm4993_vm2, %v2114_v51, %v2115_v42  ;;  %v2833_v60 = vrot.slane %v2831_v55, 4  ;;  %v2629_v61 = vshll.u32 %v4322_v48, 16  ;;  %v2635_v3 = vshll.u32 %v4323_v11, 16  ;;  %v4797_v52 = vld [vmem:[%s4991_s30 + $0x54] sm:$0xff]  }
  0xe1   : > { %v4251_v20 = vcombine.low %v2113_v50, %v2116_v57  ;;  %v2824_v13 = vor.u32 %v2823_v54, %v2820_v37  ;;  %v2839_v1 = vrot.slane %v2837_v56, 5  ;;  %v2628_v2 = vrot.slane %v2626_v43, 4  ;;  %v3355_v27 = vld [vmem:[#allocation2 + $0x40] sm:$0xff]  ;;  %v4410_v55 = vld [vmem:[%s4991_s30 + $0xa8] sm:$0xe] }
  0xe2   : > { %2261 = vrot.lane.b32.xlu1 %v4259_v21, %s4905_s8  ;;  %2243 = vrot.lane.b32.xlu0 %v4250_v33, %s4905_s8  ;;  %v2639_v4 = vshrl.u32 %v4323_v11, 16  ;;  %v2834_v8 = vor.u32 %v2833_v60, %v2829_v46  ;;  %v2631_v9 = vrot.slane %v2629_v61, 5  ;;  %v2645_v10 = vshll.u32 %v4324_v58, 16  ;;  %v4325_v33 = vld [vmem:[%s4991_s30 + $0x54] sm:$0xf] }
  0xe3   : > { %v869_v44 = vpop.permute.xlu0 %868  ;;  %v3301_v6 = vpop.permute.xlu1 %3300  ;;  %v2825_v7 = vrot.slane %v2824_v13, 4  ;;  %v2637_v14 = vrot.slane %v2635_v3, 5  ;;  %v2842_v17 = vshrl.u32 %v4349_v63, 16  ;;  %v2845_v31 = vshll.u32 %v4349_v63, 16  ;;  %4681 = vmatprep.mubr.msk.bf16.mxu1 %vm3383_vm15, %v3355_v27  ;;  %v4411_v43 = vld [vmem:[%s4991_s30 + $0xac] sm:$0xf] }
  0xe4   : > { %915 = vst.msk [vmem:[#allocation2 + $0x10] sm:$0xff] %vm912_vm7, %v869_v44  ;;  %v2641_v15 = vrot.slane %v2639_v4, 4  ;;  %v2835_v23 = vrot.slane %v2834_v8, 4  ;;  %v2632_v24 = vor.u32 %v2631_v9, %v2628_v2  ;;  %v2647_v25 = vrot.slane %v2645_v10, 5  ;;  %v3347_v22 = vld [vmem:[#allocation2] sm:$0xff] }
  0xe5   : > { %3340 = vst.msk [vmem:[#allocation2 + $0x48] sm:$0xff] %vm3330_vm14, %v3301_v6  ;;  %v2830_v19 = vsel %vm5043_vm5, %v2825_v7, %v2829_v46  ;;  %4665 = vmatprep.mubr.msk.bf16.mxu0 %vm3383_vm15, %v3347_v22  ;;  %v2844_v30 = vrot.slane %v2842_v17, 4  ;;  %v2851_v32 = vshll.u32 %v4350_v12, 16  ;;  %v2855_v35 = vshrl.u32 %v4350_v12, 16  ;;  %v4386_v61 = vld [vmem:[%s4991_s30 + $0x48] sm:$0xe] }
  0xe6   : > { %2440 = vrot.lane.b32.xlu1 %v4794_v59, %s4906_s9  ;;  %2245 = vrot.lane.b32.xlu0 %v4251_v20, %s4905_s8  ;;  %v2642_v29 = vor.u32 %v2641_v15, %v2637_v14  ;;  %v2840_v34 = vsel %vm5043_vm5, %v2835_v23, %v2839_v1  ;;  %v2633_v62 = vrot.slane %v2632_v24, 4  ;;  %v2861_v36 = vshll.u32 %v4351_v16, 16  ;;  %v4804_v51 = vld [vmem:[%s6244_s1 + $0x10] ss:$0 sps:$4 sm:$0x33]  }
  0xe7   : > { %v3285_v26 = vpop.permute.xlu0 %3284  ;;  %v4370_v39 = vcombine.low %v2830_v19, %v2840_v34  ;;  %v2847_v41 = vrot.slane %v2845_v31, 5  ;;  %v2853_v42 = vrot.slane %v2851_v32, 5  ;;  %v2857_v48 = vrot.slane %v2855_v35, 4  ;;  %v4412_v20 = vld [vmem:[%s4991_s30 + $0xb0] sm:$0x1]  ;;  %4703 = vmatprep.subr.msk.bf16.mxu0 %vm3432_vm0, %v4804_v51  ;;  %4704 = vmatprep.subr.msk.bf16.mxu1 %vm3432_vm0, %v4804_v51 }
  0xe8   : > { %3332 = vst.msk [vmem:[#allocation2 + $0x8] sm:$0xff] %vm3330_vm14, %v3285_v26  ;;  %v2643_v40 = vrot.slane %v2642_v29, 4  ;;  %v2638_v47 = vsel %vm5043_vm5, %v2633_v62, %v2637_v14  ;;  %v2863_v49 = vrot.slane %v2861_v36, 5  ;;  %v2650_v50 = vshrl.u32 %v4325_v33, 16  ;;  %v4387_v4 = vld [vmem:[%s4991_s30 + $0x4c] sm:$0xf] }
  0xe9   : > { %v2848_v21 = vor.u32 %v2847_v41, %v2844_v30  ;;  %v2653_v37 = vshll.u32 %v4325_v33, 16  ;;  %v2659_v54 = vshll.u32 %v4326_v38, 16  ;;  %v2858_v57 = vor.u32 %v2857_v48, %v2853_v42  ;;  %v4388_v10 = vld [vmem:[%s4991_s30 + $0x50] sm:$0x1]  ;;  %v424_v19 = vld [vmem:[%s4991_s30 + $0xac] sm:$0xf] }
  0xea   : > { %2442 = vrot.lane.b32.xlu1 %v4796_v18, %s4906_s9  ;;  %2424 = vrot.lane.b32.xlu0 %v4795_v28, %s4906_s9  ;;  %v2648_v53 = vsel %vm5043_vm5, %v2643_v40, %v2647_v25  ;;  %v2652_v46 = vrot.slane %v2650_v50, 4  ;;  %v2663_v56 = vshrl.u32 %v4326_v38, 16  ;;  %v2669_v60 = vshll.u32 %v4327_v45, 16  ;;  %v423_v18 = vld [vmem:[%s4991_s30 + $0xa8] sm:$0xf] }
  0xeb   : > { %v4362_v11 = vcombine.low %v2638_v47, %v2648_v53  ;;  %v2849_v59 = vrot.slane %v2848_v21, 4  ;;  %v2655_v44 = vrot.slane %v2653_v37, 5  ;;  %v2661_v13 = vrot.slane %v2659_v54, 5  ;;  %v425_v33 = vld [vmem:[%s4991_s30 + $0xb0] sm:$0x1]  ;;  %v4817_v53 = vld [vmem:[%s4991_s30 + $0xa8] sm:$0xff]  }
  0xec   : > { %v2859_v63 = vrot.slane %v2858_v57, 4  ;;  %v2665_v1 = vrot.slane %v2663_v56, 4  ;;  %v4434_v3 = vrot.slane %v4410_v55, 9  ;;  %v2671_v8 = vrot.slane %v2669_v60, 5  ;;  %v3356_v27 = vld [vmem:[#allocation2 + $0x48] sm:$0xff]  ;;  %v4818_v56 = vld [vmem:[%s4991_s30 + $0x48] sm:$0xff]  }
  0xed   : > { %v887_v58 = vpop.permute.xlu1 %886  ;;  %v2854_v6 = vsel %vm5043_vm5, %v2849_v59, %v2853_v42  ;;  %v2656_v7 = vor.u32 %v2655_v44, %v2652_v46  ;;  %v3434_v9 = vsel %vm3432_vm0, %v4804_v51, 0  ;;  %v3208_v15 = vrot.slane %v4411_v43, 5  ;;  %v399_v34 = vld [vmem:[%s4991_s30 + $0x48] sm:$0xf]  ;;  %v400_v62 = vld [vmem:[%s4991_s30 + $0x4c] sm:$0xf] }
  0xee   : > { %924 = vst.msk [vmem:[#allocation2 + $0x58] sm:$0xff] %vm912_vm7, %v887_v58  ;;  %2985 = vrot.lane.b32.xlu1 %v4370_v39, %s4907_s10  ;;  %v871_v2 = vpop.permute.xlu0 %870  ;;  %2426 = vrot.lane.b32.xlu0 %v4797_v52, %s4906_s9  ;;  %v2864_v12 = vsel %vm5043_vm5, %v2859_v63, %v2863_v49  ;;  %v2666_v14 = vor.u32 %v2665_v1, %v2661_v13  ;;  %v3211_v16 = vrot.slane %v4412_v20, 5  ;;  %v4426_v25 = vrot.slane %v4386_v61, 9  ;;  %v401_v40 = vld [vmem:[%s4991_s30 + $0x50] sm:$0x1] }
  0xef   : > { %916 = vst.msk [vmem:[#allocation2 + $0x18] sm:$0xff] %vm912_vm7, %v871_v2  ;;  %4664 = vmatpush3.bf16.msra.mxu0 %v3434_v9  ;;  %v4371_v23 = vcombine.low %v2854_v6, %v2864_v12  ;;  %v2657_v24 = vrot.slane %v2656_v7, 4  ;;  %4702 = vmatpush3.bf16.msra.mxu1 %v3434_v9  ;;  %v3152_v26 = vrot.slane %v4387_v4, 5  ;;  %v3348_v22 = vld [vmem:[#allocation2 + $0x8] sm:$0xff]  ;;  %v3209_v29 = vsel %vm4993_vm2, %v4434_v3, %v3208_v15  ;;  %v4413_v57 = vld [vmem:[%s4991_s30 + $0xb4] sm:$0xe] }
  0xf0   : > { %v2667_v28 = vrot.slane %v2666_v14, 4  ;;  %v3210_v30 = vrot.slane %v3208_v15, 4  ;;  %v3155_v31 = vrot.slane %v4388_v10, 5  ;;  %v769_v39 = vshrl.u32 %v423_v18, 16  ;;  %v4414_v46 = vld [vmem:[%s4991_s30 + $0xb8] sm:$0xf] }
  0xf1   : > { %v1209_v17 = vpop.permute.xlu1 %1208  ;;  %v2662_v35 = vsel %vm5043_vm5, %v2657_v24, %v2661_v13  ;;  %v3153_v36 = vsel %vm4993_vm2, %v4426_v25, %v3152_v26  ;;  %v3154_v38 = vrot.slane %v3152_v26, 4  ;;  %v772_v45 = vshll.u32 %v423_v18, 16  ;;  %v4415_v44 = vld [vmem:[%s4991_s30 + $0xbc] sm:$0x1]  ;;  %379 = vst.msk [vmem:[#allocation2 + $0x70] sm:$0xff] %vm364_vm6, %v4817_v53  ;;  %371 = vst.msk [vmem:[#allocation2 + $0x30] sm:$0xff] %vm364_vm6, %v4818_v56 }
  0xf2   : > { %1247 = vst.msk [vmem:[#allocation2 + $0x50] sm:$0xff] %vm1236_vm8, %v1209_v17  ;;  %v1193_v32 = vpop.permute.xlu0 %1192  ;;  %2969 = vrot.lane.b32.xlu0 %v4362_v11, %s4907_s10  ;;  %2987 = vrot.lane.b32.xlu1 %v4371_v23, %s4907_s10  ;;  %v2672_v41 = vsel %vm5043_vm5, %v2667_v28, %v2671_v8  ;;  %v3212_v42 = vsel %vm4993_vm2, %v3210_v30, %v3211_v16  ;;  %v778_v47 = vshll.u32 %v424_v19, 16  ;;  %v771_v52 = vrot.slane %v769_v39, 4  ;;  %v4389_v1 = vld [vmem:[%s4991_s30 + $0x54] sm:$0xe] }
  0xf3   : > { %1239 = vst.msk [vmem:[#allocation2 + $0x10] sm:$0xff] %vm1236_vm8, %v1193_v32  ;;  %4666 = vmatmul.mubr.msk.bf16.vlgmr.msra.gmra.mrb[0].mxu0 %vm3383_vm15, %v3348_v22  ;;  %4682 = vmatmul.mubr.msk.bf16.vlgmr.msra.gmra.mrb[0].mxu1 %vm3383_vm15, %v3356_v27  ;;  %v4363_v49 = vcombine.low %v2662_v35, %v2672_v41  ;;  %v4450_v50 = vcombine.low %v3209_v29, %v3212_v42  ;;  %v774_v37 = vrot.slane %v772_v45, 5  ;;  %v782_v55 = vshrl.u32 %v424_v19, 16  ;;  %v4390_v8 = vld [vmem:[%s4991_s30 + $0x58] sm:$0xf] }
  0xf4   : > { %v3156_v51 = vsel %vm4993_vm2, %v3154_v38, %v3155_v31  ;;  %v780_v54 = vrot.slane %v778_v47, 5  ;;  %v788_v58 = vshll.u32 %v425_v33, 16  ;;  %v577_v43 = vshrl.u32 %v399_v34, 16  ;;  %v4391_v15 = vld [vmem:[%s4991_s30 + $0x5c] sm:$0x1]  ;;  %v4819_v39 = vld [vmem:[%s4991_s30 + $0xb4] sm:$0xff]  }
  0xf5   : > { %v1211_v48 = vpop.permute.xlu1 %1210  ;;  %v4442_v21 = vcombine.low %v3153_v36, %v3156_v51  ;;  %v580_v20 = vshll.u32 %v399_v34, 16  ;;  %v586_v59 = vshll.u32 %v400_v62, 16  ;;  %v775_v13 = vor.u32 %v774_v37, %v771_v52  ;;  %v426_v24 = vld [vmem:[%s4991_s30 + $0xb4] sm:$0xf]  ;;  %v427_v35 = vld [vmem:[%s4991_s30 + $0xb8] sm:$0xf] }
  0xf6   : > { %1248 = vst.msk [vmem:[#allocation2 + $0x58] sm:$0xff] %vm1236_vm8, %v1211_v48  ;;  %v1195_v11 = vpop.permute.xlu0 %1194  ;;  %2971 = vrot.lane.b32.xlu0 %v4363_v49, %s4907_s10  ;;  %3306 = vrot.lane.b32.xlu1 %v4450_v50, %s4908_s11  ;;  %v784_v60 = vrot.slane %v782_v55, 4  ;;  %v590_v61 = vshrl.u32 %v400_v62, 16  ;;  %v596_v63 = vshll.u32 %v401_v40, 16  ;;  %v790_v3 = vrot.slane %v788_v58, 5 }
  0xf7   : > { %1240 = vst.msk [vmem:[#allocation2 + $0x18] sm:$0xff] %vm1236_vm8, %v1195_v11  ;;  %v579_v4 = vrot.slane %v577_v43, 4  ;;  %v582_v6 = vrot.slane %v580_v20, 5  ;;  %v588_v7 = vrot.slane %v586_v59, 5  ;;  %v776_v9 = vrot.slane %v775_v13, 4 }
  0xf8   : > { %v785_v10 = vor.u32 %v784_v60, %v780_v54  ;;  %v592_v12 = vrot.slane %v590_v61, 4  ;;  %v598_v14 = vrot.slane %v596_v63, 5  ;;  %v4435_v18 = vrot.slane %v4413_v57, 9  ;;  %v428_v47 = vld [vmem:[%s4991_s30 + $0xbc] sm:$0x1]  ;;  %380 = vst.msk [vmem:[#allocation2 + $0x78] sm:$0xff] %vm364_vm6, %v4819_v39 }
  0xf9   : > { %v1390_v2 = vpop.permute.xlu1 %1389  ;;  %v583_v17 = vor.u32 %v582_v6, %v579_v4  ;;  %v3215_v19 = vrot.slane %v4414_v46, 5  ;;  %v3218_v23 = vrot.slane %v4415_v44, 5  ;;  %v781_v25 = vsel %vm5043_vm5, %v776_v9, %v780_v54  ;;  %v402_v48 = vld [vmem:[%s4991_s30 + $0x54] sm:$0xf]  ;;  %v403_v53 = vld [vmem:[%s4991_s30 + $0x58] sm:$0xf] }
  0xfa   : > { %1428 = vst.msk [vmem:[#allocation2 + $0x50] sm:$0xff] %vm1417_vm9, %v1390_v2  ;;  %v1374_v16 = vpop.permute.xlu0 %1373  ;;  %3290 = vrot.lane.b32.xlu0 %v4442_v21, %s4908_s11  ;;  %v786_v26 = vrot.slane %v785_v10, 4  ;;  %v593_v22 = vor.u32 %v592_v12, %v588_v7  ;;  %v4427_v27 = vrot.slane %v4389_v1, 9  ;;  %v3159_v32 = vrot.slane %v4390_v8, 5  ;;  %v404_v57 = vld [vmem:[%s4991_s30 + $0x5c] sm:$0x1] }
  0xfb   : > { %1420 = vst.msk [vmem:[#allocation2 + $0x10] sm:$0xff] %vm1417_vm9, %v1374_v16  ;;  %v584_v29 = vrot.slane %v583_v17, 4  ;;  %v3216_v30 = vsel %vm4993_vm2, %v4435_v18, %v3215_v19  ;;  %v3217_v31 = vrot.slane %v3215_v19, 4  ;;  %v3162_v62 = vrot.slane %v4391_v15, 5  ;;  %v4820_v46 = vld [vmem:[%s4991_s30 + $0x54] sm:$0xff]  }
  0xfc   : > { %v791_v33 = vsel %vm5043_vm5, %v786_v26, %v790_v3  ;;  %v594_v34 = vrot.slane %v593_v22, 4  ;;  %v793_v36 = vshrl.u32 %v426_v24, 16  ;;  %v3160_v45 = vsel %vm4993_vm2, %v4427_v27, %v3159_v32  ;;  %v971_v59 = vld [vmem:[%s4991_s30 + $0xa8] sm:$0xe]  ;;  %v972_v1 = vld [vmem:[%s4991_s30 + $0xac] sm:$0xf] }
  0xfd   : > { %v1392_v28 = vpop.permute.xlu1 %1391  ;;  %v4036_v40 = vcombine.low %v781_v25, %v791_v33  ;;  %v589_v41 = vsel %vm5043_vm5, %v584_v29, %v588_v7  ;;  %v3219_v42 = vsel %vm4993_vm2, %v3217_v31, %v3218_v23  ;;  %v3161_v51 = vrot.slane %v3159_v32, 4  ;;  %372 = vst.msk [vmem:[#allocation2 + $0x38] sm:$0xff] %vm364_vm6, %v4820_v46  ;;  %v973_v7 = vld [vmem:[%s4991_s30 + $0xb0] sm:$0x1]  ;;  %v947_v15 = vld [vmem:[%s4991_s30 + $0x48] sm:$0xe] }
  0xfe   : > { %1429 = vst.msk [vmem:[#allocation2 + $0x58] sm:$0xff] %vm1417_vm9, %v1392_v28  ;;  %v1376_v38 = vpop.permute.xlu0 %1375  ;;  %v599_v49 = vsel %vm5043_vm5, %v594_v34, %v598_v14  ;;  %v4451_v50 = vcombine.low %v3216_v30, %v3219_v42  ;;  %v795_v52 = vrot.slane %v793_v36, 4  ;;  %v796_v54 = vshll.u32 %v426_v24, 16  ;;  %v948_v16 = vld [vmem:[%s4991_s30 + $0x4c] sm:$0xf] }
  0xff   : > { %1421 = vst.msk [vmem:[#allocation2 + $0x18] sm:$0xff] %vm1417_vm9, %v1376_v38  ;;  %892 = vrot.lane.b32.xlu1 %v4036_v40, %s4903_s6  ;;  %v4028_v37 = vcombine.low %v589_v41, %v599_v49  ;;  %v802_v55 = vshll.u32 %v427_v35, 16  ;;  %v806_v11 = vshrl.u32 %v427_v35, 16  ;;  %v3163_v56 = vsel %vm4993_vm2, %v3161_v51, %v3162_v62  ;;  %v949_v24 = vld [vmem:[%s4991_s30 + $0x50] sm:$0x1] }
 0x100   : > { %v812_v58 = vshll.u32 %v428_v47, 16  ;;  %v601_v43 = vshrl.u32 %v402_v48, 16  ;;  %v604_v20 = vshll.u32 %v402_v48, 16  ;;  %v4443_v13 = vcombine.low %v3160_v45, %v3163_v56  ;;  %v974_v25 = vld [vmem:[%s4991_s30 + $0xb4] sm:$0xe] }
 0x101   : > { %v1935_v21 = vpop.permute.xlu1 %1934  ;;  %876 = vrot.lane.b32.xlu0 %v4028_v37, %s4903_s6  ;;  %v798_v60 = vrot.slane %v796_v54, 5  ;;  %v804_v61 = vrot.slane %v802_v55, 5  ;;  %v808_v63 = vrot.slane %v806_v11, 4  ;;  %v610_v6 = vshll.u32 %v403_v53, 16  ;;  %v975_v29 = vld [vmem:[%s4991_s30 + $0xb8] sm:$0xf] }
 0x102   : > { %1973 = vst.msk [vmem:[#allocation2 + $0x50] sm:$0xff] %vm1962_vm10, %v1935_v21  ;;  %v1919_v44 = vpop.permute.xlu0 %1918  ;;  %v814_v2 = vrot.slane %v812_v58, 5  ;;  %v603_v3 = vrot.slane %v601_v43, 4  ;;  %v606_v4 = vrot.slane %v604_v20, 5  ;;  %v614_v12 = vshrl.u32 %v403_v53, 16 }
 0x103   : > { %1965 = vst.msk [vmem:[#allocation2 + $0x10] sm:$0xff] %vm1962_vm10, %v1919_v44  ;;  %3308 = vrot.lane.b32.xlu1 %v4451_v50, %s4908_s11  ;;  %v799_v9 = vor.u32 %v798_v60, %v795_v52  ;;  %v809_v10 = vor.u32 %v808_v63, %v804_v61  ;;  %v620_v14 = vshll.u32 %v404_v57, 16  ;;  %v612_v18 = vrot.slane %v610_v6, 5  ;;  %v976_v30 = vld [vmem:[%s4991_s30 + $0xbc] sm:$0x1] }
 0x104   : > { %v607_v17 = vor.u32 %v606_v4, %v603_v3  ;;  %v4052_v19 = vrot.slane %v971_v59, 9  ;;  %v1128_v23 = vrot.slane %v972_v1, 5  ;;  %v616_v27 = vrot.slane %v614_v12, 4  ;;  %v950_v62 = vld [vmem:[%s4991_s30 + $0x54] sm:$0xe] }
 0x105   : > { %v1937_v8 = vpop.permute.xlu1 %1936  ;;  %3292 = vrot.lane.b32.xlu0 %v4443_v13, %s4908_s11  ;;  %v800_v26 = vrot.slane %v799_v9, 4  ;;  %v810_v22 = vrot.slane %v809_v10, 4  ;;  %v622_v28 = vrot.slane %v620_v14, 5  ;;  %v1131_v34 = vrot.slane %v973_v7, 5  ;;  %v951_v35 = vld [vmem:[%s4991_s30 + $0x58] sm:$0xf] }
 0x106   : > { %1974 = vst.msk [vmem:[#allocation2 + $0x58] sm:$0xff] %vm1962_vm10, %v1937_v8  ;;  %v608_v31 = vrot.slane %v607_v17, 4  ;;  %v1129_v32 = vsel %vm4993_vm2, %v4052_v19, %v1128_v23  ;;  %v1130_v33 = vrot.slane %v1128_v23, 4  ;;  %v617_v41 = vor.u32 %v616_v27, %v612_v18  ;;  %v952_v45 = vld [vmem:[%s4991_s30 + $0x5c] sm:$0x1] }
 0x107   : > { %v805_v39 = vsel %vm5043_vm5, %v800_v26, %v804_v61  ;;  %v815_v40 = vsel %vm5043_vm5, %v810_v22, %v814_v2  ;;  %v4044_v42 = vrot.slane %v947_v15, 9  ;;  %v1072_v50 = vrot.slane %v948_v16, 5  ;;  %v4160_v51 = vld [vmem:[%s4991_s30 + $0xb4] sm:$0xf]  ;;  %v4161_v54 = vld [vmem:[%s4991_s30 + $0xb8] sm:$0xf] }
 0x108   : > { %v1921_v36 = vpop.permute.xlu0 %1920  ;;  %v4037_v47 = vcombine.low %v805_v39, %v815_v40  ;;  %v613_v48 = vsel %vm5043_vm5, %v608_v31, %v612_v18  ;;  %v1132_v49 = vsel %vm4993_vm2, %v1130_v33, %v1131_v34  ;;  %v618_v52 = vrot.slane %v617_v41, 4  ;;  %v4162_v43 = vld [vmem:[%s4991_s30 + $0xbc] sm:$0x1]  ;;  %v4136_v2 = vld [vmem:[%s4991_s30 + $0x54] sm:$0xf] }
 0x109   : > { %v2256_v38 = vpop.permute.xlu1 %2255  ;;  %1966 = vst.msk [vmem:[#allocation2 + $0x18] sm:$0xff] %vm1962_vm10, %v1921_v36  ;;  %v4068_v53 = vcombine.low %v1129_v32, %v1132_v49  ;;  %v1075_v21 = vrot.slane %v949_v24, 5  ;;  %v4053_v37 = vrot.slane %v974_v25, 9  ;;  %v1073_v55 = vsel %vm4993_vm2, %v4044_v42, %v1072_v50  ;;  %v4137_v3 = vld [vmem:[%s4991_s30 + $0x58] sm:$0xf] }
 0x10a   : > { %2294 = vst.msk [vmem:[#allocation2 + $0x50] sm:$0xff] %vm2283_vm11, %v2256_v38  ;;  %894 = vrot.lane.b32.xlu1 %v4037_v47, %s4903_s6  ;;  %v1074_v11 = vrot.slane %v1072_v50, 4  ;;  %v1135_v57 = vrot.slane %v975_v29, 5  ;;  %v1138_v46 = vrot.slane %v976_v30, 5  ;;  %v623_v20 = vsel %vm5043_vm5, %v618_v52, %v622_v28  ;;  %v4138_v24 = vld [vmem:[%s4991_s30 + $0x5c] sm:$0x1] }
 0x10b   : > { %v4045_v59 = vrot.slane %v950_v62, 9  ;;  %v1079_v44 = vrot.slane %v951_v35, 5  ;;  %v1082_v13 = vrot.slane %v952_v45, 5  ;;  %v4029_v60 = vcombine.low %v613_v48, %v623_v20  ;;  %v4163_v28 = vld [vmem:[%s4991_s30 + $0xc0] sm:$0xf]  ;;  %v4805_v33 = vld [vmem:[%s4991_s30 + $0xb4] sm:$0xff]  }
 0x10c   : > { %v2240_v56 = vpop.permute.xlu0 %2239  ;;  %v1076_v61 = vsel %vm4993_vm2, %v1074_v11, %v1075_v21  ;;  %v1136_v63 = vsel %vm4993_vm2, %v4053_v37, %v1135_v57  ;;  %v1137_v1 = vrot.slane %v1135_v57, 4  ;;  %v1819_v8 = vshrl.u32 %v4160_v51, 16  ;;  %v4164_v39 = vld [vmem:[%s4991_s30 + $0xc4] sm:$0xf]  ;;  %v4165_v52 = vld [vmem:[%s4991_s30 + $0xc8] sm:$0x1] }
 0x10d   : > { %v2258_v58 = vpop.permute.xlu1 %2257  ;;  %2286 = vst.msk [vmem:[#allocation2 + $0x10] sm:$0xff] %vm2283_vm11, %v2240_v56  ;;  %v4060_v4 = vcombine.low %v1073_v55, %v1076_v61  ;;  %v1080_v6 = vsel %vm4993_vm2, %v4045_v59, %v1079_v44  ;;  %v1081_v7 = vrot.slane %v1079_v44, 4  ;;  %878 = vrot.lane.b32.xlu0 %v4029_v60, %s4903_s6  ;;  %v1822_v12 = vshll.u32 %v4160_v51, 16  ;;  %v4139_v11 = vld [vmem:[%s4991_s30 + $0x60] sm:$0xf] }
 0x10e   : > { %2295 = vst.msk [vmem:[#allocation2 + $0x58] sm:$0xff] %vm2283_vm11, %v2258_v58  ;;  %1216 = vrot.lane.b32.xlu1 %v4068_v53, %s4902_s5  ;;  %v1139_v9 = vsel %vm4993_vm2, %v1137_v1, %v1138_v46  ;;  %v1828_v14 = vshll.u32 %v4161_v54, 16  ;;  %v1832_v15 = vshrl.u32 %v4161_v54, 16  ;;  %v1821_v19 = vrot.slane %v1819_v8, 4  ;;  %v4806_v53 = vld [vmem:[%s4991_s30 + $0x54] sm:$0xff]   ;;  %v4807_v57 = vld [vmem:[%s4991_s30 + $0xc0] sm:$0xff]  }
 0x10f   : > { %v4069_v17 = vcombine.low %v1136_v63, %v1139_v9  ;;  %v1083_v18 = vsel %vm4993_vm2, %v1081_v7, %v1082_v13  ;;  %v1838_v23 = vshll.u32 %v4162_v43, 16  ;;  %v1824_v26 = vrot.slane %v1822_v12, 5  ;;  %v4140_v20 = vld [vmem:[%s4991_s30 + $0x64] sm:$0xf]  ;;  %v4141_v1 = vld [vmem:[%s4991_s30 + $0x68] sm:$0x1] }
 0x110   : > { %v2242_v10 = vpop.permute.xlu0 %2241  ;;  %v4061_v25 = vcombine.low %v1080_v6, %v1083_v18  ;;  %v1830_v22 = vrot.slane %v1828_v14, 5  ;;  %v1834_v27 = vrot.slane %v1832_v15, 4  ;;  %v1627_v30 = vshrl.u32 %v4136_v2, 16  ;;  %v4225_v9 = vld [vmem:[%s4991_s30 + $0xb8] sm:$0xf] }
 0x111   : > { %v2437_v16 = vpop.permute.xlu1 %2436  ;;  %2287 = vst.msk [vmem:[#allocation2 + $0x18] sm:$0xff] %vm2283_vm11, %v2242_v10  ;;  %v1840_v29 = vrot.slane %v1838_v23, 5  ;;  %v1630_v31 = vshll.u32 %v4136_v2, 16  ;;  %v1636_v32 = vshll.u32 %v4137_v3, 16  ;;  %1200 = vrot.lane.b32.xlu0 %v4060_v4, %s4902_s5  ;;  %v1825_v34 = vor.u32 %v1824_v26, %v1821_v19  ;;  %v4224_v2 = vld [vmem:[%s4991_s30 + $0xb4] sm:$0xe] }
 0x112   : > { %2475 = vst.msk [vmem:[#allocation2 + $0x50] sm:$0xff] %vm2464_vm12, %v2437_v16  ;;  %1218 = vrot.lane.b32.xlu1 %v4069_v17, %s4902_s5  ;;  %v1835_v62 = vor.u32 %v1834_v27, %v1830_v22  ;;  %v1640_v35 = vshrl.u32 %v4137_v3, 16  ;;  %v1646_v36 = vshll.u32 %v4138_v24, 16  ;;  %v1629_v41 = vrot.slane %v1627_v30, 4  ;;  %v4808_v3 = vld [vmem:[%s4991_s30 + $0x60] sm:$0xff]  }
 0x113   : > { %v1632_v42 = vrot.slane %v1630_v31, 5  ;;  %v1638_v45 = vrot.slane %v1636_v32, 5  ;;  %v1843_v47 = vshrl.u32 %v4163_v28, 16  ;;  %v1826_v48 = vrot.slane %v1825_v34, 4  ;;  %v4226_v10 = vld [vmem:[%s4991_s30 + $0xbc] sm:$0x1] }
 0x114   : > { %v2421_v38 = vpop.permute.xlu0 %2420  ;;  %v1836_v49 = vrot.slane %v1835_v62, 4  ;;  %v1642_v50 = vrot.slane %v1640_v35, 4  ;;  %v1648_v51 = vrot.slane %v1646_v36, 5  ;;  %v1846_v54 = vshll.u32 %v4163_v28, 16  ;;  %v4200_v17 = vld [vmem:[%s4991_s30 + $0x54] sm:$0xe] }
 0x115   : > { %v2439_v40 = vpop.permute.xlu1 %2438  ;;  %2467 = vst.msk [vmem:[#allocation2 + $0x10] sm:$0xff] %vm2464_vm12, %v2421_v38  ;;  %v1633_v21 = vor.u32 %v1632_v42, %v1629_v41  ;;  %v1845_v37 = vrot.slane %v1843_v47, 4  ;;  %v1852_v55 = vshll.u32 %v4164_v39, 16  ;;  %1202 = vrot.lane.b32.xlu0 %v4061_v25, %s4902_s5  ;;  %v1831_v46 = vsel %vm5043_vm5, %v1826_v48, %v1830_v22  ;;  %v4201_v30 = vld [vmem:[%s4991_s30 + $0x58] sm:$0xf]  ;;  %s210_s5 = sand.u32 1, %s4883_s13  }
 0x116   : > { %2476 = vst.msk [vmem:[#allocation2 + $0x58] sm:$0xff] %vm2464_vm12, %v2439_v40  ;;  %1397 = vrot.lane.b32.xlu1 %v4805_v33, %s4901_s4  ;;  %v1841_v56 = vsel %vm5043_vm5, %v1836_v49, %v1840_v29  ;;  %v1643_v58 = vor.u32 %v1642_v50, %v1638_v45  ;;  %v1856_v43 = vshrl.u32 %v4164_v39, 16  ;;  %v1848_v61 = vrot.slane %v1846_v54, 5  ;;  %v4202_v62 = vld [vmem:[%s4991_s30 + $0x5c] sm:$0x1] }
 0x117   : > { %v4180_v13 = vcombine.low %v1831_v46, %v1841_v56  ;;  %v1634_v60 = vrot.slane %v1633_v21, 4  ;;  %v1854_v63 = vrot.slane %v1852_v55, 5  ;;  %v1862_v7 = vshll.u32 %v4165_v52, 16  ;;  %v4227_v40 = vld [vmem:[%s4991_s30 + $0xc0] sm:$0xe] }
 0x118   : > { %v2423_v59 = vpop.permute.xlu0 %2422  ;;  %v1644_v4 = vrot.slane %v1643_v58, 4  ;;  %v1858_v6 = vrot.slane %v1856_v43, 4  ;;  %v1651_v8 = vshrl.u32 %v4139_v11, 16  ;;  %v1849_v14 = vor.u32 %v1848_v61, %v1845_v37  ;;  %v4228_v41 = vld [vmem:[%s4991_s30 + $0xc4] sm:$0xf] }
 0x119   : > { %v2982_v44 = vpop.permute.xlu1 %2981  ;;  %2468 = vst.msk [vmem:[#allocation2 + $0x18] sm:$0xff] %vm2464_vm12, %v2423_v59  ;;  %v1639_v12 = vsel %vm5043_vm5, %v1634_v60, %v1638_v45  ;;  %v1654_v15 = vshll.u32 %v4139_v11, 16  ;;  %v1660_v16 = vshll.u32 %v4140_v20, 16  ;;  %1381 = vrot.lane.b32.xlu0 %v4806_v53, %s4901_s4  ;;  %v1864_v23 = vrot.slane %v1862_v7, 5  ;;  %v4229_v49 = vld [vmem:[%s4991_s30 + $0xc8] sm:$0x1] }
 0x11a   : > { %3020 = vst.msk [vmem:[#allocation2 + $0x50] sm:$0xff] %vm3009_vm13, %v2982_v44  ;;  %1399 = vrot.lane.b32.xlu1 %v4807_v57, %s4901_s4  ;;  %v1649_v18 = vsel %vm5043_vm5, %v1644_v4, %v1648_v51  ;;  %v1859_v19 = vor.u32 %v1858_v6, %v1854_v63  ;;  %v1653_v24 = vrot.slane %v1651_v8, 4  ;;  %v1850_v27 = vrot.slane %v1849_v14, 4  ;;  %v4203_v54 = vld [vmem:[%s4991_s30 + $0x60] sm:$0xe] }
 0x11b   : > { %v4172_v22 = vcombine.low %v1639_v12, %v1649_v18  ;;  %v1656_v28 = vrot.slane %v1654_v15, 5  ;;  %v5882_v29 = vrot.slane %v1660_v16, 5  ;;  %v1664_v32 = vshrl.u32 %v4140_v20, 16  ;;  %v4204_v56 = vld [vmem:[%s4991_s30 + $0x64] sm:$0xf] }
 0x11c   : > { %v2966_v25 = vpop.permute.xlu0 %2965  ;;  %v1860_v31 = vrot.slane %v1859_v19, 4  ;;  %v1670_v33 = vshll.u32 %v4141_v1, 16  ;;  %v4244_v34 = vrot.slane %v4224_v2, 9  ;;  %v1855_v35 = vsel %vm5043_vm5, %v1850_v27, %v1854_v63  ;;  %v4205_v44 = vld [vmem:[%s4991_s30 + $0x68] sm:$0x1] }
 0x11d   : > { %v2984_v26 = vpop.permute.xlu1 %2983  ;;  %3012 = vst.msk [vmem:[#allocation2 + $0x10] sm:$0xff] %vm3009_vm13, %v2966_v25  ;;  %v1657_v36 = vor.u32 %v1656_v28, %v1653_v24  ;;  %v2175_v38 = vrot.slane %v4225_v9, 5  ;;  %v2178_v39 = vrot.slane %v4226_v10, 5  ;;  %1383 = vrot.lane.b32.xlu0 %v4808_v3, %s4901_s4  ;;  %v1666_v45 = vrot.slane %v1664_v32, 4  ;;  %v4353_v3 = vld [vmem:[%s4991_s30 + $0xc4] sm:$0xf] }
 0x11e   : > { %3021 = vst.msk [vmem:[#allocation2 + $0x58] sm:$0xff] %vm3009_vm13, %v2984_v26  ;;  %1942 = vrot.lane.b32.xlu1 %v4180_v13, %s4904_s7  ;;  %v1865_v42 = vsel %vm5043_vm5, %v1860_v31, %v1864_v23  ;;  %v1672_v47 = vrot.slane %v1670_v33, 5  ;;  %v4236_v48 = vrot.slane %v4200_v17, 9  ;;  %v2119_v11 = vrot.slane %v4201_v30, 5  ;;  %v4352_v13 = vld [vmem:[%s4991_s30 + $0xc0] sm:$0xf] }
 0x11f   : > { %v4181_v52 = vcombine.low %v1855_v35, %v1865_v42  ;;  %v1658_v53 = vrot.slane %v1657_v36, 4  ;;  %v2176_v21 = vsel %vm4993_vm2, %v4244_v34, %v2175_v38  ;;  %v2177_v37 = vrot.slane %v2175_v38, 4  ;;  %v4354_v4 = vld [vmem:[%s4991_s30 + $0xc8] sm:$0x1]  ;;  %v4328_v6 = vld [vmem:[%s4991_s30 + $0x60] sm:$0xf] }
 0x120   : > { %v2968_v50 = vpop.permute.xlu0 %2967  ;;  %v1667_v55 = vor.u32 %v1666_v45, %v5882_v29  ;;  %v2122_v57 = vrot.slane %v4202_v62, 5  ;;  %v4245_v46 = vrot.slane %v4227_v40, 9  ;;  %v2182_v20 = vrot.slane %v4228_v41, 5  ;;  %v4329_v12 = vld [vmem:[%s4991_s30 + $0x64] sm:$0xf] }
 0x121   : > { %v3303_v51 = vpop.permute.xlu1 %3302  ;;  %3013 = vst.msk [vmem:[#allocation2 + $0x18] sm:$0xff] %vm3009_vm13, %v2968_v50  ;;  %v1663_v58 = vsel %vm5043_vm5, %v1658_v53, %v5882_v29  ;;  %v2179_v43 = vsel %vm4993_vm2, %v2177_v37, %v2178_v39  ;;  %v2185_v59 = vrot.slane %v4229_v49, 5  ;;  %1926 = vrot.lane.b32.xlu0 %v4172_v22, %s4904_s7  ;;  %v2120_v63 = vsel %vm4993_vm2, %v4236_v48, %v2119_v11  ;;  %v4330_v29 = vld [vmem:[%s4991_s30 + $0x68] sm:$0x1]  ;;  %v4355_v40 = vld [vmem:[%s4991_s30 + $0xcc] sm:$0xf] }
 0x122   : > { %3341 = vst.msk [vmem:[#allocation2 + $0x50] sm:$0xff] %vm3330_vm14, %v3303_v51  ;;  %1944 = vrot.lane.b32.xlu1 %v4181_v52, %s4904_s7  ;;  %v1668_v60 = vrot.slane %v1667_v55, 4  ;;  %v4260_v61 = vcombine.low %v2176_v21, %v2179_v43  ;;  %v2121_v1 = vrot.slane %v2119_v11, 4  ;;  %v2183_v7 = vsel %vm4993_vm2, %v4245_v46, %v2182_v20  ;;  %v4356_v48 = vld [vmem:[%s4991_s30 + $0xd0] sm:$0xf]  ;;  %v4809_v49 = vld [vmem:[%s4991_s30 + $0xc0] sm:$0xff]  }
 0x123   : > { %v2184_v8 = vrot.slane %v2182_v20, 4  ;;  %v4237_v9 = vrot.slane %v4203_v54, 9  ;;  %v2126_v10 = vrot.slane %v4204_v56, 5  ;;  %v2129_v16 = vrot.slane %v4205_v44, 5  ;;  %v4357_v43 = vld [vmem:[%s4991_s30 + $0xd4] sm:$0x1] }
 0x124   : > { %v3287_v2 = vpop.permute.xlu0 %3286  ;;  %v1673_v14 = vsel %vm5043_vm5, %v1668_v60, %v1672_v47  ;;  %v2123_v15 = vsel %vm4993_vm2, %v2121_v1, %v2122_v57  ;;  %v2866_v17 = vshrl.u32 %v4352_v13, 16  ;;  %v2869_v28 = vshll.u32 %v4352_v13, 16  ;;  %v4811_v1 = vld [vmem:[%s4991_s30 + $0xcc] sm:$0xff]  }
 0x125   : > { %3333 = vst.msk [vmem:[#allocation2 + $0x10] sm:$0xff] %vm3330_vm14, %v3287_v2  ;;  %v4173_v18 = vcombine.low %v1663_v58, %v1673_v14  ;;  %v4252_v19 = vcombine.low %v2120_v63, %v2123_v15  ;;  %v2186_v23 = vsel %vm4993_vm2, %v2184_v8, %v2185_v59  ;;  %v2127_v24 = vsel %vm4993_vm2, %v4237_v9, %v2126_v10  ;;  %v4331_v63 = vld [vmem:[%s4991_s30 + $0x6c] sm:$0xf]  ;;  %v4332_v14 = vld [vmem:[%s4991_s30 + $0x70] sm:$0xf] }
 0x126   : > { %2263 = vrot.lane.b32.xlu1 %v4260_v61, %s4905_s8  ;;  %v4261_v25 = vcombine.low %v2183_v7, %v2186_v23  ;;  %v2128_v26 = vrot.slane %v2126_v10, 4  ;;  %v2868_v27 = vrot.slane %v2866_v17, 4  ;;  %v2875_v31 = vshll.u32 %v4353_v3, 16  ;;  %v4810_v7 = vld [vmem:[%s4991_s30 + $0x60] sm:$0xff]  }
 0x127   : > { %1928 = vrot.lane.b32.xlu0 %v4173_v18, %s4904_s7  ;;  %v2879_v32 = vshrl.u32 %v4353_v3, 16  ;;  %v2885_v33 = vshll.u32 %v4354_v4, 16  ;;  %v2674_v34 = vshrl.u32 %v4328_v6, 16  ;;  %v2871_v36 = vrot.slane %v2869_v28, 5  ;;  %v4333_v18 = vld [vmem:[%s4991_s30 + $0x74] sm:$0x1] }
 0x128   : > { %v889_v22 = vpop.permute.xlu1 %888  ;;  %v2130_v62 = vsel %vm4993_vm2, %v2128_v26, %v2129_v16  ;;  %v2677_v38 = vshll.u32 %v4328_v6, 16  ;;  %v2683_v39 = vshll.u32 %v4329_v12, 16  ;;  %v2877_v42 = vrot.slane %v2875_v31, 5  ;;  %v4416_v23 = vld [vmem:[%s4991_s30 + $0xc0] sm:$0xe]  ;;  %s4004_s7 = sshll.u32 %s210_s5, 7 }
 0x129   : > { %v3357_v30 = vld [vmem:[#allocation2 + $0x50] sm:$0xff]  ;;  %925 = vst.msk [vmem:[#allocation2 + $0x60] sm:$0xff] %vm912_vm7, %v889_v22  ;;  %v4253_v41 = vcombine.low %v2127_v24, %v2130_v62  ;;  %v2881_v45 = vrot.slane %v2879_v32, 4  ;;  %v2887_v47 = vrot.slane %v2885_v33, 5  ;;  %v2872_v50 = vor.u32 %v2871_v36, %v2868_v27  ;;  %v4418_v28 = vld [vmem:[%s4991_s30 + $0xc8] sm:$0x1] }
 0x12a   : > { %4685 = vmatprep.mubr.msk.bf16.mxu1 %vm3383_vm15, %v3357_v30  ;;  %v873_v35 = vpop.permute.xlu0 %872  ;;  %2265 = vrot.lane.b32.xlu1 %v4261_v25, %s4905_s8  ;;  %v2676_v51 = vrot.slane %v2674_v34, 4  ;;  %v2679_v52 = vrot.slane %v2677_v38, 5  ;;  %v5942_v53 = vrot.slane %v2683_v39, 5  ;;  %v2687_v55 = vshrl.u32 %v4329_v12, 16  ;;  %v4417_v27 = vld [vmem:[%s4991_s30 + $0xc4] sm:$0xf] }
 0x12b   : > { %917 = vst.msk [vmem:[#allocation2 + $0x20] sm:$0xff] %vm912_vm7, %v873_v35  ;;  %2247 = vrot.lane.b32.xlu0 %v4252_v19, %s4905_s8  ;;  %v2882_v54 = vor.u32 %v2881_v45, %v2877_v42  ;;  %v2693_v11 = vshll.u32 %v4330_v29, 16  ;;  %v2890_v57 = vshrl.u32 %v4355_v40, 16  ;;  %v2873_v46 = vrot.slane %v2872_v50, 4  ;;  %v4812_v29 = vld [vmem:[%s4991_s30 + $0x6c] sm:$0xff]  }
 0x12c   : > { %v3305_v21 = vpop.permute.xlu1 %3304  ;;  %v3349_v37 = vld [vmem:[#allocation2 + $0x10] sm:$0xff]  ;;  %v2680_v56 = vor.u32 %v2679_v52, %v2676_v51  ;;  %v2893_v20 = vshll.u32 %v4355_v40, 16  ;;  %v2899_v59 = vshll.u32 %v4356_v48, 16  ;;  %v2689_v13 = vrot.slane %v2687_v55, 4 }
 0x12d   : > { %3342 = vst.msk [vmem:[#allocation2 + $0x58] sm:$0xff] %vm3330_vm14, %v3305_v21  ;;  %4669 = vmatprep.mubr.msk.bf16.mxu0 %vm3383_vm15, %v3349_v37  ;;  %v2883_v44 = vrot.slane %v2882_v54, 4  ;;  %v2695_v60 = vrot.slane %v2693_v11, 5  ;;  %v2892_v61 = vrot.slane %v2890_v57, 4  ;;  %v2878_v2 = vsel %vm5043_vm5, %v2873_v46, %v2877_v42  ;;  %v4392_v40 = vld [vmem:[%s4991_s30 + $0x60] sm:$0xe] }
 0x12e   : > { %v3289_v58 = vpop.permute.xlu0 %3288  ;;  %2444 = vrot.lane.b32.xlu1 %v4809_v49, %s4906_s9  ;;  %v2681_v3 = vrot.slane %v2680_v56, 4  ;;  %v2895_v4 = vrot.slane %v2893_v20, 5  ;;  %v5954_v6 = vrot.slane %v2899_v59, 5  ;;  %v2690_v9 = vor.u32 %v2689_v13, %v5942_v53  ;;  %v4394_v49 = vld [vmem:[%s4991_s30 + $0x68] sm:$0x1] }
 0x12f   : > { %3334 = vst.msk [vmem:[#allocation2 + $0x18] sm:$0xff] %vm3330_vm14, %v3289_v58  ;;  %2249 = vrot.lane.b32.xlu0 %v4253_v41, %s4905_s8  ;;  %v2888_v8 = vsel %vm5043_vm5, %v2883_v44, %v2887_v47  ;;  %v2903_v10 = vshrl.u32 %v4356_v48, 16  ;;  %v2909_v12 = vshll.u32 %v4357_v43, 16  ;;  %v2698_v19 = vshrl.u32 %v4331_v63, 16  ;;  %v4393_v41 = vld [vmem:[%s4991_s30 + $0x64] sm:$0xf] }
 0x130   : > { %v4372_v15 = vcombine.low %v2878_v2, %v2888_v8  ;;  %v2686_v16 = vsel %vm5043_vm5, %v2681_v3, %v5942_v53  ;;  %v2896_v17 = vor.u32 %v2895_v4, %v2892_v61  ;;  %v2691_v24 = vrot.slane %v2690_v9, 4  ;;  %v4419_v54 = vld [vmem:[%s4991_s30 + $0xcc] sm:$0xe]  ;;  %v4420_v58 = vld [vmem:[%s4991_s30 + $0xd0] sm:$0xf]  ;;  %s6119_s8 = scalar_lea.vmem [#allocation3], %s4004_s7 }
 0x131   : > { %v2905_v25 = vrot.slane %v2903_v10, 4  ;;  %v2911_v26 = vrot.slane %v2909_v12, 5  ;;  %v2701_v22 = vshll.u32 %v4331_v63, 16  ;;  %v2700_v31 = vrot.slane %v2698_v19, 4  ;;  %v4421_v13 = vld [vmem:[%s4991_s30 + $0xd4] sm:$0x1] }
 0x132   : > { %2446 = vrot.lane.b32.xlu1 %v4811_v1, %s4906_s9  ;;  %v2897_v30 = vrot.slane %v2896_v17, 4  ;;  %v2707_v32 = vshll.u32 %v4332_v14, 16  ;;  %v2711_v33 = vshrl.u32 %v4332_v14, 16  ;;  %v2696_v35 = vsel %vm5043_vm5, %v2691_v24, %v2695_v60  ;;  %v4396_v8 = vld [vmem:[%s4991_s30 + $0x70] sm:$0xf] }
 0x133   : > { %2428 = vrot.lane.b32.xlu0 %v4810_v7, %s4906_s9  ;;  %v2906_v36 = vor.u32 %v2905_v25, %v5954_v6  ;;  %v2703_v38 = vrot.slane %v2701_v22, 5  ;;  %v2717_v39 = vshll.u32 %v4333_v18, 16  ;;  %v4364_v42 = vcombine.low %v2686_v16, %v2696_v35  ;;  %v4395_v7 = vld [vmem:[%s4991_s30 + $0x6c] sm:$0xe] }
 0x134   : > { %v891_v34 = vpop.permute.xlu1 %890  ;;  %v3358_v62 = vld [vmem:[#allocation2 + $0x58] sm:$0xff]  ;;  %v2902_v45 = vsel %vm5043_vm5, %v2897_v30, %v5954_v6  ;;  %v2709_v47 = vrot.slane %v2707_v32, 5  ;;  %v2713_v48 = vrot.slane %v2711_v33, 4  ;;  %v4436_v37 = vrot.slane %v4416_v23, 9 }
 0x135   : > { %926 = vst.msk [vmem:[#allocation2 + $0x68] sm:$0xff] %vm912_vm7, %v891_v34  ;;  %4686 = vmatmul.mubr.msk.bf16.gmra.mrb[4].mxu1 %vm3383_vm15, %v3358_v62  ;;  %v2907_v51 = vrot.slane %v2906_v36, 4  ;;  %v2704_v52 = vor.u32 %v2703_v38, %v2700_v31  ;;  %v2719_v53 = vrot.slane %v2717_v39, 5  ;;  %v3222_v11 = vrot.slane %v4417_v27, 5 }
 0x136   : > { %v3350_v50 = vld [vmem:[#allocation2 + $0x18] sm:$0xff]  ;;  %v875_v21 = vpop.permute.xlu0 %874  ;;  %2989 = vrot.lane.b32.xlu1 %v4372_v15, %s4907_s10  ;;  %v2714_v55 = vor.u32 %v2713_v48, %v2709_v47  ;;  %v3225_v57 = vrot.slane %v4418_v28, 5  ;;  %v4428_v46 = vrot.slane %v4392_v40, 9  ;;  %v3166_v59 = vrot.slane %v4393_v41, 5  ;;  %v4397_v15 = vld [vmem:[%s4991_s30 + $0x74] sm:$0x1] }
 0x137   : > { %4670 = vmatmul.mubr.msk.bf16.gmra.mrb[4].mxu0 %vm3383_vm15, %v3350_v50  ;;  %918 = vst.msk [vmem:[#allocation2 + $0x28] sm:$0xff] %vm912_vm7, %v875_v21  ;;  %2430 = vrot.lane.b32.xlu0 %v4812_v29, %s4906_s9  ;;  %v2912_v43 = vsel %vm5043_vm5, %v2907_v51, %v2911_v26  ;;  %v2705_v20 = vrot.slane %v2704_v52, 4  ;;  %v3169_v44 = vrot.slane %v4394_v49, 5  ;;  %v3223_v63 = vsel %vm4993_vm2, %v4436_v37, %v3222_v11  ;;  %s4544_s9 = sshll.u32 %s4891_s15, 11  ;;  %s6196_s15 = scalar_lea.sflag [#allocation4], %s210_s5 }
 0x138   : > { %v1213_v56 = vpop.permute.xlu1 %1212  ;;  %v4373_v60 = vcombine.low %v2902_v45, %v2912_v43  ;;  %v2715_v61 = vrot.slane %v2714_v55, 4  ;;  %v3224_v1 = vrot.slane %v3222_v11, 4  ;;  %v3168_v3 = vrot.slane %v3166_v59, 4  ;;  %s6188_s19 = scalar_lea.hbm %s6246_s3, %s4544_s9 }
 0x139   : > { %1249 = vst.msk [vmem:[#allocation2 + $0x60] sm:$0xff] %vm1236_vm8, %v1213_v56  ;;  %v2710_v2 = vsel %vm5043_vm5, %v2705_v20, %v2709_v47  ;;  %v4437_v6 = vrot.slane %v4419_v54, 9  ;;  %v3229_v12 = vrot.slane %v4420_v58, 5  ;;  %v3232_v14 = vrot.slane %v4421_v13, 5 }
 0x13a   : > { %v1197_v4 = vpop.permute.xlu0 %1196  ;;  %2991 = vrot.lane.b32.xlu1 %v4373_v60, %s4907_s10  ;;  %v2720_v9 = vsel %vm5043_vm5, %v2715_v61, %v2719_v53  ;;  %v3226_v10 = vsel %vm4993_vm2, %v3224_v1, %v3225_v57  ;;  %v3167_v19 = vsel %vm4993_vm2, %v4428_v46, %v3166_v59  ;;  %v3170_v5 = vsel %vm4993_vm2, %v3168_v3, %v3169_v44 }
 0x13b   : > { %1241 = vst.msk [vmem:[#allocation2 + $0x20] sm:$0xff] %vm1236_vm8, %v1197_v4  ;;  %2973 = vrot.lane.b32.xlu0 %v4364_v42, %s4907_s10  ;;  %v4365_v17 = vcombine.low %v2710_v2, %v2720_v9  ;;  %v4452_v18 = vcombine.low %v3223_v63, %v3226_v10  ;;  %v3230_v23 = vsel %vm4993_vm2, %v4437_v6, %v3229_v12  ;;  %v3231_v24 = vrot.slane %v3229_v12, 4 }
 0x13c   : > { %v1215_v16 = vpop.permute.xlu1 %1214  ;;  %v4429_v25 = vrot.slane %v4395_v7, 9  ;;  %v3173_v26 = vrot.slane %v4396_v8, 5  ;;  %v3176_v22 = vrot.slane %v4397_v15, 5  ;;  %v4444_v31 = vcombine.low %v3167_v19, %v3170_v5 }
 0x13d   : > { %1250 = vst.msk [vmem:[#allocation2 + $0x68] sm:$0xff] %vm1236_vm8, %v1215_v16  ;;  %v3233_v28 = vsel %vm4993_vm2, %v3231_v24, %v3232_v14 }
 0x13e   : > { %v1199_v27 = vpop.permute.xlu0 %1198  ;;  %3310 = vrot.lane.b32.xlu1 %v4452_v18, %s4908_s11  ;;  %v3175_v29 = vrot.slane %v3173_v26, 4  ;;  %v4453_v32 = vcombine.low %v3230_v23, %v3233_v28  ;;  %v3174_v33 = vsel %vm4993_vm2, %v4429_v25, %v3173_v26 }
 0x13f   : > { %1242 = vst.msk [vmem:[#allocation2 + $0x28] sm:$0xff] %vm1236_vm8, %v1199_v27  ;;  %2975 = vrot.lane.b32.xlu0 %v4365_v17, %s4907_s10  ;;  %s3880_s10 = sshll.u32 %s6119_s8, 4  ;;  %s6190_s10 = int_to_ptr.vmem [resolvable:$true] %s3880_s10 }
 0x140   : > { %v1394_v30 = vpop.permute.xlu1 %1393  ;;  %v3177_v34 = vsel %vm4993_vm2, %v3175_v29, %v3176_v22  ;;  %s4821_s21 = scalar_lea.vmem %s6190_s10, 2048  ;;  %p4828_p1 = scmp.lt.s32.totalorder %s6190_s10, %s4826_s26 }
 0x141   : > { %1430 = vst.msk [vmem:[#allocation2 + $0x60] sm:$0xff] %vm1417_vm9, %v1394_v30  ;;  %v4445_v36 = vcombine.low %v3174_v33, %v3177_v34  ;;  %p4822_p12 = scmp.ne.s32.totalorder %s6190_s10, %s4821_s21  ;;  %p4829_p2 = scmp.lt.s32.totalorder %s4827_s27, %s4821_s21 }
 0x142   : > { %v1378_v62 = vpop.permute.xlu0 %1377  ;;  %3312 = vrot.lane.b32.xlu1 %v4453_v32, %s4908_s11 }
 0x143   : > { %1422 = vst.msk [vmem:[#allocation2 + $0x20] sm:$0xff] %vm1417_vm9, %v1378_v62  ;;  %3294 = vrot.lane.b32.xlu0 %v4444_v31, %s4908_s11  ;;  %v6093_v62 = vld [vmem:[%s6245_s2] ss:$0 sm:$0xff]  ;;  %p4823_p13 = pnand %p4822_p12, %p4971_p4  ;;  %p4830_p3 = por %p4829_p2, %p4828_p1 }
 0x144   : > { %v1396_v35 = vpop.permute.xlu1 %1395 }
 0x145   : > { %1431 = vst.msk [vmem:[#allocation2 + $0x68] sm:$0xff] %vm1417_vm9, %v1396_v35  ;;  %p4824_p0 = pneg %p4823_p13 }
 0x146   : > { %v1380_v38 = vpop.permute.xlu0 %1379 }
 0x147   : > { %1423 = vst.msk [vmem:[#allocation2 + $0x28] sm:$0xff] %vm1417_vm9, %v1380_v38  ;;  %3296 = vrot.lane.b32.xlu0 %v4445_v36, %s4908_s11  ;;  %v6098_v36 = vld [vmem:[%s6245_s2 + $0x1] ss:$0 sm:$0xff]  ;;  %p4831_p5 = pnand %p4830_p3, %p4824_p0 }
 0x148   : > { %v1939_v39 = vpop.permute.xlu1 %1938 }
 0x149   : > { %1975 = vst.msk [vmem:[#allocation2 + $0x60] sm:$0xff] %vm1962_vm10, %v1939_v39 }
 0x14a   : > { %v1923_v0 = vpop.permute.xlu0 %1922 }
 0x14b   : > { %1967 = vst.msk [vmem:[#allocation2 + $0x20] sm:$0xff] %vm1962_vm10, %v1923_v0 }
 0x14c   : > { %v1941_v40 = vpop.permute.xlu1 %1940 }
 0x14d   : > { %1976 = vst.msk [vmem:[#allocation2 + $0x68] sm:$0xff] %vm1962_vm10, %v1941_v40 }
 0x150   : > { %v2260_v41 = vpop.permute.xlu1 %2259  ;;  %v1925_v42 = vpop.permute.xlu0 %1924 }
 0x151   : > { %2296 = vst.msk [vmem:[#allocation2 + $0x60] sm:$0xff] %vm2283_vm11, %v2260_v41 }
 0x152   : > { %1968 = vst.msk [vmem:[#allocation2 + $0x28] sm:$0xff] %vm1962_vm10, %v1925_v42 }
 0x154   : > { %v2262_v45 = vpop.permute.xlu1 %2261  ;;  %v2244_v47 = vpop.permute.xlu0 %2243 }
 0x155   : > { %2297 = vst.msk [vmem:[#allocation2 + $0x68] sm:$0xff] %vm2283_vm11, %v2262_v45  ;;  %2288 = vst.msk [vmem:[#allocation2 + $0x20] sm:$0xff] %vm2283_vm11, %v2244_v47 }
 0x158   : > { %v2441_v48 = vpop.permute.xlu1 %2440  ;;  %v2246_v49 = vpop.permute.xlu0 %2245 }
 0x159   : > { %2477 = vst.msk [vmem:[#allocation2 + $0x60] sm:$0xff] %vm2464_vm12, %v2441_v48 }
 0x15a   : > { %2289 = vst.msk [vmem:[#allocation2 + $0x28] sm:$0xff] %vm2283_vm11, %v2246_v49 }
 0x15c   : > { %v2443_v50 = vpop.permute.xlu1 %2442  ;;  %v2425_v51 = vpop.permute.xlu0 %2424 }
 0x15d   : > { %2478 = vst.msk [vmem:[#allocation2 + $0x68] sm:$0xff] %vm2464_vm12, %v2443_v50  ;;  %2469 = vst.msk [vmem:[#allocation2 + $0x20] sm:$0xff] %vm2464_vm12, %v2425_v51 }
 0x160   : > { %v2986_v52 = vpop.permute.xlu1 %2985  ;;  %v2427_v53 = vpop.permute.xlu0 %2426 }
 0x161   : > { %3022 = vst.msk [vmem:[#allocation2 + $0x60] sm:$0xff] %vm3009_vm13, %v2986_v52 }
 0x162   : > { %2470 = vst.msk [vmem:[#allocation2 + $0x28] sm:$0xff] %vm2464_vm12, %v2427_v53 }
 0x164   : > { %v2970_v21 = vpop.permute.xlu0 %2969  ;;  %v2988_v37 = vpop.permute.xlu1 %2987 }
 0x165   : > { %3014 = vst.msk [vmem:[#allocation2 + $0x20] sm:$0xff] %vm3009_vm13, %v2970_v21  ;;  %3023 = vst.msk [vmem:[#allocation2 + $0x68] sm:$0xff] %vm3009_vm13, %v2988_v37 }
 0x168   : > { %v2972_v54 = vpop.permute.xlu0 %2971  ;;  %v3307_v55 = vpop.permute.xlu1 %3306 }
 0x169   : > { %3015 = vst.msk [vmem:[#allocation2 + $0x28] sm:$0xff] %vm3009_vm13, %v2972_v54 }
 0x16a   : > { %3343 = vst.msk [vmem:[#allocation2 + $0x60] sm:$0xff] %vm3330_vm14, %v3307_v55 }
 0x16c   : > { %v3291_v11 = vpop.permute.xlu0 %3290 }
 0x16d   : > { %3335 = vst.msk [vmem:[#allocation2 + $0x20] sm:$0xff] %vm3330_vm14, %v3291_v11 }
 0x171   : > { %v3359_v57 = vld [vmem:[#allocation2 + $0x60] sm:$0xff]  ;;  %v893_v46 = vpop.permute.xlu1 %892 }
 0x172   : > { %4689 = vmatprep.mubr.msk.bf16.mxu1 %vm3383_vm15, %v3359_v57  ;;  %927 = vst.msk [vmem:[#allocation2 + $0x70] sm:$0xff] %vm912_vm7, %v893_v46 }
 0x173   : > { %v877_v56 = vpop.permute.xlu0 %876 }
 0x174   : > { %v3351_v58 = vld [vmem:[#allocation2 + $0x20] sm:$0xff]  ;;  %919 = vst.msk [vmem:[#allocation2 + $0x30] sm:$0xff] %vm912_vm7, %v877_v56 }
 0x175   : > { %4673 = vmatprep.mubr.msk.bf16.mxu0 %vm3383_vm15, %v3351_v58  ;;  %v3309_v43 = vpop.permute.xlu1 %3308 }
 0x176   : > { %3344 = vst.msk [vmem:[#allocation2 + $0x68] sm:$0xff] %vm3330_vm14, %v3309_v43 }
 0x177   : > { %v3293_v20 = vpop.permute.xlu0 %3292 }
 0x178   : > { %3336 = vst.msk [vmem:[#allocation2 + $0x28] sm:$0xff] %vm3330_vm14, %v3293_v20 }
 0x17c   : > { %v895_v59 = vpop.permute.xlu1 %894 }
 0x17d   : > { %928 = vst.msk [vmem:[#allocation2 + $0x78] sm:$0xff] %vm912_vm7, %v895_v59  ;;  %v3360_v44 = vld [vmem:[#allocation2 + $0x68] sm:$0xff] }
 0x17e   : > { %4690 = vmatmul.mubr.msk.bf16.gmra.mrb[8].mxu1 %vm3383_vm15, %v3360_v44 }
 0x17f   : > { %v3352_v13 = vld [vmem:[#allocation2 + $0x28] sm:$0xff]  ;;  %v879_v60 = vpop.permute.xlu0 %878 }
 0x180   : > { %v1217_v61 = vpop.permute.xlu1 %1216  ;;  %4674 = vmatmul.mubr.msk.bf16.gmra.mrb[8].mxu0 %vm3383_vm15, %v3352_v13  ;;  %920 = vst.msk [vmem:[#allocation2 + $0x38] sm:$0xff] %vm912_vm7, %v879_v60 }
 0x181   : > { %1251 = vst.msk [vmem:[#allocation2 + $0x70] sm:$0xff] %vm1236_vm8, %v1217_v61 }
 0x183   : > { %v1201_v63 = vpop.permute.xlu0 %1200 }
 0x184   : > { %v1219_v1 = vpop.permute.xlu1 %1218  ;;  %1243 = vst.msk [vmem:[#allocation2 + $0x30] sm:$0xff] %vm1236_vm8, %v1201_v63 }
 0x185   : > { %1252 = vst.msk [vmem:[#allocation2 + $0x78] sm:$0xff] %vm1236_vm8, %v1219_v1 }
 0x187   : > { %v1203_v2 = vpop.permute.xlu0 %1202 }
 0x188   : > { %v1398_v3 = vpop.permute.xlu1 %1397  ;;  %1244 = vst.msk [vmem:[#allocation2 + $0x38] sm:$0xff] %vm1236_vm8, %v1203_v2 }
 0x189   : > { %1432 = vst.msk [vmem:[#allocation2 + $0x70] sm:$0xff] %vm1417_vm9, %v1398_v3 }
 0x18b   : > { %v1382_v4 = vpop.permute.xlu0 %1381 }
 0x18c   : > { %v1400_v6 = vpop.permute.xlu1 %1399  ;;  %1424 = vst.msk [vmem:[#allocation2 + $0x30] sm:$0xff] %vm1417_vm9, %v1382_v4 }
 0x18d   : > { %1433 = vst.msk [vmem:[#allocation2 + $0x78] sm:$0xff] %vm1417_vm9, %v1400_v6 }
 0x18f   : > { %v1384_v7 = vpop.permute.xlu0 %1383 }
 0x190   : > { %v1943_v8 = vpop.permute.xlu1 %1942  ;;  %1425 = vst.msk [vmem:[#allocation2 + $0x38] sm:$0xff] %vm1417_vm9, %v1384_v7 }
 0x191   : > { %1977 = vst.msk [vmem:[#allocation2 + $0x70] sm:$0xff] %vm1962_vm10, %v1943_v8 }
 0x193   : > { %v1927_v9 = vpop.permute.xlu0 %1926 }
 0x194   : > { %v1945_v10 = vpop.permute.xlu1 %1944  ;;  %1969 = vst.msk [vmem:[#allocation2 + $0x30] sm:$0xff] %vm1962_vm10, %v1927_v9 }
 0x195   : > { %1978 = vst.msk [vmem:[#allocation2 + $0x78] sm:$0xff] %vm1962_vm10, %v1945_v10 }
 0x198   : > { %v2264_v12 = vpop.permute.xlu1 %2263 }
 0x199   : > { %v1929_v14 = vpop.permute.xlu0 %1928  ;;  %2298 = vst.msk [vmem:[#allocation2 + $0x70] sm:$0xff] %vm2283_vm11, %v2264_v12 }
 0x19a   : > { %1970 = vst.msk [vmem:[#allocation2 + $0x38] sm:$0xff] %vm1962_vm10, %v1929_v14 }
 0x19c   : > { %v2266_v15 = vpop.permute.xlu1 %2265 }
 0x19d   : > { %v2248_v16 = vpop.permute.xlu0 %2247  ;;  %2299 = vst.msk [vmem:[#allocation2 + $0x78] sm:$0xff] %vm2283_vm11, %v2266_v15 }
 0x19e   : > { %2290 = vst.msk [vmem:[#allocation2 + $0x30] sm:$0xff] %vm2283_vm11, %v2248_v16 }
 0x1a0   : > { %v2445_v17 = vpop.permute.xlu1 %2444 }
 0x1a1   : > { %v2250_v18 = vpop.permute.xlu0 %2249  ;;  %2479 = vst.msk [vmem:[#allocation2 + $0x70] sm:$0xff] %vm2464_vm12, %v2445_v17 }
 0x1a2   : > { %2291 = vst.msk [vmem:[#allocation2 + $0x38] sm:$0xff] %vm2283_vm11, %v2250_v18 }
 0x1a4   : > { %v2447_v19 = vpop.permute.xlu1 %2446 }
 0x1a5   : > { %v2429_v5 = vpop.permute.xlu0 %2428  ;;  %2480 = vst.msk [vmem:[#allocation2 + $0x78] sm:$0xff] %vm2464_vm12, %v2447_v19 }
 0x1a6   : > { %2471 = vst.msk [vmem:[#allocation2 + $0x30] sm:$0xff] %vm2464_vm12, %v2429_v5 }
 0x1a8   : > { %v2990_v23 = vpop.permute.xlu1 %2989 }
 0x1a9   : > { %v2431_v24 = vpop.permute.xlu0 %2430  ;;  %3024 = vst.msk [vmem:[#allocation2 + $0x70] sm:$0xff] %vm3009_vm13, %v2990_v23 }
 0x1aa   : > { %2472 = vst.msk [vmem:[#allocation2 + $0x38] sm:$0xff] %vm2464_vm12, %v2431_v24 }
 0x1ac   : > { %v2992_v25 = vpop.permute.xlu1 %2991 }
 0x1ad   : > { %v2974_v26 = vpop.permute.xlu0 %2973  ;;  %3025 = vst.msk [vmem:[#allocation2 + $0x78] sm:$0xff] %vm3009_vm13, %v2992_v25 }
 0x1ae   : > { %3016 = vst.msk [vmem:[#allocation2 + $0x30] sm:$0xff] %vm3009_vm13, %v2974_v26 }
 0x1b0   : > { %v3311_v22 = vpop.permute.xlu1 %3310 }
 0x1b1   : > { %v2976_v27 = vpop.permute.xlu0 %2975  ;;  %3345 = vst.msk [vmem:[#allocation2 + $0x70] sm:$0xff] %vm3330_vm14, %v3311_v22 }
 0x1b2   : > { %3017 = vst.msk [vmem:[#allocation2 + $0x38] sm:$0xff] %vm3009_vm13, %v2976_v27 }
 0x1b4   : > { %v3313_v28 = vpop.permute.xlu1 %3312 }
 0x1b5   : > { %v3295_v29 = vpop.permute.xlu0 %3294  ;;  %3346 = vst.msk [vmem:[#allocation2 + $0x78] sm:$0xff] %vm3330_vm14, %v3313_v28 }
 0x1b6   : > { %3337 = vst.msk [vmem:[#allocation2 + $0x30] sm:$0xff] %vm3330_vm14, %v3295_v29 }
 0x1b8   : > { %v3361_v30 = vld [vmem:[#allocation2 + $0x70] sm:$0xff] }
 0x1b9   : > { %v3297_v31 = vpop.permute.xlu0 %3296  ;;  %4693 = vmatprep.mubr.msk.bf16.mxu1 %vm3383_vm15, %v3361_v30 }
 0x1ba   : > { %3338 = vst.msk [vmem:[#allocation2 + $0x38] sm:$0xff] %vm3330_vm14, %v3297_v31 }
 0x1bc   : > { %v3362_v32 = vld [vmem:[#allocation2 + $0x78] sm:$0xff] }
 0x1bd   : > { %v3353_v33 = vld [vmem:[#allocation2 + $0x30] sm:$0xff]  ;;  %4694 = vmatmul.mubr.msk.bf16.gmra.mrb[12].mxu1 %vm3383_vm15, %v3362_v32 }
 0x1be   : > { %4677 = vmatprep.mubr.msk.bf16.mxu0 %vm3383_vm15, %v3353_v33 }
 0x1c1   : > { %v3354_v34 = vld [vmem:[#allocation2 + $0x38] sm:$0xff] }
 0x1c2   : > { %4678 = vmatmul.mubr.msk.bf16.gmra.mrb[12].mxu0 %vm3383_vm15, %v3354_v34 }
 0x1c6   : > { %v4667_v35 = vpop.f32.mrb[0].mxu0  ;;  %v4683_v38 = vpop.f32.mrb[0].mxu1 }
 0x1c7   : > { %v3604_v39 = vmul.f32 %v4667_v35, %v6093_v62  ;;  %v3620_v0 = vmul.f32 %v4683_v38, %v6093_v62  ;;  %v3470_v40 = vpop.f32.mrb[1].mxu0  ;;  %v3534_v41 = vpop.f32.mrb[1].mxu1 }
 0x1c8   : > { %v3602_v42 = vmul.f32 %v6093_v62, %v3470_v40  ;;  %v3618_v45 = vmul.f32 %v6093_v62, %v3534_v41  ;;  %v4668_v47 = vpop.f32.mrb[2].mxu0  ;;  %v4684_v48 = vpop.f32.mrb[2].mxu1 }
 0x1c9   : > { %v3641_v49 = vadd.f32 %v6098_v36, %v3604_v39  ;;  %v3657_v50 = vadd.f32 %v6098_v36, %v3620_v0  ;;  %v3605_v51 = vmul.f32 %v4668_v47, %v6093_v62  ;;  %v3621_v52 = vmul.f32 %v4684_v48, %v6093_v62  ;;  %v3473_v53 = vpop.f32.mrb[3].mxu0  ;;  %v3537_v21 = vpop.f32.mrb[3].mxu1 }
 0x1ca   : > { %v3639_v37 = vadd.f32 %v6098_v36, %v3602_v42  ;;  %v3655_v54 = vadd.f32 %v6098_v36, %v3618_v45  ;;  %v3603_v55 = vmul.f32 %v6093_v62, %v3473_v53  ;;  %v3619_v11 = vmul.f32 %v6093_v62, %v3537_v21 }
 0x1cb   : > { %v3642_v57 = vadd.f32 %v6098_v36, %v3605_v51  ;;  %v3658_v46 = vadd.f32 %v6098_v36, %v3621_v52  ;;  %v3673_v43 = vmax.f32 %v3641_v49, 0.0  ;;  %v3689_v20 = vmax.f32 %v3657_v50, 0.0 }
 0x1cc   : > { %v3640_v56 = vadd.f32 %v6098_v36, %v3603_v55  ;;  %v3656_v58 = vadd.f32 %v6098_v36, %v3619_v11  ;;  %v3671_v13 = vmax.f32 %v3639_v37, 0.0  ;;  %v3687_v60 = vmax.f32 %v3655_v54, 0.0 }
 0x1cd   : > { %v3674_v59 = vmax.f32 %v3642_v57, 0.0  ;;  %v3690_v44 = vmax.f32 %v3658_v46, 0.0 }
 0x1ce   : > { %v3672_v61 = vmax.f32 %v3640_v56, 0.0  ;;  %v3688_v63 = vmax.f32 %v3656_v58, 0.0 }
 0x1cf   : > { %v4553_v1 = vpack.c.bf16 %v3674_v59, %v3673_v43  ;;  %v4593_v2 = vpack.c.bf16 %v3690_v44, %v3689_v20 }
 0x1d0   : > { %v4548_v3 = vpack.c.bf16 %v3672_v61, %v3671_v13  ;;  %v4588_v4 = vpack.c.bf16 %v3688_v63, %v3687_v60 }
 0x1d1   : > { %4625 = vst [vmem:[%s6119_s8 + $0x8] sm:$0xff] %v4553_v1   ;;  %4633 = vst [vmem:[%s6119_s8 + $0x48] sm:$0xff] %v4593_v2  }
 0x1d2   : > { %4549 = vst [vmem:[%s6119_s8] sm:$0xff] %v4548_v3   ;;  %4632 = vst [vmem:[%s6119_s8 + $0x40] sm:$0xff] %v4588_v4  }
 0x208   : > { %v4687_v6 = vpop.f32.mrb[4].mxu1 }
 0x209   : > { %v3624_v7 = vmul.f32 %v4687_v6, %v6093_v62  ;;  %v3550_v8 = vpop.f32.mrb[5].mxu1 }
 0x20a   : > { %v4671_v9 = vpop.f32.mrb[4].mxu0  ;;  %v3622_v10 = vmul.f32 %v6093_v62, %v3550_v8  ;;  %v4688_v12 = vpop.f32.mrb[6].mxu1 }
 0x20b   : > { %v3608_v14 = vmul.f32 %v4671_v9, %v6093_v62  ;;  %v3661_v15 = vadd.f32 %v6098_v36, %v3624_v7  ;;  %v3486_v16 = vpop.f32.mrb[5].mxu0  ;;  %v3625_v17 = vmul.f32 %v4688_v12, %v6093_v62  ;;  %v3553_v18 = vpop.f32.mrb[7].mxu1 }
 0x20c   : > { %v3606_v19 = vmul.f32 %v6093_v62, %v3486_v16  ;;  %v3659_v5 = vadd.f32 %v6098_v36, %v3622_v10  ;;  %v4672_v23 = vpop.f32.mrb[6].mxu0  ;;  %v3623_v24 = vmul.f32 %v6093_v62, %v3553_v18 }
 0x20d   : > { %v3645_v25 = vadd.f32 %v6098_v36, %v3608_v14  ;;  %v3609_v26 = vmul.f32 %v4672_v23, %v6093_v62  ;;  %v3662_v22 = vadd.f32 %v6098_v36, %v3625_v17  ;;  %v3489_v27 = vpop.f32.mrb[7].mxu0  ;;  %v3693_v31 = vmax.f32 %v3661_v15, 0.0 }
 0x20e   : > { %v3643_v28 = vadd.f32 %v6098_v36, %v3606_v19  ;;  %v3607_v29 = vmul.f32 %v6093_v62, %v3489_v27  ;;  %v3660_v30 = vadd.f32 %v6098_v36, %v3623_v24  ;;  %v3691_v34 = vmax.f32 %v3659_v5, 0.0 }
 0x20f   : > { %v3646_v32 = vadd.f32 %v6098_v36, %v3609_v26  ;;  %v3694_v33 = vmax.f32 %v3662_v22, 0.0  ;;  %v3677_v39 = vmax.f32 %v3645_v25, 0.0 }
 0x210   : > { %v3644_v35 = vadd.f32 %v6098_v36, %v3607_v29  ;;  %v3692_v38 = vmax.f32 %v3660_v30, 0.0  ;;  %v3675_v41 = vmax.f32 %v3643_v28, 0.0 }
 0x211   : > { %v3678_v0 = vmax.f32 %v3646_v32, 0.0  ;;  %v4603_v40 = vpack.c.bf16 %v3694_v33, %v3693_v31 }
 0x212   : > { %v3676_v42 = vmax.f32 %v3644_v35, 0.0  ;;  %v4598_v45 = vpack.c.bf16 %v3692_v38, %v3691_v34 }
 0x213   : > { %v4563_v47 = vpack.c.bf16 %v3678_v0, %v3677_v39  ;;  %4635 = vst [vmem:[%s6119_s8 + $0x58] sm:$0xff] %v4603_v40  }
 0x214   : > { %v4558_v48 = vpack.c.bf16 %v3676_v42, %v3675_v41  ;;  %4634 = vst [vmem:[%s6119_s8 + $0x50] sm:$0xff] %v4598_v45  }
 0x215   : > { %4627 = vst [vmem:[%s6119_s8 + $0x18] sm:$0xff] %v4563_v47  }
 0x216   : > { %4626 = vst [vmem:[%s6119_s8 + $0x10] sm:$0xff] %v4558_v48  }
 0x251   : > { %v4691_v49 = vpop.f32.mrb[8].mxu1 }
 0x252   : > { %v3628_v50 = vmul.f32 %v4691_v49, %v6093_v62  ;;  %v3566_v51 = vpop.f32.mrb[9].mxu1 }
 0x253   : > { %v4675_v52 = vpop.f32.mrb[8].mxu0  ;;  %v3626_v53 = vmul.f32 %v6093_v62, %v3566_v51  ;;  %v4692_v21 = vpop.f32.mrb[10].mxu1 }
 0x254   : > { %v3612_v37 = vmul.f32 %v4675_v52, %v6093_v62  ;;  %v3665_v54 = vadd.f32 %v6098_v36, %v3628_v50  ;;  %v3502_v55 = vpop.f32.mrb[9].mxu0  ;;  %v3629_v11 = vmul.f32 %v4692_v21, %v6093_v62  ;;  %v3569_v57 = vpop.f32.mrb[11].mxu1 }
 0x255   : > { %v3610_v46 = vmul.f32 %v6093_v62, %v3502_v55  ;;  %v3663_v56 = vadd.f32 %v6098_v36, %v3626_v53  ;;  %v4676_v58 = vpop.f32.mrb[10].mxu0  ;;  %v3627_v43 = vmul.f32 %v6093_v62, %v3569_v57 }
 0x256   : > { %v3649_v20 = vadd.f32 %v6098_v36, %v3612_v37  ;;  %v3613_v59 = vmul.f32 %v4676_v58, %v6093_v62  ;;  %v3666_v44 = vadd.f32 %v6098_v36, %v3629_v11  ;;  %v3505_v13 = vpop.f32.mrb[11].mxu0  ;;  %v3697_v1 = vmax.f32 %v3665_v54, 0.0 }
 0x257   : > { %v3647_v60 = vadd.f32 %v6098_v36, %v3610_v46  ;;  %v3611_v61 = vmul.f32 %v6093_v62, %v3505_v13  ;;  %v3664_v63 = vadd.f32 %v6098_v36, %v3627_v43  ;;  %v3695_v4 = vmax.f32 %v3663_v56, 0.0 }
 0x258   : > { %v3650_v2 = vadd.f32 %v6098_v36, %v3613_v59  ;;  %v3698_v3 = vmax.f32 %v3666_v44, 0.0  ;;  %v3681_v8 = vmax.f32 %v3649_v20, 0.0 }
 0x259   : > { %v3648_v6 = vadd.f32 %v6098_v36, %v3611_v61  ;;  %v3696_v7 = vmax.f32 %v3664_v63, 0.0  ;;  %v3679_v12 = vmax.f32 %v3647_v60, 0.0 }
 0x25a   : > { %v3682_v9 = vmax.f32 %v3650_v2, 0.0  ;;  %v4613_v10 = vpack.c.bf16 %v3698_v3, %v3697_v1 }
 0x25b   : > { %v3680_v14 = vmax.f32 %v3648_v6, 0.0  ;;  %v4608_v15 = vpack.c.bf16 %v3696_v7, %v3695_v4 }
 0x25c   : > { %v4573_v16 = vpack.c.bf16 %v3682_v9, %v3681_v8  ;;  %4637 = vst [vmem:[%s6119_s8 + $0x68] sm:$0xff] %v4613_v10  }
 0x25d   : > { %v4568_v17 = vpack.c.bf16 %v3680_v14, %v3679_v12  ;;  %4636 = vst [vmem:[%s6119_s8 + $0x60] sm:$0xff] %v4608_v15  }
 0x25e   : > { %4629 = vst [vmem:[%s6119_s8 + $0x28] sm:$0xff] %v4573_v16  }
 0x25f   : > { %4628 = vst [vmem:[%s6119_s8 + $0x20] sm:$0xff] %v4568_v17  }
 0x290   : > { %v4695_v18 = vpop.f32.mrb[12].mxu1 }
 0x291   : > { %v3632_v19 = vmul.f32 %v4695_v18, %v6093_v62  ;;  %v3582_v5 = vpop.f32.mrb[13].mxu1 }
 0x292   : > { %v3630_v23 = vmul.f32 %v6093_v62, %v3582_v5  ;;  %v4696_v24 = vpop.f32.mrb[14].mxu1 }
 0x293   : > { %v3669_v25 = vadd.f32 %v6098_v36, %v3632_v19  ;;  %v3633_v26 = vmul.f32 %v4696_v24, %v6093_v62  ;;  %v3585_v22 = vpop.f32.mrb[15].mxu1 }
 0x294   : > { %v3667_v27 = vadd.f32 %v6098_v36, %v3630_v23  ;;  %v3631_v28 = vmul.f32 %v6093_v62, %v3585_v22 }
 0x295   : > { %v4679_v29 = vpop.f32.mrb[12].mxu0  ;;  %v3670_v30 = vadd.f32 %v6098_v36, %v3633_v26  ;;  %v3701_v34 = vmax.f32 %v3669_v25, 0.0 }
 0x296   : > { %v3616_v31 = vmul.f32 %v4679_v29, %v6093_v62  ;;  %v3518_v32 = vpop.f32.mrb[13].mxu0  ;;  %v3668_v33 = vadd.f32 %v6098_v36, %v3631_v28  ;;  %v3699_v40 = vmax.f32 %v3667_v27, 0.0 }
 0x297   : > { %v3614_v35 = vmul.f32 %v6093_v62, %v3518_v32  ;;  %v4680_v38 = vpop.f32.mrb[14].mxu0  ;;  %v3702_v39 = vmax.f32 %v3670_v30, 0.0 }
 0x298   : > { %v3653_v0 = vadd.f32 %v6098_v36, %v3616_v31  ;;  %v3617_v41 = vmul.f32 %v4680_v38, %v6093_v62  ;;  %v3521_v42 = vpop.f32.mrb[15].mxu0  ;;  %v3700_v45 = vmax.f32 %v3668_v33, 0.0 }
 0x299   : > { %v3651_v47 = vadd.f32 %v6098_v36, %v3614_v35  ;;  %v4623_v48 = vpack.c.bf16 %v3702_v39, %v3701_v34  ;;  %v3615_v49 = vmul.f32 %v6093_v62, %v3521_v42 }
 0x29a   : > { %v3654_v50 = vadd.f32 %v6098_v36, %v3617_v41  ;;  %v4618_v51 = vpack.c.bf16 %v3700_v45, %v3699_v40  ;;  %v3685_v53 = vmax.f32 %v3653_v0, 0.0 }
 0x29b   : > { %4639 = vst [vmem:[%s6119_s8 + $0x78] sm:$0xff] %v4623_v48   ;;  %v3652_v52 = vadd.f32 %v6098_v36, %v3615_v49  ;;  %v3683_v37 = vmax.f32 %v3651_v47, 0.0 }
 0x29c   : > { %v3686_v21 = vmax.f32 %v3654_v50, 0.0  ;;  %4638 = vst [vmem:[%s6119_s8 + $0x70] sm:$0xff] %v4618_v51  }
 0x29d   : > { %v3684_v54 = vmax.f32 %v3652_v52, 0.0 }
 0x29e   : > { %v4583_v55 = vpack.c.bf16 %v3686_v21, %v3685_v53 }
 0x29f   : > { %v4578_v62 = vpack.c.bf16 %v3684_v54, %v3683_v37 }
 0x2a0   : > { %4631 = vst [vmem:[%s6119_s8 + $0x38] sm:$0xff] %v4583_v55  }
 0x2a1   : > { %4630 = vst [vmem:[%s6119_s8 + $0x30] sm:$0xff] %v4578_v62  }
 0x2a2   : > { %4834 = shalt.err (!%p4831_p5)
}
 0x2a3   : > { %s4835_s28 = scalar_lea.hbm %s6188_s19, 2048  ;;  %s4839_s4 = scalar_lea.hbm %s6246_s3, 4096 }
 0x2a4   : > { %p4836_p6 = scmp.ne.s32.totalorder %s6188_s19, %s4835_s28  ;;  %p4840_p10 = scmp.lt.u32.totalorder %s6188_s19, %s6246_s3 }
 0x2a5   : > { %p4841_p11 = scmp.lt.u32.totalorder %s4839_s4, %s4835_s28  ;;  %p4843_p13 = scmp.lt.u32.totalorder %s4835_s28, %s6188_s19 }
 0x2a6   : > { %p4837_p7 = pnand %p4836_p6, %p4971_p4 }
 0x2a7   : > { %p4842_p12 = por %p4841_p11, %p4840_p10 }
 0x2a8   : > { %p4838_p9 = pneg %p4837_p7 }
 0x2a9   : > { %p4844_p0 = por %p4843_p13, %p4842_p12 }
 0x2ab   : > { %p4845_p1 = pnand %p4844_p0, %p4838_p9 }
 0x2ad   : > { %4848 = shalt.err (!%p4845_p1)
}
 0x2ae   : > { %s4910_s8 = smov 64  }
 0x2af   : > { %4706 = dma.vmem_to_hbm [thread:$0]  (%p4971_p4), %s6190_s10, 2048, %s6188_s19, %s6196_s15, %s4910_s8, %s4910_s8, %s4903_s6  }
 0x2b0 PF: > { %p4712_p2 = scmp.ge.s32.totalorder %s4899_s17, 2  ;;  %s3895_s9 = sand.u32 1, %s4879_s12  }
 0x2b1   : > { %s3896_s11 = scalar_lea.sflag [#allocation4], %s3895_s9 }
 0x2b2   : > { %p4709_p3 = pnand %p4712_p2, %p4978_p8 }
 0x2b4   : > { %4874 = dma.done.wait (!%p4709_p3), %s3896_s11, 2048  }
 0x2b5   : > { %4876 = vsyncadd (!%p4709_p3), %s3896_s11, 4294965248  ;;  %s16_s17 = sadd.s32 1, %s4899_s17   ;;  %s6253_s12 = smov %s4883_s13 }
 0x2b6   : > { %p13_p5 = scmp.ge.s32.totalorder %s16_s17, 4   ;;  %s6254_s13 = smov %s4887_s14 }
 0x2b7   : > { %s6255_s14 = smov %s4984_s25  ;;  %s6256_s15 = smov %s4895_s16 }
 0x2b8   : > { %s6257_s16 = smov %s6259_s20  ;;  %15 = sbr.rel (!%p13_p5) target bundleno = 4 (0x4), region = 80 }
 0x2bf   :  { %3901 = vsyncpa [#allocation4], 1 }
 0x2c0   :  { %3903 = vsyncpa [#allocation4 + $0x1], 1 }

</bundles_post_ra>
